<compile_context>
chip_gen: v5e
topology: v5e:2x2
jax: 0.10.0
libtpu: 0.0.40
codegen_flags: <defaults>
</compile_context>

<pallas_src>
import jax
import jax.numpy as jnp
from jax.experimental import pallas as pl
from jax.experimental.pallas import tpu as pltpu

# ---- small config consistent with NERModelBase.__init__ ----
B, S = 2, 8                   # batch, words per sentence
MAXC = 16                     # CharEmbedder.MAX (chars per word)
ALPHA_SIZE = 40               # |alphabet| (+ pad id 0)
VOCAB_SIZE = 100              # |vocab|    (+ pad id 0)
CHAR_EMB = 8                  # char_embedding_dim
CHAR_KERNELS = (3, 5)         # char_kerners
CHAR_CHANNELS = (16, 16)      # char_channels
WORD_EMB = 32                 # word embedding length
LSTM_SIZE = 32                # lstm_size
LSTM_LAYERS = 1               # lstm_layers

K3, K5 = CHAR_KERNELS
C3, C5 = CHAR_CHANNELS
L3 = MAXC - K3 + 1            # 14 valid conv positions (k=3)
L5 = MAXC - K5 + 1            # 12 valid conv positions (k=5)
D_FEAT = WORD_EMB + C3 + C5   # 64
H = LSTM_SIZE                 # 32
N_ROWS = S * B                # 16 (time-major rows: index t*B + b)


# ----------------------------------------------------------------------------
# Fused kernel: char CNN (im2col) + feature concat + hoisted input matmul +
# bidirectional masked LSTM recurrence.  Single program, everything in VMEM.
# ----------------------------------------------------------------------------
def _ner_fused_kernel(char_x_ref, word_x_ref, mask_ref,
                      w_unf_ref, b_unf_ref,
                      wih_ref, b_ih_ref, whh_f_ref, whh_b_ref,
                      out_ref):
    # ---- char CNN: one im2col matmul, bias + ReLU, windowed max per branch --
    y = jnp.dot(char_x_ref[...], w_unf_ref[...],
                preferred_element_type=jnp.float32) + b_unf_ref[...]
    y = jnp.maximum(y, 0.0)                          # (N, L3*C3 + L5*C5)

    feat3 = y[:, 0:C3]                               # max over L3 windows
    for l in range(1, L3):
        feat3 = jnp.maximum(feat3, y[:, l * C3:(l + 1) * C3])
    off = L3 * C3
    feat5 = y[:, off:off + C5]                       # max over L5 windows
    for l in range(1, L5):
        feat5 = jnp.maximum(feat5, y[:, off + l * C5:off + (l + 1) * C5])
    char_feats = jnp.concatenate([feat3, feat5], axis=-1)          # (N, 32)

    # ---- word features + hoisted input-side LSTM matmul (both dirs) --------
    feats = jnp.concatenate([word_x_ref[...], char_feats], axis=-1)  # (N, 64)
    gates_in = jnp.dot(feats, wih_ref[...],
                       preferred_element_type=jnp.float32) + b_ih_ref[...]
    # gates_in: (N, 8H); cols [0:4H] forward dir, [4H:8H] backward dir.

    mask_all = mask_ref[...]                         # (N, 1), time-major
    whh_f = whh_f_ref[...]                           # (H, 4H)
    whh_b = whh_b_ref[...]                           # (H, 4H)

    def cell(gin, h, c, whh):
        # gin: (B, 4H) = precomputed input gates + bias for this direction.
        g = gin + jnp.dot(h, whh, preferred_element_type=jnp.float32)
        sg = jax.nn.sigmoid(g)                       # full 128-lane EUP pass
        tg = jnp.tanh(g)                             # full 128-lane EUP pass
        i_g = sg[:, 0:H]
        f_g = sg[:, H:2 * H]
        g_g = tg[:, 2 * H:3 * H]
        o_g = sg[:, 3 * H:4 * H]
        c_new = f_g * c + i_g * g_g
        h_new = o_g * jnp.tanh(c_new)
        return h_new, c_new

    zeros = jnp.zeros((B, H), jnp.float32)
    h_f, c_f = zeros, zeros
    h_b, c_b = zeros, zeros
    out_f = [None] * S
    out_b = [None] * S

    # Fully static unroll; fwd and bwd chains interleaved for ILP.
    for step in range(S):
        tf = step
        tb = S - 1 - step
        m_f = mask_all[tf * B:(tf + 1) * B, :]       # (B, 1)
        m_b = mask_all[tb * B:(tb + 1) * B, :]

        hn, cn = cell(gates_in[tf * B:(tf + 1) * B, 0:4 * H], h_f, c_f, whh_f)
        h_f = m_f * hn + (1.0 - m_f) * h_f
        c_f = m_f * cn + (1.0 - m_f) * c_f
        out_f[tf] = h_f * m_f

        hn, cn = cell(gates_in[tb * B:(tb + 1) * B, 4 * H:8 * H],
                      h_b, c_b, whh_b)
        h_b = m_b * hn + (1.0 - m_b) * h_b
        c_b = m_b * cn + (1.0 - m_b) * c_b
        out_b[tb] = h_b * m_b

    out_f_all = jnp.concatenate(out_f, axis=0)       # (N, H)
    out_b_all = jnp.concatenate(out_b, axis=0)       # (N, H)
    out_ref[...] = jnp.concatenate([out_f_all, out_b_all], axis=-1)  # (N, 2H)


def _unfold_conv_weight(w, maxlen):
    # w: (k, E, C) -> (maxlen*E, L*C) with W[p*E+e, l*C+c] = w[p-l, e, c]
    k, e, c = w.shape
    L = maxlen - k + 1
    W = jnp.zeros((maxlen, e, L, c), w.dtype)
    for l in range(L):
        W = W.at[l:l + k, :, l, :].set(w)
    return W.reshape(maxlen * e, L * c)


# ----------------------------------------------------------------------------
# Parameters (deterministic synthetic init) and forward_lstm glue.
# ----------------------------------------------------------------------------
def init_params(key):
    ks = jax.random.split(key, 8)
    sc = 0.1
    char_table = jax.random.normal(ks[0], (ALPHA_SIZE, CHAR_EMB), jnp.float32) * sc
    char_table = char_table.at[0].set(0.0)     # pad char row
    word_table = jax.random.normal(ks[1], (VOCAB_SIZE, WORD_EMB), jnp.float32) * sc
    word_table = word_table.at[0].set(0.0)     # pad token row
    w3 = jax.random.normal(ks[2], (K3, CHAR_EMB, C3), jnp.float32) * sc
    b3 = jax.random.normal(ks[3], (1, C3), jnp.float32) * sc
    w5 = jax.random.normal(ks[4], (K5, CHAR_EMB, C5), jnp.float32) * sc
    b5 = jax.random.normal(ks[5], (1, C5), jnp.float32) * sc

    layers = []
    layer_key = ks[6]
    in_dim = D_FEAT
    for _ in range(LSTM_LAYERS):
        layer_key, sub = jax.random.split(layer_key)
        kl = jax.random.split(sub, 6)
        layers.append(dict(
            wih_f=jax.random.normal(kl[0], (in_dim, 4 * H), jnp.float32) * sc,
            whh_f=jax.random.normal(kl[1], (H, 4 * H), jnp.float32) * sc,
            b_f=jax.random.normal(kl[2], (1, 4 * H), jnp.float32) * sc,
            wih_b=jax.random.normal(kl[3], (in_dim, 4 * H), jnp.float32) * sc,
            whh_b=jax.random.normal(kl[4], (H, 4 * H), jnp.float32) * sc,
            b_b=jax.random.normal(kl[5], (1, 4 * H), jnp.float32) * sc,
        ))
        in_dim = 2 * H
    return dict(char_table=char_table, word_table=word_table,
                w3=w3, b3=b3, w5=w5, b5=b5, lstm=layers)


@jax.jit
def forward_lstm(params, char_ids, word_ids):
    assert LSTM_LAYERS == 1  # fused kernel covers one BiLSTM layer

    # --- embedding gathers + time-major layout prep (JAX glue, tiny) --------
    char_x = jnp.take(params["char_table"], char_ids, axis=0)   # (B,S,MAXC,E)
    char_x = jnp.transpose(char_x, (1, 0, 2, 3)).reshape(
        N_ROWS, MAXC * CHAR_EMB).astype(jnp.float32)             # (N, 128)
    word_x = jnp.take(params["word_table"], word_ids, axis=0)   # (B,S,WE)
    word_x_tm = jnp.transpose(word_x, (1, 0, 2)).reshape(
        N_ROWS, WORD_EMB).astype(jnp.float32)                    # (N, 32)
    mask = (word_ids != 0).astype(jnp.float32)                   # (B, S)
    mask_tm = jnp.transpose(mask, (1, 0)).reshape(N_ROWS, 1)     # (N, 1)

    # --- parameter prep: im2col conv weights, fused LSTM input weights ------
    w_unf = jnp.concatenate([_unfold_conv_weight(params["w3"], MAXC),
                             _unfold_conv_weight(params["w5"], MAXC)],
                            axis=1)                              # (128, 416)
    b_unf = jnp.concatenate([jnp.tile(params["b3"], (1, L3)),
                             jnp.tile(params["b5"], (1, L5))],
                            axis=1)                              # (1, 416)
    lp = params["lstm"][0]
    wih_all = jnp.concatenate([lp["wih_f"], lp["wih_b"]], axis=1)  # (64, 256)
    b_all = jnp.concatenate([lp["b_f"], lp["b_b"]], axis=1)        # (1, 256)

    vmem = lambda: pl.BlockSpec(memory_space=pltpu.MemorySpace.VMEM)
    out_tm = pl.pallas_call(
        _ner_fused_kernel,
        out_shape=jax.ShapeDtypeStruct((N_ROWS, 2 * H), jnp.float32),
        in_specs=[vmem() for _ in range(9)],
        out_specs=vmem(),
    )(char_x, word_x_tm, mask_tm, w_unf, b_unf, wih_all, b_all,
      lp["whh_f"], lp["whh_b"])

    lstm_out = jnp.transpose(out_tm.reshape(S, B, 2 * H), (1, 0, 2))  # (B,S,2H)
    return lstm_out, mask


if __name__ == "__main__":
    key = jax.random.PRNGKey(0)
    kp, kc, kw = jax.random.split(key, 3)
    params = init_params(kp)

    char_ids = jax.random.randint(kc, (B, S, MAXC), 1, ALPHA_SIZE, dtype=jnp.int32)
    word_ids = jax.random.randint(kw, (B, S), 1, VOCAB_SIZE, dtype=jnp.int32)
    # introduce padding on the last two positions of sentence 1
    word_ids = word_ids.at[1, 6:].set(0)
    char_ids = char_ids.at[1, 6:, :].set(0)

    lstm_out, mask = forward_lstm(params, char_ids, word_ids)
    jax.block_until_ready((lstm_out, mask))
    assert lstm_out.shape == (B, S, 2 * LSTM_SIZE)
    assert mask.shape == (B, S)
    # padded positions must emit zeros (pack_padded semantics)
    assert float(jnp.abs(lstm_out[1, 6:]).max()) == 0.0
    print("KERNEL_OK")
</pallas_src>

<mosaic_0001>
module attributes {stable_mosaic.version = 11 : i64} {
  func.func @_ner_fused_kernel(%arg0: memref<16x128xf32, #tpu.memory_space<vmem>>, %arg1: memref<16x32xf32, #tpu.memory_space<vmem>>, %arg2: memref<16x1xf32, #tpu.memory_space<vmem>>, %arg3: memref<128x416xf32, #tpu.memory_space<vmem>>, %arg4: memref<1x416xf32, #tpu.memory_space<vmem>>, %arg5: memref<64x256xf32, #tpu.memory_space<vmem>>, %arg6: memref<1x256xf32, #tpu.memory_space<vmem>>, %arg7: memref<32x128xf32, #tpu.memory_space<vmem>>, %arg8: memref<32x128xf32, #tpu.memory_space<vmem>>, %arg9: memref<16x64xf32, #tpu.memory_space<vmem>>) attributes {dimension_semantics = [], scalar_prefetch = 0 : i64, scratch_operands = 0 : i64, tpu.core_type = #tpu.core_type<tc>} {
    %c0 = arith.constant 0 : index
    %c0_0 = arith.constant 0 : index
    %0 = vector.load %arg0[%c0, %c0_0] : memref<16x128xf32, #tpu.memory_space<vmem>>, vector<16x128xf32>
    %c0_1 = arith.constant 0 : index
    %c0_2 = arith.constant 0 : index
    %1 = vector.load %arg3[%c0_1, %c0_2] : memref<128x416xf32, #tpu.memory_space<vmem>>, vector<128x416xf32>
    %cst = arith.constant dense<0.000000e+00> : vector<16x416xf32>
    %2 = tpu.matmul %0, %1, %cst {dimension_numbers = #tpu.dot_dimension_numbers<[1], [0], [0], [1], [0, 0, 1, 1], [], []>} : vector<16x128xf32>, vector<128x416xf32>, vector<16x416xf32> -> vector<16x416xf32>
    %c0_3 = arith.constant 0 : index
    %c0_4 = arith.constant 0 : index
    %3 = vector.load %arg4[%c0_3, %c0_4] : memref<1x416xf32, #tpu.memory_space<vmem>>, vector<1x416xf32>
    %4 = vector.broadcast %3 : vector<1x416xf32> to vector<16x416xf32>
    %5 = arith.addf %2, %4 : vector<16x416xf32>
    %cst_5 = arith.constant 0.000000e+00 : f32
    %6 = vector.broadcast %cst_5 : f32 to vector<16x416xf32>
    %7 = arith.maximumf %5, %6 : vector<16x416xf32>
    %8 = vector.extract_strided_slice %7 {offsets = [0, 0], sizes = [16, 16], strides = [1, 1]} : vector<16x416xf32> to vector<16x16xf32>
    %9 = vector.extract_strided_slice %7 {offsets = [0, 16], sizes = [16, 16], strides = [1, 1]} : vector<16x416xf32> to vector<16x16xf32>
    %10 = arith.maximumf %8, %9 : vector<16x16xf32>
    %11 = vector.extract_strided_slice %7 {offsets = [0, 32], sizes = [16, 16], strides = [1, 1]} : vector<16x416xf32> to vector<16x16xf32>
    %12 = arith.maximumf %10, %11 : vector<16x16xf32>
    %13 = vector.extract_strided_slice %7 {offsets = [0, 48], sizes = [16, 16], strides = [1, 1]} : vector<16x416xf32> to vector<16x16xf32>
    %14 = arith.maximumf %12, %13 : vector<16x16xf32>
    %15 = vector.extract_strided_slice %7 {offsets = [0, 64], sizes = [16, 16], strides = [1, 1]} : vector<16x416xf32> to vector<16x16xf32>
    %16 = arith.maximumf %14, %15 : vector<16x16xf32>
    %17 = vector.extract_strided_slice %7 {offsets = [0, 80], sizes = [16, 16], strides = [1, 1]} : vector<16x416xf32> to vector<16x16xf32>
    %18 = arith.maximumf %16, %17 : vector<16x16xf32>
    %19 = vector.extract_strided_slice %7 {offsets = [0, 96], sizes = [16, 16], strides = [1, 1]} : vector<16x416xf32> to vector<16x16xf32>
    %20 = arith.maximumf %18, %19 : vector<16x16xf32>
    %21 = vector.extract_strided_slice %7 {offsets = [0, 112], sizes = [16, 16], strides = [1, 1]} : vector<16x416xf32> to vector<16x16xf32>
    %22 = arith.maximumf %20, %21 : vector<16x16xf32>
    %23 = vector.extract_strided_slice %7 {offsets = [0, 128], sizes = [16, 16], strides = [1, 1]} : vector<16x416xf32> to vector<16x16xf32>
    %24 = arith.maximumf %22, %23 : vector<16x16xf32>
    %25 = vector.extract_strided_slice %7 {offsets = [0, 144], sizes = [16, 16], strides = [1, 1]} : vector<16x416xf32> to vector<16x16xf32>
    %26 = arith.maximumf %24, %25 : vector<16x16xf32>
    %27 = vector.extract_strided_slice %7 {offsets = [0, 160], sizes = [16, 16], strides = [1, 1]} : vector<16x416xf32> to vector<16x16xf32>
    %28 = arith.maximumf %26, %27 : vector<16x16xf32>
    %29 = vector.extract_strided_slice %7 {offsets = [0, 176], sizes = [16, 16], strides = [1, 1]} : vector<16x416xf32> to vector<16x16xf32>
    %30 = arith.maximumf %28, %29 : vector<16x16xf32>
    %31 = vector.extract_strided_slice %7 {offsets = [0, 192], sizes = [16, 16], strides = [1, 1]} : vector<16x416xf32> to vector<16x16xf32>
    %32 = arith.maximumf %30, %31 : vector<16x16xf32>
    %33 = vector.extract_strided_slice %7 {offsets = [0, 208], sizes = [16, 16], strides = [1, 1]} : vector<16x416xf32> to vector<16x16xf32>
    %34 = arith.maximumf %32, %33 : vector<16x16xf32>
    %35 = vector.extract_strided_slice %7 {offsets = [0, 224], sizes = [16, 16], strides = [1, 1]} : vector<16x416xf32> to vector<16x16xf32>
    %36 = vector.extract_strided_slice %7 {offsets = [0, 240], sizes = [16, 16], strides = [1, 1]} : vector<16x416xf32> to vector<16x16xf32>
    %37 = arith.maximumf %35, %36 : vector<16x16xf32>
    %38 = vector.extract_strided_slice %7 {offsets = [0, 256], sizes = [16, 16], strides = [1, 1]} : vector<16x416xf32> to vector<16x16xf32>
    %39 = arith.maximumf %37, %38 : vector<16x16xf32>
    %40 = vector.extract_strided_slice %7 {offsets = [0, 272], sizes = [16, 16], strides = [1, 1]} : vector<16x416xf32> to vector<16x16xf32>
    %41 = arith.maximumf %39, %40 : vector<16x16xf32>
    %42 = vector.extract_strided_slice %7 {offsets = [0, 288], sizes = [16, 16], strides = [1, 1]} : vector<16x416xf32> to vector<16x16xf32>
    %43 = arith.maximumf %41, %42 : vector<16x16xf32>
    %44 = vector.extract_strided_slice %7 {offsets = [0, 304], sizes = [16, 16], strides = [1, 1]} : vector<16x416xf32> to vector<16x16xf32>
    %45 = arith.maximumf %43, %44 : vector<16x16xf32>
    %46 = vector.extract_strided_slice %7 {offsets = [0, 320], sizes = [16, 16], strides = [1, 1]} : vector<16x416xf32> to vector<16x16xf32>
    %47 = arith.maximumf %45, %46 : vector<16x16xf32>
    %48 = vector.extract_strided_slice %7 {offsets = [0, 336], sizes = [16, 16], strides = [1, 1]} : vector<16x416xf32> to vector<16x16xf32>
    %49 = arith.maximumf %47, %48 : vector<16x16xf32>
    %50 = vector.extract_strided_slice %7 {offsets = [0, 352], sizes = [16, 16], strides = [1, 1]} : vector<16x416xf32> to vector<16x16xf32>
    %51 = arith.maximumf %49, %50 : vector<16x16xf32>
    %52 = vector.extract_strided_slice %7 {offsets = [0, 368], sizes = [16, 16], strides = [1, 1]} : vector<16x416xf32> to vector<16x16xf32>
    %53 = arith.maximumf %51, %52 : vector<16x16xf32>
    %54 = vector.extract_strided_slice %7 {offsets = [0, 384], sizes = [16, 16], strides = [1, 1]} : vector<16x416xf32> to vector<16x16xf32>
    %55 = arith.maximumf %53, %54 : vector<16x16xf32>
    %56 = vector.extract_strided_slice %7 {offsets = [0, 400], sizes = [16, 16], strides = [1, 1]} : vector<16x416xf32> to vector<16x16xf32>
    %57 = arith.maximumf %55, %56 : vector<16x16xf32>
    %58 = tpu.concatenate %34, %57 in 1 : vector<16x16xf32>, vector<16x16xf32> -> vector<16x32xf32>
    %c0_6 = arith.constant 0 : index
    %c0_7 = arith.constant 0 : index
    %59 = vector.load %arg1[%c0_6, %c0_7] : memref<16x32xf32, #tpu.memory_space<vmem>>, vector<16x32xf32>
    %60 = tpu.concatenate %59, %58 in 1 : vector<16x32xf32>, vector<16x32xf32> -> vector<16x64xf32>
    %c0_8 = arith.constant 0 : index
    %c0_9 = arith.constant 0 : index
    %61 = vector.load %arg5[%c0_8, %c0_9] : memref<64x256xf32, #tpu.memory_space<vmem>>, vector<64x256xf32>
    %cst_10 = arith.constant dense<0.000000e+00> : vector<16x256xf32>
    %62 = tpu.matmul %60, %61, %cst_10 {dimension_numbers = #tpu.dot_dimension_numbers<[1], [0], [0], [1], [0, 0, 1, 1], [], []>} : vector<16x64xf32>, vector<64x256xf32>, vector<16x256xf32> -> vector<16x256xf32>
    %c0_11 = arith.constant 0 : index
    %c0_12 = arith.constant 0 : index
    %63 = vector.load %arg6[%c0_11, %c0_12] : memref<1x256xf32, #tpu.memory_space<vmem>>, vector<1x256xf32>
    %64 = vector.broadcast %63 : vector<1x256xf32> to vector<16x256xf32>
    %65 = arith.addf %62, %64 : vector<16x256xf32>
    %c0_13 = arith.constant 0 : index
    %c0_14 = arith.constant 0 : index
    %66 = vector.load %arg2[%c0_13, %c0_14] : memref<16x1xf32, #tpu.memory_space<vmem>>, vector<16x1xf32>
    %c0_15 = arith.constant 0 : index
    %c0_16 = arith.constant 0 : index
    %67 = vector.load %arg7[%c0_15, %c0_16] : memref<32x128xf32, #tpu.memory_space<vmem>>, vector<32x128xf32>
    %c0_17 = arith.constant 0 : index
    %c0_18 = arith.constant 0 : index
    %68 = vector.load %arg8[%c0_17, %c0_18] : memref<32x128xf32, #tpu.memory_space<vmem>>, vector<32x128xf32>
    %cst_19 = arith.constant 0.000000e+00 : f32
    %69 = vector.broadcast %cst_19 : f32 to vector<2x32xf32>
    %70 = vector.extract_strided_slice %66 {offsets = [0, 0], sizes = [2, 1], strides = [1, 1]} : vector<16x1xf32> to vector<2x1xf32>
    %71 = vector.extract_strided_slice %66 {offsets = [14, 0], sizes = [2, 1], strides = [1, 1]} : vector<16x1xf32> to vector<2x1xf32>
    %72 = vector.extract_strided_slice %65 {offsets = [0, 0], sizes = [2, 128], strides = [1, 1]} : vector<16x256xf32> to vector<2x128xf32>
    %cst_20 = arith.constant dense<0.000000e+00> : vector<2x128xf32>
    %73 = tpu.matmul %69, %67, %cst_20 {dimension_numbers = #tpu.dot_dimension_numbers<[1], [0], [0], [1], [0, 0, 1, 1], [], []>} : vector<2x32xf32>, vector<32x128xf32>, vector<2x128xf32> -> vector<2x128xf32>
    %74 = arith.addf %72, %73 : vector<2x128xf32>
    %75 = arith.negf %74 : vector<2x128xf32>
    %76 = math.exp %75 : vector<2x128xf32>
    %cst_21 = arith.constant 1.000000e+00 : f32
    %77 = vector.broadcast %cst_21 : f32 to vector<2x128xf32>
    %78 = arith.addf %77, %76 : vector<2x128xf32>
    %79 = arith.divf %77, %78 : vector<2x128xf32>
    %80 = math.tanh %74 : vector<2x128xf32>
    %81 = vector.extract_strided_slice %79 {offsets = [0, 0], sizes = [2, 32], strides = [1, 1]} : vector<2x128xf32> to vector<2x32xf32>
    %82 = vector.extract_strided_slice %79 {offsets = [0, 32], sizes = [2, 32], strides = [1, 1]} : vector<2x128xf32> to vector<2x32xf32>
    %83 = vector.extract_strided_slice %80 {offsets = [0, 64], sizes = [2, 32], strides = [1, 1]} : vector<2x128xf32> to vector<2x32xf32>
    %84 = vector.extract_strided_slice %79 {offsets = [0, 96], sizes = [2, 32], strides = [1, 1]} : vector<2x128xf32> to vector<2x32xf32>
    %85 = arith.mulf %82, %69 : vector<2x32xf32>
    %86 = arith.mulf %81, %83 : vector<2x32xf32>
    %87 = arith.addf %85, %86 : vector<2x32xf32>
    %88 = math.tanh %87 : vector<2x32xf32>
    %89 = arith.mulf %84, %88 : vector<2x32xf32>
    %90 = vector.broadcast %70 : vector<2x1xf32> to vector<2x32xf32>
    %91 = arith.mulf %90, %89 : vector<2x32xf32>
    %cst_22 = arith.constant 1.000000e+00 : f32
    %92 = vector.broadcast %cst_22 : f32 to vector<2x1xf32>
    %93 = arith.subf %92, %70 : vector<2x1xf32>
    %94 = vector.broadcast %93 : vector<2x1xf32> to vector<2x32xf32>
    %95 = arith.mulf %94, %69 : vector<2x32xf32>
    %96 = arith.addf %91, %95 : vector<2x32xf32>
    %97 = vector.broadcast %70 : vector<2x1xf32> to vector<2x32xf32>
    %98 = arith.mulf %97, %87 : vector<2x32xf32>
    %cst_23 = arith.constant 1.000000e+00 : f32
    %99 = vector.broadcast %cst_23 : f32 to vector<2x1xf32>
    %100 = arith.subf %99, %70 : vector<2x1xf32>
    %101 = vector.broadcast %100 : vector<2x1xf32> to vector<2x32xf32>
    %102 = arith.mulf %101, %69 : vector<2x32xf32>
    %103 = arith.addf %98, %102 : vector<2x32xf32>
    %104 = vector.broadcast %70 : vector<2x1xf32> to vector<2x32xf32>
    %105 = arith.mulf %96, %104 : vector<2x32xf32>
    %106 = vector.extract_strided_slice %65 {offsets = [14, 128], sizes = [2, 128], strides = [1, 1]} : vector<16x256xf32> to vector<2x128xf32>
    %cst_24 = arith.constant dense<0.000000e+00> : vector<2x128xf32>
    %107 = tpu.matmul %69, %68, %cst_24 {dimension_numbers = #tpu.dot_dimension_numbers<[1], [0], [0], [1], [0, 0, 1, 1], [], []>} : vector<2x32xf32>, vector<32x128xf32>, vector<2x128xf32> -> vector<2x128xf32>
    %108 = arith.addf %106, %107 : vector<2x128xf32>
    %109 = arith.negf %108 : vector<2x128xf32>
    %110 = math.exp %109 : vector<2x128xf32>
    %cst_25 = arith.constant 1.000000e+00 : f32
    %111 = vector.broadcast %cst_25 : f32 to vector<2x128xf32>
    %112 = arith.addf %111, %110 : vector<2x128xf32>
    %113 = arith.divf %111, %112 : vector<2x128xf32>
    %114 = math.tanh %108 : vector<2x128xf32>
    %115 = vector.extract_strided_slice %113 {offsets = [0, 0], sizes = [2, 32], strides = [1, 1]} : vector<2x128xf32> to vector<2x32xf32>
    %116 = vector.extract_strided_slice %113 {offsets = [0, 32], sizes = [2, 32], strides = [1, 1]} : vector<2x128xf32> to vector<2x32xf32>
    %117 = vector.extract_strided_slice %114 {offsets = [0, 64], sizes = [2, 32], strides = [1, 1]} : vector<2x128xf32> to vector<2x32xf32>
    %118 = vector.extract_strided_slice %113 {offsets = [0, 96], sizes = [2, 32], strides = [1, 1]} : vector<2x128xf32> to vector<2x32xf32>
    %119 = arith.mulf %116, %69 : vector<2x32xf32>
    %120 = arith.mulf %115, %117 : vector<2x32xf32>
    %121 = arith.addf %119, %120 : vector<2x32xf32>
    %122 = math.tanh %121 : vector<2x32xf32>
    %123 = arith.mulf %118, %122 : vector<2x32xf32>
    %124 = vector.broadcast %71 : vector<2x1xf32> to vector<2x32xf32>
    %125 = arith.mulf %124, %123 : vector<2x32xf32>
    %cst_26 = arith.constant 1.000000e+00 : f32
    %126 = vector.broadcast %cst_26 : f32 to vector<2x1xf32>
    %127 = arith.subf %126, %71 : vector<2x1xf32>
    %128 = vector.broadcast %127 : vector<2x1xf32> to vector<2x32xf32>
    %129 = arith.mulf %128, %69 : vector<2x32xf32>
    %130 = arith.addf %125, %129 : vector<2x32xf32>
    %131 = vector.broadcast %71 : vector<2x1xf32> to vector<2x32xf32>
    %132 = arith.mulf %131, %121 : vector<2x32xf32>
    %cst_27 = arith.constant 1.000000e+00 : f32
    %133 = vector.broadcast %cst_27 : f32 to vector<2x1xf32>
    %134 = arith.subf %133, %71 : vector<2x1xf32>
    %135 = vector.broadcast %134 : vector<2x1xf32> to vector<2x32xf32>
    %136 = arith.mulf %135, %69 : vector<2x32xf32>
    %137 = arith.addf %132, %136 : vector<2x32xf32>
    %138 = vector.broadcast %71 : vector<2x1xf32> to vector<2x32xf32>
    %139 = arith.mulf %130, %138 : vector<2x32xf32>
    %140 = vector.extract_strided_slice %66 {offsets = [2, 0], sizes = [2, 1], strides = [1, 1]} : vector<16x1xf32> to vector<2x1xf32>
    %141 = vector.extract_strided_slice %66 {offsets = [12, 0], sizes = [2, 1], strides = [1, 1]} : vector<16x1xf32> to vector<2x1xf32>
    %142 = vector.extract_strided_slice %65 {offsets = [2, 0], sizes = [2, 128], strides = [1, 1]} : vector<16x256xf32> to vector<2x128xf32>
    %cst_28 = arith.constant dense<0.000000e+00> : vector<2x128xf32>
    %143 = tpu.matmul %96, %67, %cst_28 {dimension_numbers = #tpu.dot_dimension_numbers<[1], [0], [0], [1], [0, 0, 1, 1], [], []>} : vector<2x32xf32>, vector<32x128xf32>, vector<2x128xf32> -> vector<2x128xf32>
    %144 = arith.addf %142, %143 : vector<2x128xf32>
    %145 = arith.negf %144 : vector<2x128xf32>
    %146 = math.exp %145 : vector<2x128xf32>
    %cst_29 = arith.constant 1.000000e+00 : f32
    %147 = vector.broadcast %cst_29 : f32 to vector<2x128xf32>
    %148 = arith.addf %147, %146 : vector<2x128xf32>
    %149 = arith.divf %147, %148 : vector<2x128xf32>
    %150 = math.tanh %144 : vector<2x128xf32>
    %151 = vector.extract_strided_slice %149 {offsets = [0, 0], sizes = [2, 32], strides = [1, 1]} : vector<2x128xf32> to vector<2x32xf32>
    %152 = vector.extract_strided_slice %149 {offsets = [0, 32], sizes = [2, 32], strides = [1, 1]} : vector<2x128xf32> to vector<2x32xf32>
    %153 = vector.extract_strided_slice %150 {offsets = [0, 64], sizes = [2, 32], strides = [1, 1]} : vector<2x128xf32> to vector<2x32xf32>
    %154 = vector.extract_strided_slice %149 {offsets = [0, 96], sizes = [2, 32], strides = [1, 1]} : vector<2x128xf32> to vector<2x32xf32>
    %155 = arith.mulf %152, %103 : vector<2x32xf32>
    %156 = arith.mulf %151, %153 : vector<2x32xf32>
    %157 = arith.addf %155, %156 : vector<2x32xf32>
    %158 = math.tanh %157 : vector<2x32xf32>
    %159 = arith.mulf %154, %158 : vector<2x32xf32>
    %160 = vector.broadcast %140 : vector<2x1xf32> to vector<2x32xf32>
    %161 = arith.mulf %160, %159 : vector<2x32xf32>
    %cst_30 = arith.constant 1.000000e+00 : f32
    %162 = vector.broadcast %cst_30 : f32 to vector<2x1xf32>
    %163 = arith.subf %162, %140 : vector<2x1xf32>
    %164 = vector.broadcast %163 : vector<2x1xf32> to vector<2x32xf32>
    %165 = arith.mulf %164, %96 : vector<2x32xf32>
    %166 = arith.addf %161, %165 : vector<2x32xf32>
    %167 = vector.broadcast %140 : vector<2x1xf32> to vector<2x32xf32>
    %168 = arith.mulf %167, %157 : vector<2x32xf32>
    %cst_31 = arith.constant 1.000000e+00 : f32
    %169 = vector.broadcast %cst_31 : f32 to vector<2x1xf32>
    %170 = arith.subf %169, %140 : vector<2x1xf32>
    %171 = vector.broadcast %170 : vector<2x1xf32> to vector<2x32xf32>
    %172 = arith.mulf %171, %103 : vector<2x32xf32>
    %173 = arith.addf %168, %172 : vector<2x32xf32>
    %174 = vector.broadcast %140 : vector<2x1xf32> to vector<2x32xf32>
    %175 = arith.mulf %166, %174 : vector<2x32xf32>
    %176 = vector.extract_strided_slice %65 {offsets = [12, 128], sizes = [2, 128], strides = [1, 1]} : vector<16x256xf32> to vector<2x128xf32>
    %cst_32 = arith.constant dense<0.000000e+00> : vector<2x128xf32>
    %177 = tpu.matmul %130, %68, %cst_32 {dimension_numbers = #tpu.dot_dimension_numbers<[1], [0], [0], [1], [0, 0, 1, 1], [], []>} : vector<2x32xf32>, vector<32x128xf32>, vector<2x128xf32> -> vector<2x128xf32>
    %178 = arith.addf %176, %177 : vector<2x128xf32>
    %179 = arith.negf %178 : vector<2x128xf32>
    %180 = math.exp %179 : vector<2x128xf32>
    %cst_33 = arith.constant 1.000000e+00 : f32
    %181 = vector.broadcast %cst_33 : f32 to vector<2x128xf32>
    %182 = arith.addf %181, %180 : vector<2x128xf32>
    %183 = arith.divf %181, %182 : vector<2x128xf32>
    %184 = math.tanh %178 : vector<2x128xf32>
    %185 = vector.extract_strided_slice %183 {offsets = [0, 0], sizes = [2, 32], strides = [1, 1]} : vector<2x128xf32> to vector<2x32xf32>
    %186 = vector.extract_strided_slice %183 {offsets = [0, 32], sizes = [2, 32], strides = [1, 1]} : vector<2x128xf32> to vector<2x32xf32>
    %187 = vector.extract_strided_slice %184 {offsets = [0, 64], sizes = [2, 32], strides = [1, 1]} : vector<2x128xf32> to vector<2x32xf32>
    %188 = vector.extract_strided_slice %183 {offsets = [0, 96], sizes = [2, 32], strides = [1, 1]} : vector<2x128xf32> to vector<2x32xf32>
    %189 = arith.mulf %186, %137 : vector<2x32xf32>
    %190 = arith.mulf %185, %187 : vector<2x32xf32>
    %191 = arith.addf %189, %190 : vector<2x32xf32>
    %192 = math.tanh %191 : vector<2x32xf32>
    %193 = arith.mulf %188, %192 : vector<2x32xf32>
    %194 = vector.broadcast %141 : vector<2x1xf32> to vector<2x32xf32>
    %195 = arith.mulf %194, %193 : vector<2x32xf32>
    %cst_34 = arith.constant 1.000000e+00 : f32
    %196 = vector.broadcast %cst_34 : f32 to vector<2x1xf32>
    %197 = arith.subf %196, %141 : vector<2x1xf32>
    %198 = vector.broadcast %197 : vector<2x1xf32> to vector<2x32xf32>
    %199 = arith.mulf %198, %130 : vector<2x32xf32>
    %200 = arith.addf %195, %199 : vector<2x32xf32>
    %201 = vector.broadcast %141 : vector<2x1xf32> to vector<2x32xf32>
    %202 = arith.mulf %201, %191 : vector<2x32xf32>
    %cst_35 = arith.constant 1.000000e+00 : f32
    %203 = vector.broadcast %cst_35 : f32 to vector<2x1xf32>
    %204 = arith.subf %203, %141 : vector<2x1xf32>
    %205 = vector.broadcast %204 : vector<2x1xf32> to vector<2x32xf32>
    %206 = arith.mulf %205, %137 : vector<2x32xf32>
    %207 = arith.addf %202, %206 : vector<2x32xf32>
    %208 = vector.broadcast %141 : vector<2x1xf32> to vector<2x32xf32>
    %209 = arith.mulf %200, %208 : vector<2x32xf32>
    %210 = vector.extract_strided_slice %66 {offsets = [4, 0], sizes = [2, 1], strides = [1, 1]} : vector<16x1xf32> to vector<2x1xf32>
    %211 = vector.extract_strided_slice %66 {offsets = [10, 0], sizes = [2, 1], strides = [1, 1]} : vector<16x1xf32> to vector<2x1xf32>
    %212 = vector.extract_strided_slice %65 {offsets = [4, 0], sizes = [2, 128], strides = [1, 1]} : vector<16x256xf32> to vector<2x128xf32>
    %cst_36 = arith.constant dense<0.000000e+00> : vector<2x128xf32>
    %213 = tpu.matmul %166, %67, %cst_36 {dimension_numbers = #tpu.dot_dimension_numbers<[1], [0], [0], [1], [0, 0, 1, 1], [], []>} : vector<2x32xf32>, vector<32x128xf32>, vector<2x128xf32> -> vector<2x128xf32>
    %214 = arith.addf %212, %213 : vector<2x128xf32>
    %215 = arith.negf %214 : vector<2x128xf32>
    %216 = math.exp %215 : vector<2x128xf32>
    %cst_37 = arith.constant 1.000000e+00 : f32
    %217 = vector.broadcast %cst_37 : f32 to vector<2x128xf32>
    %218 = arith.addf %217, %216 : vector<2x128xf32>
    %219 = arith.divf %217, %218 : vector<2x128xf32>
    %220 = math.tanh %214 : vector<2x128xf32>
    %221 = vector.extract_strided_slice %219 {offsets = [0, 0], sizes = [2, 32], strides = [1, 1]} : vector<2x128xf32> to vector<2x32xf32>
    %222 = vector.extract_strided_slice %219 {offsets = [0, 32], sizes = [2, 32], strides = [1, 1]} : vector<2x128xf32> to vector<2x32xf32>
    %223 = vector.extract_strided_slice %220 {offsets = [0, 64], sizes = [2, 32], strides = [1, 1]} : vector<2x128xf32> to vector<2x32xf32>
    %224 = vector.extract_strided_slice %219 {offsets = [0, 96], sizes = [2, 32], strides = [1, 1]} : vector<2x128xf32> to vector<2x32xf32>
    %225 = arith.mulf %222, %173 : vector<2x32xf32>
    %226 = arith.mulf %221, %223 : vector<2x32xf32>
    %227 = arith.addf %225, %226 : vector<2x32xf32>
    %228 = math.tanh %227 : vector<2x32xf32>
    %229 = arith.mulf %224, %228 : vector<2x32xf32>
    %230 = vector.broadcast %210 : vector<2x1xf32> to vector<2x32xf32>
    %231 = arith.mulf %230, %229 : vector<2x32xf32>
    %cst_38 = arith.constant 1.000000e+00 : f32
    %232 = vector.broadcast %cst_38 : f32 to vector<2x1xf32>
    %233 = arith.subf %232, %210 : vector<2x1xf32>
    %234 = vector.broadcast %233 : vector<2x1xf32> to vector<2x32xf32>
    %235 = arith.mulf %234, %166 : vector<2x32xf32>
    %236 = arith.addf %231, %235 : vector<2x32xf32>
    %237 = vector.broadcast %210 : vector<2x1xf32> to vector<2x32xf32>
    %238 = arith.mulf %237, %227 : vector<2x32xf32>
    %cst_39 = arith.constant 1.000000e+00 : f32
    %239 = vector.broadcast %cst_39 : f32 to vector<2x1xf32>
    %240 = arith.subf %239, %210 : vector<2x1xf32>
    %241 = vector.broadcast %240 : vector<2x1xf32> to vector<2x32xf32>
    %242 = arith.mulf %241, %173 : vector<2x32xf32>
    %243 = arith.addf %238, %242 : vector<2x32xf32>
    %244 = vector.broadcast %210 : vector<2x1xf32> to vector<2x32xf32>
    %245 = arith.mulf %236, %244 : vector<2x32xf32>
    %246 = vector.extract_strided_slice %65 {offsets = [10, 128], sizes = [2, 128], strides = [1, 1]} : vector<16x256xf32> to vector<2x128xf32>
    %cst_40 = arith.constant dense<0.000000e+00> : vector<2x128xf32>
    %247 = tpu.matmul %200, %68, %cst_40 {dimension_numbers = #tpu.dot_dimension_numbers<[1], [0], [0], [1], [0, 0, 1, 1], [], []>} : vector<2x32xf32>, vector<32x128xf32>, vector<2x128xf32> -> vector<2x128xf32>
    %248 = arith.addf %246, %247 : vector<2x128xf32>
    %249 = arith.negf %248 : vector<2x128xf32>
    %250 = math.exp %249 : vector<2x128xf32>
    %cst_41 = arith.constant 1.000000e+00 : f32
    %251 = vector.broadcast %cst_41 : f32 to vector<2x128xf32>
    %252 = arith.addf %251, %250 : vector<2x128xf32>
    %253 = arith.divf %251, %252 : vector<2x128xf32>
    %254 = math.tanh %248 : vector<2x128xf32>
    %255 = vector.extract_strided_slice %253 {offsets = [0, 0], sizes = [2, 32], strides = [1, 1]} : vector<2x128xf32> to vector<2x32xf32>
    %256 = vector.extract_strided_slice %253 {offsets = [0, 32], sizes = [2, 32], strides = [1, 1]} : vector<2x128xf32> to vector<2x32xf32>
    %257 = vector.extract_strided_slice %254 {offsets = [0, 64], sizes = [2, 32], strides = [1, 1]} : vector<2x128xf32> to vector<2x32xf32>
    %258 = vector.extract_strided_slice %253 {offsets = [0, 96], sizes = [2, 32], strides = [1, 1]} : vector<2x128xf32> to vector<2x32xf32>
    %259 = arith.mulf %256, %207 : vector<2x32xf32>
    %260 = arith.mulf %255, %257 : vector<2x32xf32>
    %261 = arith.addf %259, %260 : vector<2x32xf32>
    %262 = math.tanh %261 : vector<2x32xf32>
    %263 = arith.mulf %258, %262 : vector<2x32xf32>
    %264 = vector.broadcast %211 : vector<2x1xf32> to vector<2x32xf32>
    %265 = arith.mulf %264, %263 : vector<2x32xf32>
    %cst_42 = arith.constant 1.000000e+00 : f32
    %266 = vector.broadcast %cst_42 : f32 to vector<2x1xf32>
    %267 = arith.subf %266, %211 : vector<2x1xf32>
    %268 = vector.broadcast %267 : vector<2x1xf32> to vector<2x32xf32>
    %269 = arith.mulf %268, %200 : vector<2x32xf32>
    %270 = arith.addf %265, %269 : vector<2x32xf32>
    %271 = vector.broadcast %211 : vector<2x1xf32> to vector<2x32xf32>
    %272 = arith.mulf %271, %261 : vector<2x32xf32>
    %cst_43 = arith.constant 1.000000e+00 : f32
    %273 = vector.broadcast %cst_43 : f32 to vector<2x1xf32>
    %274 = arith.subf %273, %211 : vector<2x1xf32>
    %275 = vector.broadcast %274 : vector<2x1xf32> to vector<2x32xf32>
    %276 = arith.mulf %275, %207 : vector<2x32xf32>
    %277 = arith.addf %272, %276 : vector<2x32xf32>
    %278 = vector.broadcast %211 : vector<2x1xf32> to vector<2x32xf32>
    %279 = arith.mulf %270, %278 : vector<2x32xf32>
    %280 = vector.extract_strided_slice %66 {offsets = [6, 0], sizes = [2, 1], strides = [1, 1]} : vector<16x1xf32> to vector<2x1xf32>
    %281 = vector.extract_strided_slice %66 {offsets = [8, 0], sizes = [2, 1], strides = [1, 1]} : vector<16x1xf32> to vector<2x1xf32>
    %282 = vector.extract_strided_slice %65 {offsets = [6, 0], sizes = [2, 128], strides = [1, 1]} : vector<16x256xf32> to vector<2x128xf32>
    %cst_44 = arith.constant dense<0.000000e+00> : vector<2x128xf32>
    %283 = tpu.matmul %236, %67, %cst_44 {dimension_numbers = #tpu.dot_dimension_numbers<[1], [0], [0], [1], [0, 0, 1, 1], [], []>} : vector<2x32xf32>, vector<32x128xf32>, vector<2x128xf32> -> vector<2x128xf32>
    %284 = arith.addf %282, %283 : vector<2x128xf32>
    %285 = arith.negf %284 : vector<2x128xf32>
    %286 = math.exp %285 : vector<2x128xf32>
    %cst_45 = arith.constant 1.000000e+00 : f32
    %287 = vector.broadcast %cst_45 : f32 to vector<2x128xf32>
    %288 = arith.addf %287, %286 : vector<2x128xf32>
    %289 = arith.divf %287, %288 : vector<2x128xf32>
    %290 = math.tanh %284 : vector<2x128xf32>
    %291 = vector.extract_strided_slice %289 {offsets = [0, 0], sizes = [2, 32], strides = [1, 1]} : vector<2x128xf32> to vector<2x32xf32>
    %292 = vector.extract_strided_slice %289 {offsets = [0, 32], sizes = [2, 32], strides = [1, 1]} : vector<2x128xf32> to vector<2x32xf32>
    %293 = vector.extract_strided_slice %290 {offsets = [0, 64], sizes = [2, 32], strides = [1, 1]} : vector<2x128xf32> to vector<2x32xf32>
    %294 = vector.extract_strided_slice %289 {offsets = [0, 96], sizes = [2, 32], strides = [1, 1]} : vector<2x128xf32> to vector<2x32xf32>
    %295 = arith.mulf %292, %243 : vector<2x32xf32>
    %296 = arith.mulf %291, %293 : vector<2x32xf32>
    %297 = arith.addf %295, %296 : vector<2x32xf32>
    %298 = math.tanh %297 : vector<2x32xf32>
    %299 = arith.mulf %294, %298 : vector<2x32xf32>
    %300 = vector.broadcast %280 : vector<2x1xf32> to vector<2x32xf32>
    %301 = arith.mulf %300, %299 : vector<2x32xf32>
    %cst_46 = arith.constant 1.000000e+00 : f32
    %302 = vector.broadcast %cst_46 : f32 to vector<2x1xf32>
    %303 = arith.subf %302, %280 : vector<2x1xf32>
    %304 = vector.broadcast %303 : vector<2x1xf32> to vector<2x32xf32>
    %305 = arith.mulf %304, %236 : vector<2x32xf32>
    %306 = arith.addf %301, %305 : vector<2x32xf32>
    %307 = vector.broadcast %280 : vector<2x1xf32> to vector<2x32xf32>
    %308 = arith.mulf %307, %297 : vector<2x32xf32>
    %cst_47 = arith.constant 1.000000e+00 : f32
    %309 = vector.broadcast %cst_47 : f32 to vector<2x1xf32>
    %310 = arith.subf %309, %280 : vector<2x1xf32>
    %311 = vector.broadcast %310 : vector<2x1xf32> to vector<2x32xf32>
    %312 = arith.mulf %311, %243 : vector<2x32xf32>
    %313 = arith.addf %308, %312 : vector<2x32xf32>
    %314 = vector.broadcast %280 : vector<2x1xf32> to vector<2x32xf32>
    %315 = arith.mulf %306, %314 : vector<2x32xf32>
    %316 = vector.extract_strided_slice %65 {offsets = [8, 128], sizes = [2, 128], strides = [1, 1]} : vector<16x256xf32> to vector<2x128xf32>
    %cst_48 = arith.constant dense<0.000000e+00> : vector<2x128xf32>
    %317 = tpu.matmul %270, %68, %cst_48 {dimension_numbers = #tpu.dot_dimension_numbers<[1], [0], [0], [1], [0, 0, 1, 1], [], []>} : vector<2x32xf32>, vector<32x128xf32>, vector<2x128xf32> -> vector<2x128xf32>
    %318 = arith.addf %316, %317 : vector<2x128xf32>
    %319 = arith.negf %318 : vector<2x128xf32>
    %320 = math.exp %319 : vector<2x128xf32>
    %cst_49 = arith.constant 1.000000e+00 : f32
    %321 = vector.broadcast %cst_49 : f32 to vector<2x128xf32>
    %322 = arith.addf %321, %320 : vector<2x128xf32>
    %323 = arith.divf %321, %322 : vector<2x128xf32>
    %324 = math.tanh %318 : vector<2x128xf32>
    %325 = vector.extract_strided_slice %323 {offsets = [0, 0], sizes = [2, 32], strides = [1, 1]} : vector<2x128xf32> to vector<2x32xf32>
    %326 = vector.extract_strided_slice %323 {offsets = [0, 32], sizes = [2, 32], strides = [1, 1]} : vector<2x128xf32> to vector<2x32xf32>
    %327 = vector.extract_strided_slice %324 {offsets = [0, 64], sizes = [2, 32], strides = [1, 1]} : vector<2x128xf32> to vector<2x32xf32>
    %328 = vector.extract_strided_slice %323 {offsets = [0, 96], sizes = [2, 32], strides = [1, 1]} : vector<2x128xf32> to vector<2x32xf32>
    %329 = arith.mulf %326, %277 : vector<2x32xf32>
    %330 = arith.mulf %325, %327 : vector<2x32xf32>
    %331 = arith.addf %329, %330 : vector<2x32xf32>
    %332 = math.tanh %331 : vector<2x32xf32>
    %333 = arith.mulf %328, %332 : vector<2x32xf32>
    %334 = vector.broadcast %281 : vector<2x1xf32> to vector<2x32xf32>
    %335 = arith.mulf %334, %333 : vector<2x32xf32>
    %cst_50 = arith.constant 1.000000e+00 : f32
    %336 = vector.broadcast %cst_50 : f32 to vector<2x1xf32>
    %337 = arith.subf %336, %281 : vector<2x1xf32>
    %338 = vector.broadcast %337 : vector<2x1xf32> to vector<2x32xf32>
    %339 = arith.mulf %338, %270 : vector<2x32xf32>
    %340 = arith.addf %335, %339 : vector<2x32xf32>
    %341 = vector.broadcast %281 : vector<2x1xf32> to vector<2x32xf32>
    %342 = arith.mulf %341, %331 : vector<2x32xf32>
    %cst_51 = arith.constant 1.000000e+00 : f32
    %343 = vector.broadcast %cst_51 : f32 to vector<2x1xf32>
    %344 = arith.subf %343, %281 : vector<2x1xf32>
    %345 = vector.broadcast %344 : vector<2x1xf32> to vector<2x32xf32>
    %346 = arith.mulf %345, %277 : vector<2x32xf32>
    %347 = arith.addf %342, %346 : vector<2x32xf32>
    %348 = vector.broadcast %281 : vector<2x1xf32> to vector<2x32xf32>
    %349 = arith.mulf %340, %348 : vector<2x32xf32>
    %350 = vector.extract_strided_slice %66 {offsets = [8, 0], sizes = [2, 1], strides = [1, 1]} : vector<16x1xf32> to vector<2x1xf32>
    %351 = vector.extract_strided_slice %66 {offsets = [6, 0], sizes = [2, 1], strides = [1, 1]} : vector<16x1xf32> to vector<2x1xf32>
    %352 = vector.extract_strided_slice %65 {offsets = [8, 0], sizes = [2, 128], strides = [1, 1]} : vector<16x256xf32> to vector<2x128xf32>
    %cst_52 = arith.constant dense<0.000000e+00> : vector<2x128xf32>
    %353 = tpu.matmul %306, %67, %cst_52 {dimension_numbers = #tpu.dot_dimension_numbers<[1], [0], [0], [1], [0, 0, 1, 1], [], []>} : vector<2x32xf32>, vector<32x128xf32>, vector<2x128xf32> -> vector<2x128xf32>
    %354 = arith.addf %352, %353 : vector<2x128xf32>
    %355 = arith.negf %354 : vector<2x128xf32>
    %356 = math.exp %355 : vector<2x128xf32>
    %cst_53 = arith.constant 1.000000e+00 : f32
    %357 = vector.broadcast %cst_53 : f32 to vector<2x128xf32>
    %358 = arith.addf %357, %356 : vector<2x128xf32>
    %359 = arith.divf %357, %358 : vector<2x128xf32>
    %360 = math.tanh %354 : vector<2x128xf32>
    %361 = vector.extract_strided_slice %359 {offsets = [0, 0], sizes = [2, 32], strides = [1, 1]} : vector<2x128xf32> to vector<2x32xf32>
    %362 = vector.extract_strided_slice %359 {offsets = [0, 32], sizes = [2, 32], strides = [1, 1]} : vector<2x128xf32> to vector<2x32xf32>
    %363 = vector.extract_strided_slice %360 {offsets = [0, 64], sizes = [2, 32], strides = [1, 1]} : vector<2x128xf32> to vector<2x32xf32>
    %364 = vector.extract_strided_slice %359 {offsets = [0, 96], sizes = [2, 32], strides = [1, 1]} : vector<2x128xf32> to vector<2x32xf32>
    %365 = arith.mulf %362, %313 : vector<2x32xf32>
    %366 = arith.mulf %361, %363 : vector<2x32xf32>
    %367 = arith.addf %365, %366 : vector<2x32xf32>
    %368 = math.tanh %367 : vector<2x32xf32>
    %369 = arith.mulf %364, %368 : vector<2x32xf32>
    %370 = vector.broadcast %350 : vector<2x1xf32> to vector<2x32xf32>
    %371 = arith.mulf %370, %369 : vector<2x32xf32>
    %cst_54 = arith.constant 1.000000e+00 : f32
    %372 = vector.broadcast %cst_54 : f32 to vector<2x1xf32>
    %373 = arith.subf %372, %350 : vector<2x1xf32>
    %374 = vector.broadcast %373 : vector<2x1xf32> to vector<2x32xf32>
    %375 = arith.mulf %374, %306 : vector<2x32xf32>
    %376 = arith.addf %371, %375 : vector<2x32xf32>
    %377 = vector.broadcast %350 : vector<2x1xf32> to vector<2x32xf32>
    %378 = arith.mulf %377, %367 : vector<2x32xf32>
    %cst_55 = arith.constant 1.000000e+00 : f32
    %379 = vector.broadcast %cst_55 : f32 to vector<2x1xf32>
    %380 = arith.subf %379, %350 : vector<2x1xf32>
    %381 = vector.broadcast %380 : vector<2x1xf32> to vector<2x32xf32>
    %382 = arith.mulf %381, %313 : vector<2x32xf32>
    %383 = arith.addf %378, %382 : vector<2x32xf32>
    %384 = vector.broadcast %350 : vector<2x1xf32> to vector<2x32xf32>
    %385 = arith.mulf %376, %384 : vector<2x32xf32>
    %386 = vector.extract_strided_slice %65 {offsets = [6, 128], sizes = [2, 128], strides = [1, 1]} : vector<16x256xf32> to vector<2x128xf32>
    %cst_56 = arith.constant dense<0.000000e+00> : vector<2x128xf32>
    %387 = tpu.matmul %340, %68, %cst_56 {dimension_numbers = #tpu.dot_dimension_numbers<[1], [0], [0], [1], [0, 0, 1, 1], [], []>} : vector<2x32xf32>, vector<32x128xf32>, vector<2x128xf32> -> vector<2x128xf32>
    %388 = arith.addf %386, %387 : vector<2x128xf32>
    %389 = arith.negf %388 : vector<2x128xf32>
    %390 = math.exp %389 : vector<2x128xf32>
    %cst_57 = arith.constant 1.000000e+00 : f32
    %391 = vector.broadcast %cst_57 : f32 to vector<2x128xf32>
    %392 = arith.addf %391, %390 : vector<2x128xf32>
    %393 = arith.divf %391, %392 : vector<2x128xf32>
    %394 = math.tanh %388 : vector<2x128xf32>
    %395 = vector.extract_strided_slice %393 {offsets = [0, 0], sizes = [2, 32], strides = [1, 1]} : vector<2x128xf32> to vector<2x32xf32>
    %396 = vector.extract_strided_slice %393 {offsets = [0, 32], sizes = [2, 32], strides = [1, 1]} : vector<2x128xf32> to vector<2x32xf32>
    %397 = vector.extract_strided_slice %394 {offsets = [0, 64], sizes = [2, 32], strides = [1, 1]} : vector<2x128xf32> to vector<2x32xf32>
    %398 = vector.extract_strided_slice %393 {offsets = [0, 96], sizes = [2, 32], strides = [1, 1]} : vector<2x128xf32> to vector<2x32xf32>
    %399 = arith.mulf %396, %347 : vector<2x32xf32>
    %400 = arith.mulf %395, %397 : vector<2x32xf32>
    %401 = arith.addf %399, %400 : vector<2x32xf32>
    %402 = math.tanh %401 : vector<2x32xf32>
    %403 = arith.mulf %398, %402 : vector<2x32xf32>
    %404 = vector.broadcast %351 : vector<2x1xf32> to vector<2x32xf32>
    %405 = arith.mulf %404, %403 : vector<2x32xf32>
    %cst_58 = arith.constant 1.000000e+00 : f32
    %406 = vector.broadcast %cst_58 : f32 to vector<2x1xf32>
    %407 = arith.subf %406, %351 : vector<2x1xf32>
    %408 = vector.broadcast %407 : vector<2x1xf32> to vector<2x32xf32>
    %409 = arith.mulf %408, %340 : vector<2x32xf32>
    %410 = arith.addf %405, %409 : vector<2x32xf32>
    %411 = vector.broadcast %351 : vector<2x1xf32> to vector<2x32xf32>
    %412 = arith.mulf %411, %401 : vector<2x32xf32>
    %cst_59 = arith.constant 1.000000e+00 : f32
    %413 = vector.broadcast %cst_59 : f32 to vector<2x1xf32>
    %414 = arith.subf %413, %351 : vector<2x1xf32>
    %415 = vector.broadcast %414 : vector<2x1xf32> to vector<2x32xf32>
    %416 = arith.mulf %415, %347 : vector<2x32xf32>
    %417 = arith.addf %412, %416 : vector<2x32xf32>
    %418 = vector.broadcast %351 : vector<2x1xf32> to vector<2x32xf32>
    %419 = arith.mulf %410, %418 : vector<2x32xf32>
    %420 = vector.extract_strided_slice %66 {offsets = [10, 0], sizes = [2, 1], strides = [1, 1]} : vector<16x1xf32> to vector<2x1xf32>
    %421 = vector.extract_strided_slice %66 {offsets = [4, 0], sizes = [2, 1], strides = [1, 1]} : vector<16x1xf32> to vector<2x1xf32>
    %422 = vector.extract_strided_slice %65 {offsets = [10, 0], sizes = [2, 128], strides = [1, 1]} : vector<16x256xf32> to vector<2x128xf32>
    %cst_60 = arith.constant dense<0.000000e+00> : vector<2x128xf32>
    %423 = tpu.matmul %376, %67, %cst_60 {dimension_numbers = #tpu.dot_dimension_numbers<[1], [0], [0], [1], [0, 0, 1, 1], [], []>} : vector<2x32xf32>, vector<32x128xf32>, vector<2x128xf32> -> vector<2x128xf32>
    %424 = arith.addf %422, %423 : vector<2x128xf32>
    %425 = arith.negf %424 : vector<2x128xf32>
    %426 = math.exp %425 : vector<2x128xf32>
    %cst_61 = arith.constant 1.000000e+00 : f32
    %427 = vector.broadcast %cst_61 : f32 to vector<2x128xf32>
    %428 = arith.addf %427, %426 : vector<2x128xf32>
    %429 = arith.divf %427, %428 : vector<2x128xf32>
    %430 = math.tanh %424 : vector<2x128xf32>
    %431 = vector.extract_strided_slice %429 {offsets = [0, 0], sizes = [2, 32], strides = [1, 1]} : vector<2x128xf32> to vector<2x32xf32>
    %432 = vector.extract_strided_slice %429 {offsets = [0, 32], sizes = [2, 32], strides = [1, 1]} : vector<2x128xf32> to vector<2x32xf32>
    %433 = vector.extract_strided_slice %430 {offsets = [0, 64], sizes = [2, 32], strides = [1, 1]} : vector<2x128xf32> to vector<2x32xf32>
    %434 = vector.extract_strided_slice %429 {offsets = [0, 96], sizes = [2, 32], strides = [1, 1]} : vector<2x128xf32> to vector<2x32xf32>
    %435 = arith.mulf %432, %383 : vector<2x32xf32>
    %436 = arith.mulf %431, %433 : vector<2x32xf32>
    %437 = arith.addf %435, %436 : vector<2x32xf32>
    %438 = math.tanh %437 : vector<2x32xf32>
    %439 = arith.mulf %434, %438 : vector<2x32xf32>
    %440 = vector.broadcast %420 : vector<2x1xf32> to vector<2x32xf32>
    %441 = arith.mulf %440, %439 : vector<2x32xf32>
    %cst_62 = arith.constant 1.000000e+00 : f32
    %442 = vector.broadcast %cst_62 : f32 to vector<2x1xf32>
    %443 = arith.subf %442, %420 : vector<2x1xf32>
    %444 = vector.broadcast %443 : vector<2x1xf32> to vector<2x32xf32>
    %445 = arith.mulf %444, %376 : vector<2x32xf32>
    %446 = arith.addf %441, %445 : vector<2x32xf32>
    %447 = vector.broadcast %420 : vector<2x1xf32> to vector<2x32xf32>
    %448 = arith.mulf %447, %437 : vector<2x32xf32>
    %cst_63 = arith.constant 1.000000e+00 : f32
    %449 = vector.broadcast %cst_63 : f32 to vector<2x1xf32>
    %450 = arith.subf %449, %420 : vector<2x1xf32>
    %451 = vector.broadcast %450 : vector<2x1xf32> to vector<2x32xf32>
    %452 = arith.mulf %451, %383 : vector<2x32xf32>
    %453 = arith.addf %448, %452 : vector<2x32xf32>
    %454 = vector.broadcast %420 : vector<2x1xf32> to vector<2x32xf32>
    %455 = arith.mulf %446, %454 : vector<2x32xf32>
    %456 = vector.extract_strided_slice %65 {offsets = [4, 128], sizes = [2, 128], strides = [1, 1]} : vector<16x256xf32> to vector<2x128xf32>
    %cst_64 = arith.constant dense<0.000000e+00> : vector<2x128xf32>
    %457 = tpu.matmul %410, %68, %cst_64 {dimension_numbers = #tpu.dot_dimension_numbers<[1], [0], [0], [1], [0, 0, 1, 1], [], []>} : vector<2x32xf32>, vector<32x128xf32>, vector<2x128xf32> -> vector<2x128xf32>
    %458 = arith.addf %456, %457 : vector<2x128xf32>
    %459 = arith.negf %458 : vector<2x128xf32>
    %460 = math.exp %459 : vector<2x128xf32>
    %cst_65 = arith.constant 1.000000e+00 : f32
    %461 = vector.broadcast %cst_65 : f32 to vector<2x128xf32>
    %462 = arith.addf %461, %460 : vector<2x128xf32>
    %463 = arith.divf %461, %462 : vector<2x128xf32>
    %464 = math.tanh %458 : vector<2x128xf32>
    %465 = vector.extract_strided_slice %463 {offsets = [0, 0], sizes = [2, 32], strides = [1, 1]} : vector<2x128xf32> to vector<2x32xf32>
    %466 = vector.extract_strided_slice %463 {offsets = [0, 32], sizes = [2, 32], strides = [1, 1]} : vector<2x128xf32> to vector<2x32xf32>
    %467 = vector.extract_strided_slice %464 {offsets = [0, 64], sizes = [2, 32], strides = [1, 1]} : vector<2x128xf32> to vector<2x32xf32>
    %468 = vector.extract_strided_slice %463 {offsets = [0, 96], sizes = [2, 32], strides = [1, 1]} : vector<2x128xf32> to vector<2x32xf32>
    %469 = arith.mulf %466, %417 : vector<2x32xf32>
    %470 = arith.mulf %465, %467 : vector<2x32xf32>
    %471 = arith.addf %469, %470 : vector<2x32xf32>
    %472 = math.tanh %471 : vector<2x32xf32>
    %473 = arith.mulf %468, %472 : vector<2x32xf32>
    %474 = vector.broadcast %421 : vector<2x1xf32> to vector<2x32xf32>
    %475 = arith.mulf %474, %473 : vector<2x32xf32>
    %cst_66 = arith.constant 1.000000e+00 : f32
    %476 = vector.broadcast %cst_66 : f32 to vector<2x1xf32>
    %477 = arith.subf %476, %421 : vector<2x1xf32>
    %478 = vector.broadcast %477 : vector<2x1xf32> to vector<2x32xf32>
    %479 = arith.mulf %478, %410 : vector<2x32xf32>
    %480 = arith.addf %475, %479 : vector<2x32xf32>
    %481 = vector.broadcast %421 : vector<2x1xf32> to vector<2x32xf32>
    %482 = arith.mulf %481, %471 : vector<2x32xf32>
    %cst_67 = arith.constant 1.000000e+00 : f32
    %483 = vector.broadcast %cst_67 : f32 to vector<2x1xf32>
    %484 = arith.subf %483, %421 : vector<2x1xf32>
    %485 = vector.broadcast %484 : vector<2x1xf32> to vector<2x32xf32>
    %486 = arith.mulf %485, %417 : vector<2x32xf32>
    %487 = arith.addf %482, %486 : vector<2x32xf32>
    %488 = vector.broadcast %421 : vector<2x1xf32> to vector<2x32xf32>
    %489 = arith.mulf %480, %488 : vector<2x32xf32>
    %490 = vector.extract_strided_slice %66 {offsets = [12, 0], sizes = [2, 1], strides = [1, 1]} : vector<16x1xf32> to vector<2x1xf32>
    %491 = vector.extract_strided_slice %66 {offsets = [2, 0], sizes = [2, 1], strides = [1, 1]} : vector<16x1xf32> to vector<2x1xf32>
    %492 = vector.extract_strided_slice %65 {offsets = [12, 0], sizes = [2, 128], strides = [1, 1]} : vector<16x256xf32> to vector<2x128xf32>
    %cst_68 = arith.constant dense<0.000000e+00> : vector<2x128xf32>
    %493 = tpu.matmul %446, %67, %cst_68 {dimension_numbers = #tpu.dot_dimension_numbers<[1], [0], [0], [1], [0, 0, 1, 1], [], []>} : vector<2x32xf32>, vector<32x128xf32>, vector<2x128xf32> -> vector<2x128xf32>
    %494 = arith.addf %492, %493 : vector<2x128xf32>
    %495 = arith.negf %494 : vector<2x128xf32>
    %496 = math.exp %495 : vector<2x128xf32>
    %cst_69 = arith.constant 1.000000e+00 : f32
    %497 = vector.broadcast %cst_69 : f32 to vector<2x128xf32>
    %498 = arith.addf %497, %496 : vector<2x128xf32>
    %499 = arith.divf %497, %498 : vector<2x128xf32>
    %500 = math.tanh %494 : vector<2x128xf32>
    %501 = vector.extract_strided_slice %499 {offsets = [0, 0], sizes = [2, 32], strides = [1, 1]} : vector<2x128xf32> to vector<2x32xf32>
    %502 = vector.extract_strided_slice %499 {offsets = [0, 32], sizes = [2, 32], strides = [1, 1]} : vector<2x128xf32> to vector<2x32xf32>
    %503 = vector.extract_strided_slice %500 {offsets = [0, 64], sizes = [2, 32], strides = [1, 1]} : vector<2x128xf32> to vector<2x32xf32>
    %504 = vector.extract_strided_slice %499 {offsets = [0, 96], sizes = [2, 32], strides = [1, 1]} : vector<2x128xf32> to vector<2x32xf32>
    %505 = arith.mulf %502, %453 : vector<2x32xf32>
    %506 = arith.mulf %501, %503 : vector<2x32xf32>
    %507 = arith.addf %505, %506 : vector<2x32xf32>
    %508 = math.tanh %507 : vector<2x32xf32>
    %509 = arith.mulf %504, %508 : vector<2x32xf32>
    %510 = vector.broadcast %490 : vector<2x1xf32> to vector<2x32xf32>
    %511 = arith.mulf %510, %509 : vector<2x32xf32>
    %cst_70 = arith.constant 1.000000e+00 : f32
    %512 = vector.broadcast %cst_70 : f32 to vector<2x1xf32>
    %513 = arith.subf %512, %490 : vector<2x1xf32>
    %514 = vector.broadcast %513 : vector<2x1xf32> to vector<2x32xf32>
    %515 = arith.mulf %514, %446 : vector<2x32xf32>
    %516 = arith.addf %511, %515 : vector<2x32xf32>
    %517 = vector.broadcast %490 : vector<2x1xf32> to vector<2x32xf32>
    %518 = arith.mulf %517, %507 : vector<2x32xf32>
    %cst_71 = arith.constant 1.000000e+00 : f32
    %519 = vector.broadcast %cst_71 : f32 to vector<2x1xf32>
    %520 = arith.subf %519, %490 : vector<2x1xf32>
    %521 = vector.broadcast %520 : vector<2x1xf32> to vector<2x32xf32>
    %522 = arith.mulf %521, %453 : vector<2x32xf32>
    %523 = arith.addf %518, %522 : vector<2x32xf32>
    %524 = vector.broadcast %490 : vector<2x1xf32> to vector<2x32xf32>
    %525 = arith.mulf %516, %524 : vector<2x32xf32>
    %526 = vector.extract_strided_slice %65 {offsets = [2, 128], sizes = [2, 128], strides = [1, 1]} : vector<16x256xf32> to vector<2x128xf32>
    %cst_72 = arith.constant dense<0.000000e+00> : vector<2x128xf32>
    %527 = tpu.matmul %480, %68, %cst_72 {dimension_numbers = #tpu.dot_dimension_numbers<[1], [0], [0], [1], [0, 0, 1, 1], [], []>} : vector<2x32xf32>, vector<32x128xf32>, vector<2x128xf32> -> vector<2x128xf32>
    %528 = arith.addf %526, %527 : vector<2x128xf32>
    %529 = arith.negf %528 : vector<2x128xf32>
    %530 = math.exp %529 : vector<2x128xf32>
    %cst_73 = arith.constant 1.000000e+00 : f32
    %531 = vector.broadcast %cst_73 : f32 to vector<2x128xf32>
    %532 = arith.addf %531, %530 : vector<2x128xf32>
    %533 = arith.divf %531, %532 : vector<2x128xf32>
    %534 = math.tanh %528 : vector<2x128xf32>
    %535 = vector.extract_strided_slice %533 {offsets = [0, 0], sizes = [2, 32], strides = [1, 1]} : vector<2x128xf32> to vector<2x32xf32>
    %536 = vector.extract_strided_slice %533 {offsets = [0, 32], sizes = [2, 32], strides = [1, 1]} : vector<2x128xf32> to vector<2x32xf32>
    %537 = vector.extract_strided_slice %534 {offsets = [0, 64], sizes = [2, 32], strides = [1, 1]} : vector<2x128xf32> to vector<2x32xf32>
    %538 = vector.extract_strided_slice %533 {offsets = [0, 96], sizes = [2, 32], strides = [1, 1]} : vector<2x128xf32> to vector<2x32xf32>
    %539 = arith.mulf %536, %487 : vector<2x32xf32>
    %540 = arith.mulf %535, %537 : vector<2x32xf32>
    %541 = arith.addf %539, %540 : vector<2x32xf32>
    %542 = math.tanh %541 : vector<2x32xf32>
    %543 = arith.mulf %538, %542 : vector<2x32xf32>
    %544 = vector.broadcast %491 : vector<2x1xf32> to vector<2x32xf32>
    %545 = arith.mulf %544, %543 : vector<2x32xf32>
    %cst_74 = arith.constant 1.000000e+00 : f32
    %546 = vector.broadcast %cst_74 : f32 to vector<2x1xf32>
    %547 = arith.subf %546, %491 : vector<2x1xf32>
    %548 = vector.broadcast %547 : vector<2x1xf32> to vector<2x32xf32>
    %549 = arith.mulf %548, %480 : vector<2x32xf32>
    %550 = arith.addf %545, %549 : vector<2x32xf32>
    %551 = vector.broadcast %491 : vector<2x1xf32> to vector<2x32xf32>
    %552 = arith.mulf %551, %541 : vector<2x32xf32>
    %cst_75 = arith.constant 1.000000e+00 : f32
    %553 = vector.broadcast %cst_75 : f32 to vector<2x1xf32>
    %554 = arith.subf %553, %491 : vector<2x1xf32>
    %555 = vector.broadcast %554 : vector<2x1xf32> to vector<2x32xf32>
    %556 = arith.mulf %555, %487 : vector<2x32xf32>
    %557 = arith.addf %552, %556 : vector<2x32xf32>
    %558 = vector.broadcast %491 : vector<2x1xf32> to vector<2x32xf32>
    %559 = arith.mulf %550, %558 : vector<2x32xf32>
    %560 = vector.extract_strided_slice %66 {offsets = [14, 0], sizes = [2, 1], strides = [1, 1]} : vector<16x1xf32> to vector<2x1xf32>
    %561 = vector.extract_strided_slice %66 {offsets = [0, 0], sizes = [2, 1], strides = [1, 1]} : vector<16x1xf32> to vector<2x1xf32>
    %562 = vector.extract_strided_slice %65 {offsets = [14, 0], sizes = [2, 128], strides = [1, 1]} : vector<16x256xf32> to vector<2x128xf32>
    %cst_76 = arith.constant dense<0.000000e+00> : vector<2x128xf32>
    %563 = tpu.matmul %516, %67, %cst_76 {dimension_numbers = #tpu.dot_dimension_numbers<[1], [0], [0], [1], [0, 0, 1, 1], [], []>} : vector<2x32xf32>, vector<32x128xf32>, vector<2x128xf32> -> vector<2x128xf32>
    %564 = arith.addf %562, %563 : vector<2x128xf32>
    %565 = arith.negf %564 : vector<2x128xf32>
    %566 = math.exp %565 : vector<2x128xf32>
    %cst_77 = arith.constant 1.000000e+00 : f32
    %567 = vector.broadcast %cst_77 : f32 to vector<2x128xf32>
    %568 = arith.addf %567, %566 : vector<2x128xf32>
    %569 = arith.divf %567, %568 : vector<2x128xf32>
    %570 = math.tanh %564 : vector<2x128xf32>
    %571 = vector.extract_strided_slice %569 {offsets = [0, 0], sizes = [2, 32], strides = [1, 1]} : vector<2x128xf32> to vector<2x32xf32>
    %572 = vector.extract_strided_slice %569 {offsets = [0, 32], sizes = [2, 32], strides = [1, 1]} : vector<2x128xf32> to vector<2x32xf32>
    %573 = vector.extract_strided_slice %570 {offsets = [0, 64], sizes = [2, 32], strides = [1, 1]} : vector<2x128xf32> to vector<2x32xf32>
    %574 = vector.extract_strided_slice %569 {offsets = [0, 96], sizes = [2, 32], strides = [1, 1]} : vector<2x128xf32> to vector<2x32xf32>
    %575 = arith.mulf %572, %523 : vector<2x32xf32>
    %576 = arith.mulf %571, %573 : vector<2x32xf32>
    %577 = arith.addf %575, %576 : vector<2x32xf32>
    %578 = math.tanh %577 : vector<2x32xf32>
    %579 = arith.mulf %574, %578 : vector<2x32xf32>
    %580 = vector.broadcast %560 : vector<2x1xf32> to vector<2x32xf32>
    %581 = arith.mulf %580, %579 : vector<2x32xf32>
    %cst_78 = arith.constant 1.000000e+00 : f32
    %582 = vector.broadcast %cst_78 : f32 to vector<2x1xf32>
    %583 = arith.subf %582, %560 : vector<2x1xf32>
    %584 = vector.broadcast %583 : vector<2x1xf32> to vector<2x32xf32>
    %585 = arith.mulf %584, %516 : vector<2x32xf32>
    %586 = arith.addf %581, %585 : vector<2x32xf32>
    %587 = vector.broadcast %560 : vector<2x1xf32> to vector<2x32xf32>
    %588 = arith.mulf %586, %587 : vector<2x32xf32>
    %589 = vector.extract_strided_slice %65 {offsets = [0, 128], sizes = [2, 128], strides = [1, 1]} : vector<16x256xf32> to vector<2x128xf32>
    %cst_79 = arith.constant dense<0.000000e+00> : vector<2x128xf32>
    %590 = tpu.matmul %550, %68, %cst_79 {dimension_numbers = #tpu.dot_dimension_numbers<[1], [0], [0], [1], [0, 0, 1, 1], [], []>} : vector<2x32xf32>, vector<32x128xf32>, vector<2x128xf32> -> vector<2x128xf32>
    %591 = arith.addf %589, %590 : vector<2x128xf32>
    %592 = arith.negf %591 : vector<2x128xf32>
    %593 = math.exp %592 : vector<2x128xf32>
    %cst_80 = arith.constant 1.000000e+00 : f32
    %594 = vector.broadcast %cst_80 : f32 to vector<2x128xf32>
    %595 = arith.addf %594, %593 : vector<2x128xf32>
    %596 = arith.divf %594, %595 : vector<2x128xf32>
    %597 = math.tanh %591 : vector<2x128xf32>
    %598 = vector.extract_strided_slice %596 {offsets = [0, 0], sizes = [2, 32], strides = [1, 1]} : vector<2x128xf32> to vector<2x32xf32>
    %599 = vector.extract_strided_slice %596 {offsets = [0, 32], sizes = [2, 32], strides = [1, 1]} : vector<2x128xf32> to vector<2x32xf32>
    %600 = vector.extract_strided_slice %597 {offsets = [0, 64], sizes = [2, 32], strides = [1, 1]} : vector<2x128xf32> to vector<2x32xf32>
    %601 = vector.extract_strided_slice %596 {offsets = [0, 96], sizes = [2, 32], strides = [1, 1]} : vector<2x128xf32> to vector<2x32xf32>
    %602 = arith.mulf %599, %557 : vector<2x32xf32>
    %603 = arith.mulf %598, %600 : vector<2x32xf32>
    %604 = arith.addf %602, %603 : vector<2x32xf32>
    %605 = math.tanh %604 : vector<2x32xf32>
    %606 = arith.mulf %601, %605 : vector<2x32xf32>
    %607 = vector.broadcast %561 : vector<2x1xf32> to vector<2x32xf32>
    %608 = arith.mulf %607, %606 : vector<2x32xf32>
    %cst_81 = arith.constant 1.000000e+00 : f32
    %609 = vector.broadcast %cst_81 : f32 to vector<2x1xf32>
    %610 = arith.subf %609, %561 : vector<2x1xf32>
    %611 = vector.broadcast %610 : vector<2x1xf32> to vector<2x32xf32>
    %612 = arith.mulf %611, %550 : vector<2x32xf32>
    %613 = arith.addf %608, %612 : vector<2x32xf32>
    %614 = vector.broadcast %561 : vector<2x1xf32> to vector<2x32xf32>
    %615 = arith.mulf %613, %614 : vector<2x32xf32>
    %616 = tpu.concatenate %105, %175, %245, %315, %385, %455, %525, %588 in 0 : vector<2x32xf32>, vector<2x32xf32>, vector<2x32xf32>, vector<2x32xf32>, vector<2x32xf32>, vector<2x32xf32>, vector<2x32xf32>, vector<2x32xf32> -> vector<16x32xf32>
    %617 = tpu.concatenate %615, %559, %489, %419, %349, %279, %209, %139 in 0 : vector<2x32xf32>, vector<2x32xf32>, vector<2x32xf32>, vector<2x32xf32>, vector<2x32xf32>, vector<2x32xf32>, vector<2x32xf32>, vector<2x32xf32> -> vector<16x32xf32>
    %618 = tpu.concatenate %616, %617 in 1 : vector<16x32xf32>, vector<16x32xf32> -> vector<16x64xf32>
    %c0_82 = arith.constant 0 : index
    %c0_83 = arith.constant 0 : index
    %619 = vector.load %arg9[%c0_82, %c0_83] : memref<16x64xf32, #tpu.memory_space<vmem>>, vector<16x64xf32>
    tpu.vector_store %arg9[%c0_82, %c0_83], %618 {strides = array<i32>} : memref<16x64xf32, #tpu.memory_space<vmem>>, vector<16x64xf32>,
    return
  }
}

</mosaic_0001>

<bundles_post_ra>
// kernel: forward_lstm.1
= control target key start
LH: loop header
LB: loop body
LE: loop exit
PB: predicated region body
PF: predicated region fallthrough
CT: control target
= control target key end

     0   :  { %s2118_s17 = smov 96   ;;  %s2119_s18 = smov 64   ;;  %vm398_vm0 = vcmask 130048   ;;  %vm411_vm1 = vcmask 261120   ;;  %vm436_vm2 = vcmask 523264   ;;  %s3049_s3 = inlined_call_operand.vmem [shape: f32[128,416], index: 3, kind: input, shape index: {}]   ;;  %s3050_s0 = inlined_call_operand.vmem [shape: f32[16,128], index: 0, kind: input, shape index: {}]   ;;  %s3051_s4 = inlined_call_operand.vmem [shape: f32[1,416], index: 4, kind: input, shape index: {}]   ;;  %s3052_s5 = inlined_call_operand.vmem [shape: f32[64,256], index: 5, kind: input, shape index: {}]   ;;  %s3053_s7 = inlined_call_operand.vmem [shape: f32[32,128], index: 7, kind: input, shape index: {}]   ;;  %s3054_s8 = inlined_call_operand.vmem [shape: f32[32,128], index: 8, kind: input, shape index: {}]   ;;  %s3055_s1 = inlined_call_operand.vmem [shape: f32[16,32], index: 1, kind: input, shape index: {}]   ;;  %s3056_s6 = inlined_call_operand.vmem [shape: f32[1,256], index: 6, kind: input, shape index: {}]   ;;  %s3057_s2 = inlined_call_operand.vmem [shape: f32[16,1], index: 2, kind: input, shape index: {}]   ;;  %s3058_s9 = inlined_call_operand.vmem [shape: f32[16,64], index: 9, kind: output, shape index: {}]  }
   0x1   :  { %v94_v0 = vld [vmem:[%s3049_s3 + $0x1e0] sm:$0xff]  ;;  %v95_v1 = vld [vmem:[%s3049_s3 + $0x1e8] sm:$0xff]  ;;  %v96_v8 = vld [vmem:[%s3049_s3 + $0x1f0] sm:$0xff]  ;;  %s2120_s19 = smov 16   ;;  %s2121_s20 = smov 32  }
   0x2   :  { %v90_v2 = vld [vmem:[%s3049_s3 + $0x1c0] sm:$0xff]  ;;  %108 = vmatpush.msra.mxu0 %v94_v0  ;;  %131 = vmatpush.msra.mxu1 %v95_v1  ;;  %v91_v3 = vld [vmem:[%s3049_s3 + $0x1c8] sm:$0xff]  ;;  %v92_v9 = vld [vmem:[%s3049_s3 + $0x1d0] sm:$0xff] }
   0x3   :  { %v86_v4 = vld [vmem:[%s3049_s3 + $0x1a0] sm:$0xff]  ;;  %v87_v5 = vld [vmem:[%s3049_s3 + $0x1a8] sm:$0xff]  ;;  %154 = vmatpush.msra.mxu2 %v96_v8  ;;  %v88_v12 = vld [vmem:[%s3049_s3 + $0x1b0] sm:$0xff] }
   0x4   :  { %109 = vmatpush.msra.mxu0 %v90_v2  ;;  %132 = vmatpush.msra.mxu1 %v91_v3  ;;  %v82_v6 = vld [vmem:[%s3049_s3 + $0x180] sm:$0xff]  ;;  %v83_v7 = vld [vmem:[%s3049_s3 + $0x188] sm:$0xff]  ;;  %v97_v15 = vld [vmem:[%s3049_s3 + $0x1f8] sm:$0xff] }
   0x5   :  { %v78_v10 = vld [vmem:[%s3049_s3 + $0x160] sm:$0xff]  ;;  %v79_v11 = vld [vmem:[%s3049_s3 + $0x168] sm:$0xff]  ;;  %155 = vmatpush.msra.mxu2 %v92_v9  ;;  %v84_v16 = vld [vmem:[%s3049_s3 + $0x190] sm:$0xff]  ;;  %177 = vmatpush.msra.mxu3 %v97_v15 }
   0x6   :  { %110 = vmatpush.msra.mxu0 %v86_v4  ;;  %133 = vmatpush.msra.mxu1 %v87_v5  ;;  %v74_v13 = vld [vmem:[%s3049_s3 + $0x140] sm:$0xff]  ;;  %v75_v14 = vld [vmem:[%s3049_s3 + $0x148] sm:$0xff]  ;;  %v93_v17 = vld [vmem:[%s3049_s3 + $0x1d8] sm:$0xff] }
   0x7   :  { %v70_v18 = vld [vmem:[%s3049_s3 + $0x120] sm:$0xff]  ;;  %v71_v19 = vld [vmem:[%s3049_s3 + $0x128] sm:$0xff]  ;;  %156 = vmatpush.msra.mxu2 %v88_v12  ;;  %v80_v20 = vld [vmem:[%s3049_s3 + $0x170] sm:$0xff]  ;;  %178 = vmatpush.msra.mxu3 %v93_v17 }
   0x8   :  { %111 = vmatpush.msra.mxu0 %v82_v6  ;;  %134 = vmatpush.msra.mxu1 %v83_v7  ;;  %v89_v21 = vld [vmem:[%s3049_s3 + $0x1b8] sm:$0xff]  ;;  %v66_v22 = vld [vmem:[%s3049_s3 + $0x100] sm:$0xff]  ;;  %v67_v23 = vld [vmem:[%s3049_s3 + $0x108] sm:$0xff] }
   0x9   :  { %157 = vmatpush.msra.mxu2 %v84_v16  ;;  %v76_v24 = vld [vmem:[%s3049_s3 + $0x150] sm:$0xff]  ;;  %v85_v25 = vld [vmem:[%s3049_s3 + $0x198] sm:$0xff]  ;;  %v62_v26 = vld [vmem:[%s3049_s3 + $0xe0] sm:$0xff]  ;;  %179 = vmatpush.msra.mxu3 %v89_v21 }
   0xa   :  { %112 = vmatpush.msra.mxu0 %v78_v10  ;;  %135 = vmatpush.msra.mxu1 %v79_v11  ;;  %v63_v27 = vld [vmem:[%s3049_s3 + $0xe8] sm:$0xff]  ;;  %v72_v28 = vld [vmem:[%s3049_s3 + $0x130] sm:$0xff]  ;;  %v81_v29 = vld [vmem:[%s3049_s3 + $0x178] sm:$0xff] }
   0xb   :  { %158 = vmatpush.msra.mxu2 %v80_v20  ;;  %v58_v30 = vld [vmem:[%s3049_s3 + $0xc0] sm:$0xff]  ;;  %v59_v31 = vld [vmem:[%s3049_s3 + $0xc8] sm:$0xff]  ;;  %180 = vmatpush.msra.mxu3 %v85_v25  ;;  %v68_v32 = vld [vmem:[%s3049_s3 + $0x110] sm:$0xff] }
   0xc   :  { %113 = vmatpush.msra.mxu0 %v74_v13  ;;  %136 = vmatpush.msra.mxu1 %v75_v14  ;;  %v77_v33 = vld [vmem:[%s3049_s3 + $0x158] sm:$0xff]  ;;  %v54_v34 = vld [vmem:[%s3049_s3 + $0xa0] sm:$0xff]  ;;  %v55_v35 = vld [vmem:[%s3049_s3 + $0xa8] sm:$0xff] }
   0xd   :  { %159 = vmatpush.msra.mxu2 %v76_v24  ;;  %181 = vmatpush.msra.mxu3 %v81_v29  ;;  %v64_v36 = vld [vmem:[%s3049_s3 + $0xf0] sm:$0xff]  ;;  %v73_v37 = vld [vmem:[%s3049_s3 + $0x138] sm:$0xff]  ;;  %v50_v38 = vld [vmem:[%s3049_s3 + $0x80] sm:$0xff] }
   0xe   :  { %114 = vmatpush.msra.mxu0 %v70_v18  ;;  %137 = vmatpush.msra.mxu1 %v71_v19  ;;  %v51_v39 = vld [vmem:[%s3049_s3 + $0x88] sm:$0xff]  ;;  %v60_v40 = vld [vmem:[%s3049_s3 + $0xd0] sm:$0xff]  ;;  %v69_v41 = vld [vmem:[%s3049_s3 + $0x118] sm:$0xff] }
   0xf   :  { %160 = vmatpush.msra.mxu2 %v72_v28  ;;  %182 = vmatpush.msra.mxu3 %v77_v33  ;;  %v46_v42 = vld [vmem:[%s3049_s3 + $0x60] sm:$0xff]  ;;  %v47_v43 = vld [vmem:[%s3049_s3 + $0x68] sm:$0xff]  ;;  %v56_v44 = vld [vmem:[%s3049_s3 + $0xb0] sm:$0xff] }
  0x10   :  { %115 = vmatpush.msra.mxu0 %v66_v22  ;;  %138 = vmatpush.msra.mxu1 %v67_v23  ;;  %v65_v45 = vld [vmem:[%s3049_s3 + $0xf8] sm:$0xff]  ;;  %v42_v46 = vld [vmem:[%s3049_s3 + $0x40] sm:$0xff]  ;;  %v43_v47 = vld [vmem:[%s3049_s3 + $0x48] sm:$0xff] }
  0x11   :  { %161 = vmatpush.msra.mxu2 %v68_v32  ;;  %183 = vmatpush.msra.mxu3 %v73_v37  ;;  %v52_v48 = vld [vmem:[%s3049_s3 + $0x90] sm:$0xff]  ;;  %v61_v49 = vld [vmem:[%s3049_s3 + $0xd8] sm:$0xff]  ;;  %v38_v50 = vld [vmem:[%s3049_s3 + $0x20] sm:$0xff] }
  0x12   :  { %116 = vmatpush.msra.mxu0 %v62_v26  ;;  %139 = vmatpush.msra.mxu1 %v63_v27  ;;  %v39_v51 = vld [vmem:[%s3049_s3 + $0x28] sm:$0xff]  ;;  %v48_v52 = vld [vmem:[%s3049_s3 + $0x70] sm:$0xff]  ;;  %v57_v53 = vld [vmem:[%s3049_s3 + $0xb8] sm:$0xff] }
  0x13   :  { %162 = vmatpush.msra.mxu2 %v64_v36  ;;  %184 = vmatpush.msra.mxu3 %v69_v41  ;;  %v34_v54 = vld [vmem:[%s3049_s3] sm:$0xff]  ;;  %v35_v55 = vld [vmem:[%s3049_s3 + $0x8] sm:$0xff]  ;;  %v44_v57 = vld [vmem:[%s3049_s3 + $0x50] sm:$0xff] }
  0x14   :  { %117 = vmatpush.msra.mxu0 %v58_v30  ;;  %140 = vmatpush.msra.mxu1 %v59_v31  ;;  %v32_v56 = vld [vmem:[%s3050_s0] sm:$0xff]  ;;  %v53_v58 = vld [vmem:[%s3049_s3 + $0x98] sm:$0xff]  ;;  %v40_v59 = vld [vmem:[%s3049_s3 + $0x30] sm:$0xff] }
  0x15   :  { %163 = vmatpush.msra.mxu2 %v60_v40  ;;  %185 = vmatpush.msra.mxu3 %v65_v45  ;;  %v49_v60 = vld [vmem:[%s3049_s3 + $0x78] sm:$0xff]  ;;  %v36_v61 = vld [vmem:[%s3049_s3 + $0x10] sm:$0xff]  ;;  %v33_v0 = vld [vmem:[%s3050_s0 + $0x8] sm:$0xff]  ;;  %s2115_s0 = smov 112  }
  0x16   :  { %118 = vmatpush.msra.mxu0 %v54_v34  ;;  %141 = vmatpush.msra.mxu1 %v55_v35  ;;  %v45_v62 = vld [vmem:[%s3049_s3 + $0x58] sm:$0xff]  ;;  %v98_v2 = vld [vmem:[%s3051_s4] sm:$0xf]  ;;  %s2117_s4 = smov 48  }
  0x17   :  { %164 = vmatpush.msra.mxu2 %v56_v44  ;;  %186 = vmatpush.msra.mxu3 %v61_v49  ;;  %v41_v63 = vld [vmem:[%s3049_s3 + $0x38] sm:$0xff]  ;;  %v100_v3 = vperm.slane %v98_v2, 0  ;;  %v101_v4 = vperm.slane %v98_v2, 1  ;;  %v102_v11 = vperm.slane %v98_v2, 2  ;;  %v103_v15 = vperm.slane %v98_v2, 3 }
  0x18   :  { %119 = vmatpush.msra.mxu0 %v50_v38  ;;  %142 = vmatpush.msra.mxu1 %v51_v39  ;;  %v37_v1 = vld [vmem:[%s3049_s3 + $0x18] sm:$0xff]  ;;  %s2116_s3 = smov 80  }
  0x19   :  { %165 = vmatpush.msra.mxu2 %v52_v48  ;;  %187 = vmatpush.msra.mxu3 %v57_v53 }
  0x1a   :  { %120 = vmatpush.msra.mxu0 %v46_v42  ;;  %143 = vmatpush.msra.mxu1 %v47_v43 }
  0x1b   :  { %166 = vmatpush.msra.mxu2 %v48_v52  ;;  %188 = vmatpush.msra.mxu3 %v53_v58 }
  0x1c   :  { %121 = vmatpush.msra.mxu0 %v42_v46  ;;  %144 = vmatpush.msra.mxu1 %v43_v47 }
  0x1d   :  { %167 = vmatpush.msra.mxu2 %v44_v57  ;;  %189 = vmatpush.msra.mxu3 %v49_v60 }
  0x1e   :  { %122 = vmatpush.msra.mxu0 %v38_v50  ;;  %145 = vmatpush.msra.mxu1 %v39_v51 }
  0x1f   :  { %168 = vmatpush.msra.mxu2 %v40_v59  ;;  %190 = vmatpush.msra.mxu3 %v45_v62 }
  0x20   :  { %123 = vmatpush.msra.mxu0 %v34_v54  ;;  %146 = vmatpush.msra.mxu1 %v35_v55 }
  0x21   :  { %124 = vmatmul.f32.vlgmr.msra.gmra.mxu0 %v32_v56  ;;  %147 = vmatmul.f32.vlgmr.msra.gmra.mxu1 %v32_v56 }
  0x22   :  { %169 = vmatpush.msra.mxu2 %v36_v61  ;;  %191 = vmatpush.msra.mxu3 %v41_v63 }
  0x23   :  { %170 = vmatmul.f32.vlgmr.msra.gmra.mxu2 %v32_v56 }
  0x24   :  { %192 = vmatpush.msra.mxu3 %v37_v1 }
  0x25   :  { %193 = vmatmul.f32.vlgmr.msra.gmra.mxu3 %v32_v56 }
  0x29   :  { %150 = vmatmul.f32.gmra.mxu1 %v33_v0  ;;  %127 = vmatmul.f32.gmra.mxu0 %v33_v0 }
  0x2b   :  { %173 = vmatmul.f32.gmra.mxu2 %v33_v0 }
  0x2d   :  { %196 = vmatmul.f32.gmra.mxu3 %v33_v0 }
  0x9e   :  { %v125_v5 = vpop.f32.mrf.mxu0  ;;  %v148_v6 = vpop.f32.mrf.mxu1 }
  0x9f   :  { %v126_v7 = vadd.f32 %v125_v5, %v100_v3  ;;  %v149_v8 = vadd.f32 %v148_v6, %v101_v4 }
  0xa1   :  { %v2375_v9 = vmax.f32 %v126_v7, 0.0  ;;  %v2377_v10 = vmax.f32 %v149_v8, 0.0 }
  0xa3   :  { %270 = vrot.lane.b32.xlu0 %v2377_v10, %s2115_s0  ;;  %226 = vrot.lane.b32.xlu1 %v2375_v9, %s2116_s3 }
  0xa4   :  { %210 = vrot.lane.b32.xlu2 %v2375_v9, %s2115_s0 }
  0xa6   :  { %v171_v12 = vpop.f32.mrf.mxu2  ;;  %v151_v19 = vpop.f32.mrf.mxu1 }
  0xa7   :  { %v172_v13 = vadd.f32 %v171_v12, %v102_v11  ;;  %v152_v20 = vadd.f32 %v151_v19, %v101_v4  ;;  %v128_v22 = vpop.f32.mrf.mxu0 }
  0xa8   :  { %v194_v16 = vpop.f32.mrf.mxu3  ;;  %v129_v24 = vadd.f32 %v128_v22, %v100_v3 }
  0xa9   :  { %v2391_v14 = vmax.f32 %v172_v13, 0.0  ;;  %v195_v17 = vadd.f32 %v194_v16, %v103_v15  ;;  %v2404_v21 = vmax.f32 %v152_v20, 0.0 }
  0xaa   :  { %v2412_v26 = vmax.f32 %v129_v24, 0.0 }
  0xab   :  { %242 = vrot.lane.b32.xlu1 %v2375_v9, %s2117_s4  ;;  %218 = vrot.lane.b32.xlu0 %v2375_v9, %s2118_s17  ;;  %v203_v18 = vmax.f32 %v195_v17, 0.0 }
  0xac   :  { %234 = vrot.lane.b32.xlu2 %v2375_v9, %s2119_s18 }
  0xae   :  { %v174_v23 = vpop.f32.mrf.mxu2 }
  0xaf   :  { %v175_v25 = vadd.f32 %v174_v23, %v102_v11 }
  0xb0   :  { %v197_v28 = vpop.f32.mrf.mxu3 }
  0xb1   :  { %v2414_v27 = vmax.f32 %v175_v25, 0.0  ;;  %v198_v29 = vadd.f32 %v197_v28, %v103_v15 }
  0xb3   :  { %322 = vrot.lane.b32.xlu1 %v2391_v14, %s2116_s3  ;;  %314 = vrot.lane.b32.xlu0 %v2391_v14, %s2118_s17  ;;  %v207_v30 = vmax.f32 %v198_v29, 0.0 }
  0xb4   :  { %338 = vrot.lane.b32.xlu2 %v2391_v14, %s2117_s4 }
  0xbb   :  { %330 = vrot.lane.b32.xlu1 %v2391_v14, %s2119_s18  ;;  %354 = vrot.lane.b32.xlu0 %v2391_v14, %s2120_s19 }
  0xbc   :  { %374 = vrot.lane.b32.xlu2 %v203_v18, %s2118_s17 }
  0xc3   :  { %346 = vrot.lane.b32.xlu1 %v2391_v14, %s2121_s20  ;;  %364 = vrot.lane.b32.xlu0 %v2391_v14, %s2115_s0 }
  0xc4   :  { %272 = vrot.lane.b32.xlu2 %v2404_v21, %s2115_s0 }
  0xcb   :  { %382 = vrot.lane.b32.xlu1 %v203_v18, %s2116_s3  ;;  %212 = vrot.lane.b32.xlu0 %v2412_v26, %s2115_s0 }
  0xcc   :  { %324 = vrot.lane.b32.xlu2 %v2414_v27, %s2116_s3 }
  0xd3   :  { %332 = vrot.lane.b32.xlu1 %v2414_v27, %s2119_s18  ;;  %316 = vrot.lane.b32.xlu0 %v2414_v27, %s2118_s17 }
  0xd4   :  { %340 = vrot.lane.b32.xlu2 %v2414_v27, %s2117_s4 }
  0xdb   :  { %348 = vrot.lane.b32.xlu1 %v2414_v27, %s2121_s20  ;;  %356 = vrot.lane.b32.xlu0 %v2414_v27, %s2120_s19 }
  0xdc   :  { %366 = vrot.lane.b32.xlu2 %v2414_v27, %s2115_s0 }
  0xe3   :  { %384 = vrot.lane.b32.xlu1 %v207_v30, %s2116_s3  ;;  %376 = vrot.lane.b32.xlu0 %v207_v30, %s2118_s17 }
  0xe4   :  { %220 = vrot.lane.b32.xlu2 %v2412_v26, %s2118_s17 }
  0xeb   :  { %228 = vrot.lane.b32.xlu1 %v2412_v26, %s2116_s3  ;;  %250 = vrot.lane.b32.xlu0 %v2375_v9, %s2121_s20 }
  0xec   :  { %258 = vrot.lane.b32.xlu2 %v2375_v9, %s2120_s19 }
  0xf3   :  { %244 = vrot.lane.b32.xlu1 %v2412_v26, %s2117_s4  ;;  %236 = vrot.lane.b32.xlu0 %v2412_v26, %s2119_s18 }
  0xf4   :  { %252 = vrot.lane.b32.xlu2 %v2412_v26, %s2121_s20 }
  0xfb   :  { %260 = vrot.lane.b32.xlu1 %v2412_v26, %s2120_s19  ;;  %278 = vrot.lane.b32.xlu0 %v2377_v10, %s2118_s17 }
  0xfc   :  { %286 = vrot.lane.b32.xlu2 %v2377_v10, %s2116_s3 }
  0xfe   :  { %v211_v31 = vpop.permute.xlu2 %210 }
  0xff   :  { %v216_v17 = vmax.f32 %v2375_v9, %v211_v31 }
 0x103   :  { %302 = vrot.lane.b32.xlu1 %v2377_v10, %s2117_s4  ;;  %294 = vrot.lane.b32.xlu0 %v2377_v10, %s2119_s18 }
 0x104   :  { %280 = vrot.lane.b32.xlu2 %v2404_v21, %s2118_s17 }
 0x106   :  { %v235_v34 = vpop.permute.xlu2 %234 }
 0x10b   :  { %288 = vrot.lane.b32.xlu1 %v2404_v21, %s2116_s3 }
 0x10c   :  { %296 = vrot.lane.b32.xlu2 %v2404_v21, %s2119_s18 }
 0x10e   :  { %v339_v37 = vpop.permute.xlu2 %338 }
 0x115   :  { %v2465_v32 = vpop.permute.xlu0 %270  ;;  %v227_v33 = vpop.permute.xlu1 %226 }
 0x116   :  { %v310_v40 = vmax.f32 %v2377_v10, %v2465_v32  ;;  %v375_v41 = vpop.permute.xlu2 %374 }
 0x11d   :  { %v243_v35 = vpop.permute.xlu1 %242  ;;  %v219_v36 = vpop.permute.xlu0 %218 }
 0x11e   :  { %v2469_v47 = vpop.permute.xlu2 %272  ;;  %v224_v18 = vmax.f32 %v216_v17, %v219_v36 }
 0x11f   :  { %v311_v60 = vmax.f32 %v2404_v21, %v2469_v47 }
 0x120   :  { %v232_v22 = vmax.f32 %v224_v18, %v227_v33  ;;  %v414_v18 = vld [vmem:[%s3052_s5] sm:$0xff] }
 0x122   :  { %v240_v24 = vmax.f32 %v232_v22, %v235_v34  ;;  %v2577_v22 = vld [vmem:[%s3054_s8 + $0x10] sm:$0xff] }
 0x124   :  { %v248_v29 = vmax.f32 %v240_v24, %v243_v35  ;;  %v428_v35 = vld [vmem:[%s3052_s5 + $0x70] sm:$0xff]  ;;  %v2592_v24 = vld [vmem:[%s3054_s8] sm:$0xff] }
 0x125   :  { %v323_v38 = vpop.permute.xlu1 %322  ;;  %v315_v39 = vpop.permute.xlu0 %314  ;;  %451 = vmatpush.msrb.mxu0 %v428_v35 }
 0x126   :  { %v320_v42 = vmax.f32 %v310_v40, %v315_v39  ;;  %v325_v58 = vpop.permute.xlu2 %324 }
 0x128   :  { %v328_v45 = vmax.f32 %v320_v42, %v323_v38 }
 0x12d   :  { %v331_v43 = vpop.permute.xlu1 %330  ;;  %v355_v44 = vpop.permute.xlu0 %354 }
 0x12e   :  { %v336_v46 = vmax.f32 %v328_v45, %v331_v43  ;;  %v341_v1 = vpop.permute.xlu2 %340 }
 0x130   :  { %v344_v48 = vmax.f32 %v336_v46, %v339_v37  ;;  %v427_v46 = vld [vmem:[%s3052_s5 + $0x68] sm:$0xff] }
 0x135   :  { %v347_v49 = vpop.permute.xlu1 %346  ;;  %v365_v50 = vpop.permute.xlu0 %364 }
 0x136   :  { %v352_v51 = vmax.f32 %v344_v48, %v347_v49  ;;  %v367_v11 = vpop.permute.xlu2 %366  ;;  %v424_v48 = vld [vmem:[%s3052_s5 + $0x50] sm:$0xff]  ;;  %v425_v49 = vld [vmem:[%s3052_s5 + $0x58] sm:$0xff] }
 0x138   :  { %v360_v52 = vmax.f32 %v352_v51, %v355_v44 }
 0x13a   :  { %v362_v53 = vmax.f32 %v360_v52, %v2391_v14  ;;  %v2509_v52 = vld [vmem:[%s3053_s7 + $0x10] sm:$0xff] }
 0x13c   :  { %v370_v54 = vmax.f32 %v362_v53, %v365_v50  ;;  %v2504_v50 = vld [vmem:[%s3053_s7 + $0x18] sm:$0xff] }
 0x13d   :  { %v383_v55 = vpop.permute.xlu1 %382  ;;  %v213_v56 = vpop.permute.xlu0 %212  ;;  %514 = vmatpush.msrb.mxu2 %v2504_v50 }
 0x13e   :  { %v380_v57 = vmax.f32 %v370_v54, %v375_v41  ;;  %v221_v19 = vpop.permute.xlu2 %220  ;;  %v217_v41 = vmax.f32 %v2412_v26, %v213_v56  ;;  %v426_v26 = vld [vmem:[%s3052_s5 + $0x60] sm:$0xff] }
 0x13f   :  { %452 = vmatpush.msrb.mxu0 %v426_v26  ;;  %v422_v54 = vld [vmem:[%s3052_s5 + $0x40] sm:$0xff]  ;;  %515 = vmatpush.msrb.mxu2 %v2509_v52 }
 0x140   :  { %v388_v59 = vmax.f32 %v380_v57, %v383_v55  ;;  %v225_v36 = vmax.f32 %v217_v41, %v221_v19  ;;  %v423_v55 = vld [vmem:[%s3052_s5 + $0x48] sm:$0xff] }
 0x141   :  { %453 = vmatpush.msrb.mxu0 %v424_v48  ;;  %v2521_v57 = vld [vmem:[%s3053_s7 + $0x8] sm:$0xff] }
 0x142   :  { %392 = vrot.lane.b32.xlu0 %v388_v59, %s2117_s4  ;;  %v420_v59 = vld [vmem:[%s3052_s5 + $0x30] sm:$0xff]  ;;  %516 = vmatpush.msrb.mxu2 %v2521_v57  ;;  %v415_v19 = vld [vmem:[%s3052_s5 + $0x8] sm:$0xff] }
 0x143   :  { %454 = vmatpush.msrb.mxu0 %v422_v54 }
 0x145   :  { %v333_v61 = vpop.permute.xlu1 %332  ;;  %v317_v62 = vpop.permute.xlu0 %316  ;;  %455 = vmatpush.msrb.mxu0 %v420_v59 }
 0x146   :  { %v321_v63 = vmax.f32 %v311_v60, %v317_v62  ;;  %v259_v25 = vpop.permute.xlu2 %258  ;;  %v421_v60 = vld [vmem:[%s3052_s5 + $0x38] sm:$0xff] }
 0x148   :  { %v329_v0 = vmax.f32 %v321_v63, %v325_v58  ;;  %v2534_v63 = vld [vmem:[%s3053_s7] sm:$0xff] }
 0x149   :  { %517 = vmatpush.msrb.mxu2 %v2534_v63 }
 0x14a   :  { %304 = vrot.lane.b32.xlu0 %v2404_v21, %s2117_s4  ;;  %v337_v2 = vmax.f32 %v329_v0, %v333_v61  ;;  %v418_v0 = vld [vmem:[%s3052_s5 + $0x20] sm:$0xff] }
 0x14b   :  { %456 = vmatpush.msrb.mxu0 %v418_v0  ;;  %672 = vmatpush.msra.mxu2 %v2504_v50 }
 0x14c   :  { %v345_v3 = vmax.f32 %v337_v2, %v341_v1  ;;  %v419_v1 = vld [vmem:[%s3052_s5 + $0x28] sm:$0xff] }
 0x14d   :  { %v349_v4 = vpop.permute.xlu1 %348  ;;  %v357_v5 = vpop.permute.xlu0 %356  ;;  %673 = vmatpush.msra.mxu2 %v2509_v52 }
 0x14e   :  { %v353_v6 = vmax.f32 %v345_v3, %v349_v4  ;;  %v253_v38 = vpop.permute.xlu2 %252  ;;  %v416_v3 = vld [vmem:[%s3052_s5 + $0x10] sm:$0xff]  ;;  %v417_v4 = vld [vmem:[%s3052_s5 + $0x18] sm:$0xff] }
 0x14f   :  { %457 = vmatpush.msrb.mxu0 %v416_v3  ;;  %674 = vmatpush.msra.mxu2 %v2521_v57 }
 0x150   :  { %v361_v7 = vmax.f32 %v353_v6, %v357_v5  ;;  %v2122_v5 = vmov 0.0  }
 0x151   :  { %518 = vmatmul.f32.vlgmr.msrb.gmra.mxu2 %v2122_v5  ;;  %458 = vmatpush.msrb.mxu0 %v414_v18  ;;  %v489_v18 = vld [vmem:[%s3057_s2] sm:$0xff] }
 0x152   :  { %v363_v8 = vmax.f32 %v361_v7, %v2414_v27  ;;  %675 = vmatpush.msra.mxu2 %v2534_v63 }
 0x153   :  { %856 = vmatpush.msra.mxu0 %v2504_v50 }
 0x154   :  { %v371_v12 = vmax.f32 %v363_v8, %v367_v11  ;;  %1040 = vmatpush.msrb.mxu2 %v2504_v50 }
 0x155   :  { %v377_v13 = vpop.permute.xlu0 %376  ;;  %v385_v15 = vpop.permute.xlu1 %384  ;;  %857 = vmatpush.msra.mxu0 %v2509_v52 }
 0x156   :  { %v381_v14 = vmax.f32 %v371_v12, %v377_v13  ;;  %v287_v43 = vpop.permute.xlu2 %286  ;;  %1041 = vmatpush.msrb.mxu2 %v2509_v52 }
 0x157   :  { %858 = vmatpush.msra.mxu0 %v2521_v57 }
 0x158   :  { %v389_v16 = vmax.f32 %v381_v14, %v385_v15  ;;  %1042 = vmatpush.msrb.mxu2 %v2521_v57 }
 0x159   :  { %859 = vmatpush.msra.mxu0 %v2534_v63 }
 0x15a   :  { %394 = vrot.lane.b32.xlu1 %v389_v16, %s2117_s4  ;;  %1043 = vmatpush.msrb.mxu2 %v2534_v63 }
 0x15d   :  { %v251_v20 = vpop.permute.xlu0 %250  ;;  %v229_v23 = vpop.permute.xlu1 %228 }
 0x15e   :  { %v256_v27 = vmax.f32 %v248_v29, %v251_v20  ;;  %v233_v33 = vmax.f32 %v225_v36, %v229_v23  ;;  %v281_v7 = vpop.permute.xlu2 %280  ;;  %v2572_v20 = vld [vmem:[%s3054_s8 + $0x18] sm:$0xff]  ;;  %v2584_v23 = vld [vmem:[%s3054_s8 + $0x8] sm:$0xff] }
 0x15f   :  { %589 = vmatpush.msrb.mxu3 %v2572_v20 }
 0x160   :  { %v264_v37 = vmax.f32 %v256_v27, %v259_v25  ;;  %v401_v25 = vld [vmem:[%s3055_s1] sm:$0xff]  ;;  %v402_v27 = vld [vmem:[%s3055_s1 + $0x8] sm:$0xff] }
 0x161   :  { %590 = vmatpush.msrb.mxu3 %v2577_v22 }
 0x162   :  { %v266_v40 = vmax.f32 %v264_v37, %v2377_v10  ;;  %v429_v10 = vld [vmem:[%s3052_s5 + $0x78] sm:$0xff] }
 0x163   :  { %474 = vmatpush.msrb.mxu1 %v429_v10  ;;  %591 = vmatpush.msrb.mxu3 %v2584_v23 }
 0x164   :  { %v276_v9 = vmax.f32 %v266_v40, %v2465_v32 }
 0x165   :  { %v237_v28 = vpop.permute.xlu0 %236  ;;  %v245_v30 = vpop.permute.xlu1 %244  ;;  %475 = vmatpush.msrb.mxu1 %v427_v46  ;;  %592 = vmatpush.msrb.mxu3 %v2592_v24 }
 0x166   :  { %v241_v44 = vmax.f32 %v233_v33, %v237_v28  ;;  %593 = vmatmul.f32.vlgmr.msrb.gmra.mxu3 %v2122_v5  ;;  %v2123_v5 = vmov 0  }
 0x167   :  { %476 = vmatpush.msrb.mxu1 %v425_v49  ;;  %764 = vmatpush.msra.mxu3 %v2572_v20 }
 0x168   :  { %v249_v51 = vmax.f32 %v241_v44, %v245_v30  ;;  %1984 = vset.pattern.permute.xlu1 %v2123_v5  ;;  %1986 = vset.pattern.permute.xlu0 %v2123_v5 }
 0x169   :  { %477 = vmatpush.msrb.mxu1 %v423_v55  ;;  %765 = vmatpush.msra.mxu3 %v2577_v22 }
 0x16a   :  { %v257_v61 = vmax.f32 %v249_v51, %v253_v38  ;;  %v2632_v38 = vld [vmem:[%s3056_s6] sm:$0x3]  ;;  %1985 = vset.pattern.permute.xlu2 %v2123_v5 }
 0x16b   :  { %478 = vmatpush.msrb.mxu1 %v421_v60  ;;  %766 = vmatpush.msra.mxu3 %v2584_v23  ;;  %v433_v40 = vperm.slane %v2632_v38, 1 }
 0x16d   :  { %v279_v39 = vpop.permute.xlu0 %278  ;;  %v261_v31 = vpop.permute.xlu1 %260  ;;  %479 = vmatpush.msrb.mxu1 %v419_v1  ;;  %767 = vmatpush.msra.mxu3 %v2592_v24 }
 0x16e   :  { %v284_v42 = vmax.f32 %v276_v9, %v279_v39  ;;  %v265_v2 = vmax.f32 %v257_v61, %v261_v31  ;;  %v432_v39 = vperm.slane %v2632_v38, 0 }
 0x16f   :  { %480 = vmatpush.msrb.mxu1 %v417_v4  ;;  %1132 = vmatpush.msrb.mxu3 %v2572_v20  ;;  %v490_v4 = vld [vmem:[%s3057_s2 + $0x8] sm:$0xff] }
 0x170   :  { %v292_v45 = vmax.f32 %v284_v42, %v287_v43  ;;  %v267_v6 = vmax.f32 %v265_v2, %v2404_v21  ;;  %v297_v21 = vpop.permute.xlu2 %296 }
 0x171   :  { %481 = vmatpush.msrb.mxu1 %v415_v19  ;;  %1133 = vmatpush.msrb.mxu3 %v2577_v22  ;;  %v566_v19 = vsub.f32 1.0, %v489_v18 }
 0x172   :  { %v277_v8 = vmax.f32 %v267_v6, %v2469_v47 }
 0x173   :  { %948 = vmatpush.msra.mxu1 %v2572_v20  ;;  %1134 = vmatpush.msrb.mxu3 %v2584_v23 }
 0x174   :  { %v285_v12 = vmax.f32 %v277_v8, %v281_v7 }
 0x175   :  { %v295_v34 = vpop.permute.xlu0 %294  ;;  %v303_v53 = vpop.permute.xlu1 %302  ;;  %949 = vmatpush.msra.mxu1 %v2577_v22  ;;  %1135 = vmatpush.msrb.mxu3 %v2592_v24 }
 0x176   :  { %v300_v32 = vmax.f32 %v292_v45, %v295_v34 }
 0x177   :  { %950 = vmatpush.msra.mxu1 %v2584_v23 }
 0x178   :  { %v308_v56 = vmax.f32 %v300_v32, %v303_v53 }
 0x179   :  { %951 = vmatpush.msra.mxu1 %v2592_v24 }
 0x17d   :  { %v289_v11 = vpop.permute.xlu1 %288 }
 0x17e   :  { %v293_v13 = vmax.f32 %v285_v12, %v289_v11 }
 0x180   :  { %v301_v15 = vmax.f32 %v293_v13, %v297_v21 }
 0x1b4   :  { %v393_v58 = vpop.permute.xlu0 %392 }
 0x1b5   :  { %v399_v62 = vsel %vm398_vm0, %v308_v56, %v393_v58 }
 0x1b6   :  { %405 = vrot.lane.b32.xlu2 %v399_v62, %s2121_s20 }
 0x1bc   :  { %v305_v14 = vpop.permute.xlu0 %304 }
 0x1bd   :  { %v309_v16 = vmax.f32 %v301_v15, %v305_v14 }
 0x1cc   :  { %v395_v47 = vpop.permute.xlu1 %394 }
 0x1cd   :  { %v400_v17 = vsel %vm398_vm0, %v309_v16, %v395_v47 }
 0x1ce   :  { %407 = vrot.lane.b32.xlu0 %v400_v17, %s2121_s20 }
 0x1d4   :  { %v519_v41 = vpop.f32.mrf.mxu2 }
 0x1e9   :  { %v594_v34 = vpop.f32.mrf.mxu3 }
 0x1ea   :  { %v598_v44 = vrot.slane %v594_v34, 2 }
 0x210   :  { %v406_v28 = vpop.permute.xlu2 %405 }
 0x211   :  { %v412_v29 = vsel %vm411_vm1, %v401_v25, %v406_v28 }
 0x212   :  { %1941 = vmatmul.msk.f32.vlgmr.msrb.gmra.mxu0 %vm436_vm2, %v412_v29  ;;  %1943 = vmatmul.msk.f32.vlgmr.msrb.gmra.mxu1 %vm436_vm2, %v412_v29 }
 0x213   :  { %1218 = vmatpush.msrb.mxu0 %v2504_v50  ;;  %1303 = vmatpush.msrb.mxu1 %v2572_v20 }
 0x215   :  { %1219 = vmatpush.msrb.mxu0 %v2509_v52  ;;  %1304 = vmatpush.msrb.mxu1 %v2577_v22 }
 0x217   :  { %1220 = vmatpush.msrb.mxu0 %v2521_v57  ;;  %1305 = vmatpush.msrb.mxu1 %v2584_v23 }
 0x219   :  { %1221 = vmatpush.msrb.mxu0 %v2534_v63  ;;  %1306 = vmatpush.msrb.mxu1 %v2592_v24 }
 0x240   :  { %v408_v30 = vpop.permute.xlu0 %407 }
 0x241   :  { %v413_v37 = vsel %vm411_vm1, %v402_v27, %v408_v30 }
 0x242   :  { %1942 = vmatmul.msk.f32.gmra.mxu0 %vm436_vm2, %v413_v37  ;;  %1944 = vmatmul.msk.f32.gmra.mxu1 %vm436_vm2, %v413_v37 }
 0x28f   :  { %v460_v9 = vpop.f32.mrf.mxu0  ;;  %v483_v31 = vpop.f32.mrf.mxu1 }
 0x290   :  { %v2638_v36 = vadd.f32 %v460_v9, %v432_v39  ;;  %v2640_v42 = vadd.f32 %v483_v31, %v433_v40  ;;  %v644_v9 = vsub.f32 1.0, %v490_v4 }
 0x292   :  { %v522_v33 = vadd.f32 %v519_v41, %v2638_v36 }
 0x294   :  { %1987 = vtanh.f32 %v522_v33  ;;  %v1945_v26 = vmul.f32 -1.442695, %v522_v33 }
 0x29a   :  { %v1988_v43 = vpop.eup %1987 }
 0x29b   :  { %545 = vrot.lane.b32.xlu2 %v1988_v43, %s2119_s18 }
 0x2bf   :  { %v486_v45 = vpop.f32.mrf.mxu1 }
 0x2c0   :  { %v2644_v35 = vadd.f32 %v486_v45, %v433_v40 }
 0x2c2   :  { %v600_v10 = vadd.f32 %v598_v44, %v2644_v35 }
 0x2c4   :  { %1989 = vtanh.f32 %v600_v10  ;;  %v1946_v1 = vmul.f32 -1.442695, %v600_v10 }
 0x2c5   :  { %1991 = vpow2.f32 %v1945_v26 }
 0x2ca   :  { %v1990_v32 = vpop.eup %1989 }
 0x2cb   :  { %623 = vrot.lane.b32.xlu1 %v1990_v32, %s2119_s18  ;;  %v1992_v46 = vpop.eup %1991 }
 0x2cc   :  { %v526_v48 = vadd.f32 1.0, %v1992_v46 }
 0x2ce   :  { %1993 = vrcp.f32 %v526_v48  ;;  %v538_v56 = vand.u32 2147483648, %v526_v48  ;;  %vm532_vm4 = vweird.f32 %v526_v48  ;;  %v536_v58 = vand.u32 2147483647, %v526_v48 }
 0x2cf   :  { %1995 = vpow2.f32 %v1946_v1 }
 0x2d0   :  { %v539_v60 = vor.u32 1.1754944e-38, %v538_v56  ;;  %vm537_vm6 = vcmp.eq.f32.partialorder %v536_v58, 8.507059e+37 }
 0x2d4   :  { %v1994_v49 = vpop.eup %1993 }
 0x2d5   :  { %v528_v51 = vmul.f32 %v1994_v49, %v526_v48  ;;  %vm533_vm3 = vweird.f32 %v1994_v49  ;;  %v1996_v2 = vpop.eup %1995 }
 0x2d6   :  { %vm534_vm5 = vmor %vm532_vm4, %vm533_vm3  ;;  %v604_v3 = vadd.f32 1.0, %v1996_v2 }
 0x2d7   :  { %v529_v53 = vsub.f32 1.0, %v528_v51 }
 0x2d8   :  { %1997 = vrcp.f32 %v604_v3  ;;  %v616_v13 = vand.u32 2147483648, %v604_v3  ;;  %vm610_vm8 = vweird.f32 %v604_v3  ;;  %v614_v21 = vand.u32 2147483647, %v604_v3 }
 0x2d9   :  { %v530_v54 = vmul.f32 %v1994_v49, %v529_v53 }
 0x2da   :  { %v617_v15 = vor.u32 1.1754944e-38, %v616_v13  ;;  %vm615_vm10 = vcmp.eq.f32.partialorder %v614_v21, 8.507059e+37 }
 0x2db   :  { %v531_v55 = vadd.f32 %v1994_v49, %v530_v54 }
 0x2dd   :  { %v535_v59 = vsel %vm534_vm5, %v1994_v49, %v531_v55  ;;  %vm1902_vm5 = vcmask 1041408  }
 0x2de   :  { %v540_v62 = vsel %vm537_vm6, %v539_v60, %v535_v59  ;;  %v1998_v6 = vpop.eup %1997 }
 0x2df   :  { %v606_v7 = vmul.f32 %v1998_v6, %v604_v3  ;;  %vm611_vm7 = vweird.f32 %v1998_v6  ;;  %v543_v25 = vmul.f32 0.0, %v540_v62 }
 0x2e0   :  { %vm612_vm9 = vmor %vm610_vm8, %vm611_vm7 }
 0x2e1   :  { %v607_v8 = vsub.f32 1.0, %v606_v7 }
 0x2e3   :  { %v608_v11 = vmul.f32 %v1998_v6, %v607_v8 }
 0x2e5   :  { %v609_v12 = vadd.f32 %v1998_v6, %v608_v11 }
 0x2e7   :  { %v613_v14 = vsel %vm612_vm9, %v1998_v6, %v609_v12 }
 0x2e8   :  { %v618_v47 = vsel %vm615_vm10, %v617_v15, %v613_v14 }
 0x2e9   :  { %v621_v30 = vmul.f32 0.0, %v618_v47 }
 0x2f5   :  { %v546_v61 = vpop.permute.xlu2 %545 }
 0x2f6   :  { %v548_v0 = vmul.f32 %v546_v61, %v540_v62 }
 0x2f8   :  { %550 = vrot.lane.b32.xlu1 %v548_v0, %s2121_s20 }
 0x300   :  { %640 = vperm.xlu1 %1984, %v490_v4  }
 0x308   :  { %569 = vperm.xlu1 %1984, %v566_v19  }
 0x33d   :  { %v624_v16 = vpop.permute.xlu1 %623 }
 0x33e   :  { %v626_v17 = vmul.f32 %v624_v16, %v618_v47 }
 0x340   :  { %628 = vrot.lane.b32.xlu0 %v626_v17, %s2121_s20 }
 0x36a   :  { %v551_v28 = vpop.permute.xlu1 %550 }
 0x36b   :  { %v2656_v29 = vadd.f32 %v551_v28, %v543_v25 }
 0x36d   :  { %1999 = vtanh.f32 %v2656_v29 }
 0x372   :  { %v2661_v31 = vpop.permute.xlu1 %640 }
 0x373   :  { %v2000_v27 = vpop.eup %1999 }
 0x374   :  { %556 = vrot.lane.b32.xlu0 %v2000_v27, %s2119_s18 }
 0x37a   :  { %v2663_v43 = vpop.permute.xlu1 %569 }
 0x37b   :  { %v2666_v44 = vmul.f32 0.0, %v2663_v43 }
 0x37c   :  { %562 = vperm.xlu0 %1986, %v489_v18  }
 0x3b2   :  { %v629_v37 = vpop.permute.xlu0 %628 }
 0x3b3   :  { %v631_v40 = vadd.f32 %v629_v37, %v621_v30 }
 0x3b5   :  { %2001 = vtanh.f32 %v631_v40  ;;  %v652_v53 = vmul.f32 %v2661_v31, %v631_v40 }
 0x3bb   :  { %v2002_v41 = vpop.eup %2001 }
 0x3bc   :  { %634 = vrot.lane.b32.xlu2 %v2002_v41, %s2119_s18 }
 0x3c4   :  { %647 = vperm.xlu2 %1985, %v644_v9  }
 0x3e6   :  { %v557_v33 = vpop.permute.xlu0 %556 }
 0x3e7   :  { %v559_v34 = vmul.f32 %v557_v33, %v540_v62 }
 0x3ee   :  { %v2668_v45 = vpop.permute.xlu0 %562 }
 0x3ef   :  { %v565_v10 = vmul.f32 %v2668_v45, %v559_v34 }
 0x3f1   :  { %v2672_v26 = vadd.f32 %v2666_v44, %v565_v10 }
 0x3f3   :  { %656 = vrot.lane.b32.xlu2 %v2672_v26, %s2121_s20  ;;  %v725_v21 = vrot.slane %v2672_v26, 6 }
 0x416   :  { %v635_v32 = vpop.permute.xlu2 %634 }
 0x417   :  { %v637_v46 = vmul.f32 %v635_v32, %v618_v47 }
 0x419   :  { %v643_v49 = vmul.f32 %v2661_v31, %v637_v46 }
 0x41e   :  { %v2676_v48 = vpop.permute.xlu2 %647 }
 0x41f   :  { %v650_v51 = vmul.f32 0.0, %v2676_v48 }
 0x421   :  { %v2681_v54 = vadd.f32 %v650_v51, %v643_v49  ;;  %v2683_v55 = vadd.f32 %v652_v53, %v650_v51 }
 0x423   :  { %v747_v56 = vrot.slane %v2681_v54, 6  ;;  %v817_v28 = vrot.slane %v2681_v54, 2 }
 0x425   :  { %748 = vrot.lane.b32.xlu1 %v747_v56, %s2121_s20 }
 0x44d   :  { %v657_v58 = vpop.permute.xlu2 %656 }
 0x44e   :  { %1947 = vmatmul.msk.f32.vlgmr.msra.gmra.mxu2 %vm411_vm1, %v657_v58 }
 0x44f   :  { %1394 = vmatpush.msra.mxu2 %v2504_v50 }
 0x451   :  { %1395 = vmatpush.msra.mxu2 %v2509_v52 }
 0x453   :  { %1396 = vmatpush.msra.mxu2 %v2521_v57 }
 0x455   :  { %1397 = vmatpush.msra.mxu2 %v2534_v63 }
 0x497   :  { %v749_v59 = vpop.permute.xlu1 %748 }
 0x498   :  { %1949 = vmatmul.msk.f32.vlgmr.msra.gmra.mxu3 %vm411_vm1, %v749_v59  ;;  %v574_v59 = vmul.f32 %v2668_v45, %v2656_v29  ;;  %v797_v29 = vrot.slane %v2683_v55, 2 }
 0x499   :  { %1486 = vmatpush.msra.mxu3 %v2572_v20 }
 0x49b   :  { %1487 = vmatpush.msra.mxu3 %v2577_v22 }
 0x49d   :  { %1488 = vmatpush.msra.mxu3 %v2584_v23 }
 0x49f   :  { %1489 = vmatpush.msra.mxu3 %v2592_v24 }
 0x4d1   :  { %v677_v60 = vpop.f32.mrf.mxu2 }
 0x4d2   :  { %v681_v61 = vrot.slane %v677_v60, 6 }
 0x4d4   :  { %v683_v62 = vadd.f32 %v681_v61, %v2638_v36  ;;  %v575_v61 = vadd.f32 %v574_v59, %v2666_v44 }
 0x4d6   :  { %2003 = vtanh.f32 %v683_v62  ;;  %v1948_v1 = vmul.f32 -1.442695, %v683_v62  ;;  %v705_v62 = vrot.slane %v575_v61, 6 }
 0x4d8   :  { %2005 = vpow2.f32 %v1948_v1 }
 0x4dc   :  { %v2004_v0 = vpop.eup %2003 }
 0x4dd   :  { %709 = vrot.lane.b32.xlu2 %v2004_v0, %s2119_s18 }
 0x4de   :  { %v2006_v2 = vpop.eup %2005 }
 0x4df   :  { %v687_v3 = vadd.f32 1.0, %v2006_v2 }
 0x4e1   :  { %2007 = vrcp.f32 %v687_v3  ;;  %v699_v15 = vand.u32 2147483648, %v687_v3  ;;  %vm693_vm12 = vweird.f32 %v687_v3  ;;  %v697_v16 = vand.u32 2147483647, %v687_v3 }
 0x4e3   :  { %v700_v17 = vor.u32 1.1754944e-38, %v699_v15  ;;  %vm698_vm14 = vcmp.eq.f32.partialorder %v697_v16, 8.507059e+37  ;;  %v576_v15 = vmul.f32 %v2672_v26, %v2668_v45 }
 0x4e7   :  { %v2008_v7 = vpop.eup %2007 }
 0x4e8   :  { %v689_v8 = vmul.f32 %v2008_v7, %v687_v3  ;;  %vm694_vm11 = vweird.f32 %v2008_v7 }
 0x4e9   :  { %vm695_vm13 = vmor %vm693_vm12, %vm694_vm11 }
 0x4ea   :  { %v690_v12 = vsub.f32 1.0, %v689_v8 }
 0x4ec   :  { %v691_v13 = vmul.f32 %v2008_v7, %v690_v12 }
 0x4ee   :  { %v692_v14 = vadd.f32 %v2008_v7, %v691_v13 }
 0x4f0   :  { %v696_v47 = vsel %vm695_vm13, %v2008_v7, %v692_v14 }
 0x4f1   :  { %v701_v19 = vsel %vm698_vm14, %v700_v17, %v696_v47  ;;  %vm1904_vm14 = vcmask 1043456  }
 0x4f2   :  { %v707_v0 = vmul.f32 %v705_v62, %v701_v19 }
 0x51b   :  { %v769_v4 = vpop.f32.mrf.mxu3 }
 0x51c   :  { %v773_v5 = vrot.slane %v769_v4, 4 }
 0x51e   :  { %v775_v6 = vadd.f32 %v773_v5, %v2644_v35 }
 0x520   :  { %2009 = vtanh.f32 %v775_v6  ;;  %v1950_v27 = vmul.f32 -1.442695, %v775_v6 }
 0x522   :  { %2011 = vpow2.f32 %v1950_v27 }
 0x526   :  { %v2010_v11 = vpop.eup %2009 }
 0x527   :  { %801 = vrot.lane.b32.xlu0 %v2010_v11, %s2119_s18 }
 0x528   :  { %v2012_v30 = vpop.eup %2011 }
 0x529   :  { %v779_v37 = vadd.f32 1.0, %v2012_v30 }
 0x52b   :  { %2013 = vrcp.f32 %v779_v37  ;;  %v791_v10 = vand.u32 2147483648, %v779_v37  ;;  %vm785_vm0 = vweird.f32 %v779_v37  ;;  %v789_v32 = vand.u32 2147483647, %v779_v37 }
 0x52d   :  { %v792_v49 = vor.u32 1.1754944e-38, %v791_v10  ;;  %vm790_vm4 = vcmp.eq.f32.partialorder %v789_v32, 8.507059e+37 }
 0x52f   :  { %726 = vrot.lane.b32.xlu0 %v725_v21, %s2121_s20 }
 0x531   :  { %v2014_v40 = vpop.eup %2013 }
 0x532   :  { %v781_v41 = vmul.f32 %v2014_v40, %v779_v37  ;;  %vm786_vm15 = vweird.f32 %v2014_v40 }
 0x533   :  { %vm787_vm3 = vmor %vm785_vm0, %vm786_vm15 }
 0x534   :  { %v782_v9 = vsub.f32 1.0, %v781_v41  ;;  %v2750_v41 = vpop.f32.mrf.mxu0 }
 0x536   :  { %v783_v33 = vmul.f32 %v2014_v40, %v782_v9 }
 0x537   :  { %v710_v18 = vpop.permute.xlu2 %709 }
 0x538   :  { %v712_v25 = vmul.f32 %v710_v18, %v701_v19  ;;  %v784_v34 = vadd.f32 %v2014_v40, %v783_v33 }
 0x53a   :  { %714 = vrot.lane.b32.xlu1 %v712_v25, %s2121_s20  ;;  %v788_v46 = vsel %vm787_vm3, %v2014_v40, %v784_v34 }
 0x53b   :  { %v793_v51 = vsel %vm790_vm4, %v792_v49, %v788_v46 }
 0x53c   :  { %v799_v44 = vmul.f32 %v797_v29, %v793_v51 }
 0x542   :  { %818 = vrot.lane.b32.xlu1 %v817_v28, %s2121_s20 }
 0x599   :  { %v802_v53 = vpop.permute.xlu0 %801 }
 0x59a   :  { %v804_v56 = vmul.f32 %v802_v53, %v793_v51 }
 0x59c   :  { %806 = vrot.lane.b32.xlu2 %v804_v56, %s2121_s20 }
 0x5a1   :  { %v727_v58 = vpop.permute.xlu0 %726 }
 0x5a2   :  { %v729_v60 = vmul.f32 %v727_v58, %v2663_v43 }
 0x5a4   :  { %731 = vrot.lane.b32.xlu1 %v729_v60, %s2118_s17 }
 0x5ac   :  { %v715_v1 = vpop.permute.xlu1 %714 }
 0x5ad   :  { %v2712_v2 = vadd.f32 %v715_v1, %v707_v0 }
 0x5af   :  { %2015 = vtanh.f32 %v2712_v2 }
 0x5b4   :  { %v819_v4 = vpop.permute.xlu1 %818 }
 0x5b5   :  { %v2016_v3 = vpop.eup %2015  ;;  %v821_v5 = vmul.f32 %v819_v4, %v2676_v48 }
 0x5b6   :  { %720 = vrot.lane.b32.xlu2 %v2016_v3, %s2119_s18 }
 0x5be   :  { %823 = vrot.lane.b32.xlu2 %v821_v5, %s2118_s17 }
 0x5c6   :  { %736 = vrot.lane.b32.xlu2 %v705_v62, %s2118_s17 }
 0x5f6   :  { %v807_v6 = vpop.permute.xlu2 %806 }
 0x5f7   :  { %v2720_v7 = vadd.f32 %v807_v6, %v799_v44 }
 0x5f9   :  { %2017 = vtanh.f32 %v2720_v7 }
 0x5ff   :  { %v2018_v8 = vpop.eup %2017 }
 0x600   :  { %812 = vrot.lane.b32.xlu0 %v2018_v8, %s2119_s18 }
 0x610   :  { %v721_v11 = vpop.permute.xlu2 %720 }
 0x611   :  { %v723_v12 = vmul.f32 %v721_v11, %v701_v19 }
 0x613   :  { %v724_v13 = vmul.f32 %v723_v12, %v2668_v45 }
 0x616   :  { %v732_v21 = vpop.permute.xlu1 %731 }
 0x617   :  { %v734_v14 = vadd.f32 %v732_v21, %v724_v13  ;;  %v827_v13 = vmul.f32 %v2720_v7, %v2661_v31 }
 0x618   :  { %v824_v17 = vpop.permute.xlu2 %823 }
 0x619   :  { %v745_v55 = vmul.f32 %v734_v14, %v2668_v45  ;;  %v839_v16 = vrot.slane %v734_v14, 2  ;;  %v909_v49 = vrot.slane %v734_v14, 6 }
 0x61b   :  { %840 = vrot.lane.b32.xlu0 %v839_v16, %s2121_s20  ;;  %v2730_v47 = vsel %vm1902_vm5, %v576_v15, %v745_v55 }
 0x620   :  { %v737_v18 = vpop.permute.xlu2 %736 }
 0x621   :  { %v739_v19 = vmul.f32 %v737_v18, %v2663_v43 }
 0x623   :  { %828 = vrot.lane.b32.xlu0 %v797_v29, %s2118_s17 }
 0x62b   :  { %741 = vrot.lane.b32.xlu0 %v739_v19, %s2121_s20 }
 0x672   :  { %v813_v25 = vpop.permute.xlu0 %812 }
 0x673   :  { %v815_v28 = vmul.f32 %v813_v25, %v793_v51 }
 0x675   :  { %v816_v26 = vmul.f32 %v815_v28, %v2661_v31 }
 0x677   :  { %v2736_v27 = vadd.f32 %v824_v17, %v816_v26 }
 0x679   :  { %v931_v30 = vrot.slane %v2736_v27, 4  ;;  %v1001_v15 = vrot.slane %v2736_v27, 2 }
 0x67b   :  { %932 = vrot.lane.b32.xlu1 %v931_v30, %s2121_s20 }
 0x68d   :  { %v841_v37 = vpop.permute.xlu0 %840 }
 0x68e   :  { %1951 = vmatmul.msk.f32.vlgmr.msra.gmra.mxu0 %vm411_vm1, %v841_v37 }
 0x68f   :  { %1578 = vmatpush.msra.mxu0 %v2504_v50 }
 0x691   :  { %1579 = vmatpush.msra.mxu0 %v2509_v52 }
 0x693   :  { %1580 = vmatpush.msra.mxu0 %v2521_v57 }
 0x695   :  { %1581 = vmatpush.msra.mxu0 %v2534_v63  ;;  %v829_v32 = vpop.permute.xlu0 %828 }
 0x696   :  { %v831_v46 = vmul.f32 %v829_v32, %v2676_v48 }
 0x6ed   :  { %v933_v40 = vpop.permute.xlu1 %932 }
 0x6ee   :  { %1953 = vmatmul.msk.f32.vlgmr.msra.gmra.mxu1 %vm411_vm1, %v933_v40 }
 0x6ef   :  { %1670 = vmatpush.msra.mxu1 %v2572_v20 }
 0x6f1   :  { %1671 = vmatpush.msra.mxu1 %v2577_v22 }
 0x6f3   :  { %1672 = vmatpush.msra.mxu1 %v2584_v23 }
 0x6f5   :  { %1673 = vmatpush.msra.mxu1 %v2592_v24 }
 0x70b   :  { %v861_v9 = vpop.f32.mrf.mxu0 }
 0x70c   :  { %v865_v33 = vrot.slane %v861_v9, 4 }
 0x70e   :  { %v867_v34 = vadd.f32 %v865_v33, %v2638_v36 }
 0x710   :  { %2019 = vtanh.f32 %v867_v34  ;;  %v1952_v51 = vmul.f32 -1.442695, %v867_v34 }
 0x712   :  { %2021 = vpow2.f32 %v1952_v51 }
 0x716   :  { %v2020_v10 = vpop.eup %2019 }
 0x717   :  { %893 = vrot.lane.b32.xlu1 %v2020_v10, %s2119_s18 }
 0x718   :  { %v2022_v53 = vpop.eup %2021 }
 0x719   :  { %v871_v56 = vadd.f32 1.0, %v2022_v53 }
 0x71b   :  { %2023 = vrcp.f32 %v871_v56  ;;  %v883_v5 = vand.u32 2147483648, %v871_v56  ;;  %vm877_vm7 = vweird.f32 %v871_v56  ;;  %v881_v29 = vand.u32 2147483647, %v871_v56 }
 0x71d   :  { %v884_v6 = vor.u32 1.1754944e-38, %v883_v5  ;;  %vm882_vm9 = vcmp.eq.f32.partialorder %v881_v29, 8.507059e+37 }
 0x71f   :  { %833 = vrot.lane.b32.xlu1 %v831_v46, %s2121_s20  ;;  %v742_v46 = vpop.permute.xlu0 %741 }
 0x721   :  { %v2024_v61 = vpop.eup %2023 }
 0x722   :  { %v873_v0 = vmul.f32 %v2024_v61, %v871_v56  ;;  %vm878_vm6 = vweird.f32 %v2024_v61 }
 0x723   :  { %vm879_vm8 = vmor %vm877_vm7, %vm878_vm6 }
 0x724   :  { %v874_v1 = vsub.f32 1.0, %v873_v0 }
 0x726   :  { %v875_v3 = vmul.f32 %v2024_v61, %v874_v1 }
 0x727   :  { %910 = vrot.lane.b32.xlu1 %v909_v49, %s2121_s20  ;;  %v735_v49 = vmul.f32 %v2712_v2, %v2668_v45 }
 0x728   :  { %v876_v4 = vadd.f32 %v2024_v61, %v875_v3 }
 0x729   :  { %v744_v51 = vadd.f32 %v742_v46, %v735_v49 }
 0x72a   :  { %v880_v44 = vsel %vm879_vm8, %v2024_v61, %v876_v4 }
 0x72b   :  { %v885_v11 = vsel %vm882_vm9, %v884_v6, %v880_v44  ;;  %v889_v53 = vrot.slane %v744_v51, 6 }
 0x72d   :  { %v891_v56 = vmul.f32 %v889_v53, %v885_v11 }
 0x76b   :  { %v953_v58 = vpop.f32.mrf.mxu1 }
 0x76c   :  { %v957_v59 = vrot.slane %v953_v58, 6 }
 0x76e   :  { %v959_v60 = vadd.f32 %v957_v59, %v2644_v35 }
 0x770   :  { %2025 = vtanh.f32 %v959_v60  ;;  %v1954_v17 = vmul.f32 -1.442695, %v959_v60 }
 0x772   :  { %2027 = vpow2.f32 %v1954_v17 }
 0x776   :  { %v2026_v62 = vpop.eup %2025 }
 0x777   :  { %985 = vrot.lane.b32.xlu2 %v2026_v62, %s2119_s18 }
 0x778   :  { %v2028_v18 = vpop.eup %2027 }
 0x779   :  { %v963_v19 = vadd.f32 1.0, %v2028_v18 }
 0x77b   :  { %2029 = vrcp.f32 %v963_v19  ;;  %v975_v37 = vand.u32 2147483648, %v963_v19  ;;  %vm969_vm11 = vweird.f32 %v963_v19  ;;  %v973_v40 = vand.u32 2147483647, %v963_v19 }
 0x77d   :  { %v976_v33 = vor.u32 1.1754944e-38, %v975_v37  ;;  %vm974_vm13 = vcmp.eq.f32.partialorder %v973_v40, 8.507059e+37 }
 0x781   :  { %v2030_v25 = vpop.eup %2029 }
 0x782   :  { %v965_v28 = vmul.f32 %v2030_v25, %v963_v19  ;;  %vm970_vm10 = vweird.f32 %v2030_v25 }
 0x783   :  { %vm971_vm12 = vmor %vm969_vm11, %vm970_vm10  ;;  %vm1906_vm10 = vcmask 1045504  }
 0x784   :  { %v966_v26 = vsub.f32 1.0, %v965_v28 }
 0x786   :  { %v967_v7 = vmul.f32 %v2030_v25, %v966_v26 }
 0x788   :  { %v968_v30 = vadd.f32 %v2030_v25, %v967_v7 }
 0x789   :  { %v894_v8 = vpop.permute.xlu1 %893 }
 0x78a   :  { %v896_v12 = vmul.f32 %v894_v8, %v885_v11  ;;  %v972_v9 = vsel %vm971_vm12, %v2030_v25, %v968_v30 }
 0x78b   :  { %v977_v10 = vsel %vm974_vm13, %v976_v33, %v972_v9 }
 0x78c   :  { %898 = vrot.lane.b32.xlu2 %v896_v12, %s2121_s20 }
 0x791   :  { %v834_v21 = vpop.permute.xlu1 %833 }
 0x792   :  { %v836_v14 = vadd.f32 %v834_v21, %v827_v13 }
 0x794   :  { %1002 = vrot.lane.b32.xlu2 %v1001_v15, %s2121_s20  ;;  %v981_v0 = vrot.slane %v836_v14, 2 }
 0x796   :  { %v983_v2 = vmul.f32 %v981_v0, %v977_v10 }
 0x799   :  { %v911_v55 = vpop.permute.xlu1 %910 }
 0x79a   :  { %v913_v16 = vmul.f32 %v911_v55, %v2663_v43 }
 0x79c   :  { %915 = vrot.lane.b32.xlu2 %v913_v16, %s2118_s17 }
 0x7d1   :  { %v986_v34 = vpop.permute.xlu2 %985 }
 0x7d2   :  { %v988_v32 = vmul.f32 %v986_v34, %v977_v10 }
 0x7d4   :  { %990 = vrot.lane.b32.xlu0 %v988_v32, %s2121_s20 }
 0x7e6   :  { %v899_v58 = vpop.permute.xlu2 %898 }
 0x7e7   :  { %v2769_v59 = vadd.f32 %v899_v58, %v891_v56 }
 0x7e9   :  { %2031 = vtanh.f32 %v2769_v59 }
 0x7ee   :  { %v1003_v61 = vpop.permute.xlu2 %1002 }
 0x7ef   :  { %v2032_v60 = vpop.eup %2031  ;;  %v1005_v62 = vmul.f32 %v1003_v61, %v2676_v48 }
 0x7f0   :  { %904 = vrot.lane.b32.xlu0 %v2032_v60, %s2119_s18 }
 0x7f6   :  { %v916_v6 = vpop.permute.xlu2 %915 }
 0x7f8   :  { %1007 = vrot.lane.b32.xlu0 %v1005_v62, %s2118_s17 }
 0x800   :  { %1012 = vrot.lane.b32.xlu0 %v981_v0, %s2118_s17 }
 0x846   :  { %v991_v1 = vpop.permute.xlu0 %990 }
 0x847   :  { %v2776_v3 = vadd.f32 %v991_v1, %v983_v2 }
 0x849   :  { %2033 = vtanh.f32 %v2776_v3 }
 0x84f   :  { %v2034_v4 = vpop.eup %2033 }
 0x850   :  { %996 = vrot.lane.b32.xlu1 %v2034_v4, %s2119_s18 }
 0x862   :  { %v905_v5 = vpop.permute.xlu0 %904 }
 0x863   :  { %v907_v29 = vmul.f32 %v905_v5, %v885_v11 }
 0x865   :  { %v908_v44 = vmul.f32 %v907_v29, %v2668_v45 }
 0x867   :  { %v918_v8 = vadd.f32 %v916_v6, %v908_v44 }
 0x869   :  { %v929_v12 = vmul.f32 %v918_v8, %v2668_v45  ;;  %v1023_v13 = vrot.slane %v918_v8, 4  ;;  %v1093_v30 = vrot.slane %v918_v8, 6 }
 0x86a   :  { %v1008_v14 = vpop.permute.xlu0 %1007 }
 0x86b   :  { %1024 = vrot.lane.b32.xlu1 %v1023_v13, %s2121_s20  ;;  %v2785_v21 = vsel %vm1904_vm14, %v2730_v47, %v929_v12 }
 0x872   :  { %v1013_v15 = vpop.permute.xlu0 %1012 }
 0x873   :  { %920 = vrot.lane.b32.xlu1 %v889_v53, %s2118_s17  ;;  %v1015_v11 = vmul.f32 %v1013_v15, %v2676_v48  ;;  %v919_v15 = vmul.f32 %v2769_v59, %v2668_v45 }
 0x87b   :  { %1017 = vrot.lane.b32.xlu1 %v1015_v11, %s2121_s20 }
 0x8c2   :  { %v997_v55 = vpop.permute.xlu1 %996 }
 0x8c3   :  { %v999_v16 = vmul.f32 %v997_v55, %v977_v10 }
 0x8c5   :  { %v1000_v17 = vmul.f32 %v999_v16, %v2661_v31 }
 0x8c7   :  { %v2791_v18 = vadd.f32 %v1008_v14, %v1000_v17 }
 0x8c9   :  { %v1115_v19 = vrot.slane %v2791_v18, 2 }
 0x8cb   :  { %1116 = vrot.lane.b32.xlu2 %v1115_v19, %s2121_s20 }
 0x8dd   :  { %v1025_v47 = vpop.permute.xlu1 %1024 }
 0x8de   :  { %1955 = vmatmul.msk.f32.vlgmr.msrb.gmra.mxu2 %vm411_vm1, %v1025_v47 }
 0x8df   :  { %1762 = vmatpush.msrb.mxu2 %v2504_v50 }
 0x8e1   :  { %1763 = vmatpush.msrb.mxu2 %v2509_v52 }
 0x8e3   :  { %1764 = vmatpush.msrb.mxu2 %v2521_v57 }
 0x8e5   :  { %1765 = vmatpush.msrb.mxu2 %v2534_v63 }
 0x925   :  { %v1117_v25 = vpop.permute.xlu2 %1116 }
 0x926   :  { %1957 = vmatmul.msk.f32.vlgmr.msrb.gmra.mxu3 %vm411_vm1, %v1117_v25 }
 0x927   :  { %1844 = vmatpush.msrb.mxu3 %v2572_v20 }
 0x929   :  { %1845 = vmatpush.msrb.mxu3 %v2577_v22  ;;  %v921_v22 = vpop.permute.xlu1 %920 }
 0x92b   :  { %1846 = vmatpush.msrb.mxu3 %v2584_v23  ;;  %v923_v23 = vmul.f32 %v921_v22, %v2663_v43 }
 0x92d   :  { %1847 = vmatpush.msrb.mxu3 %v2592_v24 }
 0x931   :  { %v1018_v55 = vpop.permute.xlu1 %1017 }
 0x961   :  { %v1045_v28 = vpop.f32.mrf.mxu2 }
 0x962   :  { %v1049_v26 = vrot.slane %v1045_v28, 2  ;;  %v1011_v28 = vmul.f32 %v2776_v3, %v2661_v31 }
 0x964   :  { %v1051_v50 = vadd.f32 %v1049_v26, %v2638_v36  ;;  %v1020_v26 = vadd.f32 %v1018_v55, %v1011_v28 }
 0x966   :  { %2035 = vtanh.f32 %v1051_v50  ;;  %v1956_v20 = vmul.f32 -1.442695, %v1051_v50  ;;  %v1162_v50 = vrot.slane %v1020_v26, 2 }
 0x96c   :  { %v2036_v52 = vpop.eup %2035 }
 0x96d   :  { %1077 = vrot.lane.b32.xlu0 %v2036_v52, %s2119_s18 }
 0x9a9   :  { %v1137_v57 = vpop.f32.mrf.mxu3 }
 0x9aa   :  { %v1140_v63 = vadd.f32 %v1137_v57, %v2644_v35  ;;  %v1183_v35 = vmul.f32 %v1117_v25, %v2676_v48 }
 0x9ac   :  { %2037 = vtanh.f32 %v1140_v63  ;;  %v1958_v56 = vmul.f32 -1.442695, %v1140_v63 }
 0x9ad   :  { %2039 = vpow2.f32 %v1956_v20 }
 0x9b2   :  { %v2038_v7 = vpop.eup %2037 }
 0x9b3   :  { %1166 = vrot.lane.b32.xlu2 %v2038_v7, %s2119_s18  ;;  %v2040_v24 = vpop.eup %2039 }
 0x9b4   :  { %v1055_v36 = vadd.f32 1.0, %v2040_v24 }
 0x9b6   :  { %2041 = vrcp.f32 %v1055_v36  ;;  %v1067_v10 = vand.u32 2147483648, %v1055_v36  ;;  %vm1061_vm0 = vweird.f32 %v1055_v36  ;;  %v1065_v32 = vand.u32 2147483647, %v1055_v36 }
 0x9b7   :  { %2043 = vpow2.f32 %v1958_v56 }
 0x9b8   :  { %v1068_v49 = vor.u32 1.1754944e-38, %v1067_v10  ;;  %vm1066_vm4 = vcmp.eq.f32.partialorder %v1065_v32, 8.507059e+37  ;;  %v654_v32 = vmul.f32 %v2681_v54, %v2661_v31 }
 0x9bb   :  { %925 = vrot.lane.b32.xlu2 %v923_v23, %s2121_s20 }
 0x9bc   :  { %v2042_v37 = vpop.eup %2041 }
 0x9bd   :  { %v1057_v40 = vmul.f32 %v2042_v37, %v1055_v36  ;;  %vm1062_vm15 = vweird.f32 %v2042_v37  ;;  %v2044_v60 = vpop.eup %2043 }
 0x9be   :  { %vm1063_vm3 = vmor %vm1061_vm0, %vm1062_vm15  ;;  %v1144_v61 = vadd.f32 1.0, %v2044_v60 }
 0x9bf   :  { %v1058_v9 = vsub.f32 1.0, %v1057_v40 }
 0x9c0   :  { %2045 = vrcp.f32 %v1144_v61  ;;  %v1156_v5 = vand.u32 2147483648, %v1144_v61  ;;  %vm1150_vm7 = vweird.f32 %v1144_v61  ;;  %v1154_v29 = vand.u32 2147483647, %v1144_v61 }
 0x9c1   :  { %v1059_v33 = vmul.f32 %v2042_v37, %v1058_v9 }
 0x9c2   :  { %v1157_v6 = vor.u32 1.1754944e-38, %v1156_v5  ;;  %vm1155_vm9 = vcmp.eq.f32.partialorder %v1154_v29, 8.507059e+37 }
 0x9c3   :  { %1094 = vrot.lane.b32.xlu2 %v1093_v30, %s2121_s20  ;;  %v1060_v34 = vadd.f32 %v2042_v37, %v1059_v33  ;;  %v837_v33 = vmul.f32 %v2736_v27, %v2661_v31 }
 0x9c5   :  { %v1064_v46 = vsel %vm1063_vm3, %v2042_v37, %v1060_v34 }
 0x9c6   :  { %v1069_v51 = vsel %vm1066_vm4, %v1068_v49, %v1064_v46  ;;  %v2046_v62 = vpop.eup %2045 }
 0x9c7   :  { %v1146_v0 = vmul.f32 %v2046_v62, %v1144_v61  ;;  %vm1151_vm6 = vweird.f32 %v2046_v62 }
 0x9c8   :  { %vm1152_vm8 = vmor %vm1150_vm7, %vm1151_vm6 }
 0x9c9   :  { %v1147_v2 = vsub.f32 1.0, %v1146_v0 }
 0x9cb   :  { %1185 = vrot.lane.b32.xlu2 %v1183_v35, %s2118_s17  ;;  %v1148_v1 = vmul.f32 %v2046_v62, %v1147_v2  ;;  %v1021_v35 = vmul.f32 %v2791_v18, %v2661_v31 }
 0x9cd   :  { %v1149_v4 = vadd.f32 %v2046_v62, %v1148_v1 }
 0x9cf   :  { %v1153_v44 = vsel %vm1152_vm8, %v2046_v62, %v1149_v4 }
 0x9d0   :  { %v1158_v12 = vsel %vm1155_vm9, %v1157_v6, %v1153_v44 }
 0x9d1   :  { %v1164_v52 = vmul.f32 %v1162_v50, %v1158_v12 }
 0x9df   :  { %v1078_v53 = vpop.permute.xlu0 %1077 }
 0x9e0   :  { %v1080_v58 = vmul.f32 %v1078_v53, %v1069_v51 }
 0x9e2   :  { %1082 = vrot.lane.b32.xlu1 %v1080_v58, %s2121_s20 }
 0xa0d   :  { %v1167_v8 = vpop.permute.xlu2 %1166 }
 0xa0e   :  { %v1169_v13 = vmul.f32 %v1167_v8, %v1158_v12 }
 0xa10   :  { %1171 = vrot.lane.b32.xlu0 %v1169_v13, %s2121_s20 }
 0xa15   :  { %v926_v14 = vpop.permute.xlu2 %925 }
 0xa16   :  { %v928_v11 = vadd.f32 %v926_v14, %v919_v15 }
 0xa18   :  { %v1073_v16 = vrot.slane %v928_v11, 6 }
 0xa1a   :  { %v1075_v17 = vmul.f32 %v1073_v16, %v1069_v51 }
 0xa1d   :  { %v1095_v7 = vpop.permute.xlu2 %1094 }
 0xa1e   :  { %v1097_v20 = vmul.f32 %v1095_v7, %v2663_v43 }
 0xa25   :  { %v1186_v30 = vpop.permute.xlu2 %1185 }
 0xa54   :  { %v1083_v19 = vpop.permute.xlu1 %1082 }
 0xa55   :  { %v2818_v47 = vadd.f32 %v1083_v19, %v1075_v17 }
 0xa57   :  { %2047 = vtanh.f32 %v2818_v47 }
 0xa5d   :  { %v2048_v25 = vpop.eup %2047 }
 0xa5e   :  { %1088 = vrot.lane.b32.xlu1 %v2048_v25, %s2119_s18 }
 0xa82   :  { %v1172_v57 = vpop.permute.xlu0 %1171 }
 0xa83   :  { %v2824_v59 = vadd.f32 %v1172_v57, %v1164_v52 }
 0xa85   :  { %2049 = vtanh.f32 %v2824_v59 }
 0xa8b   :  { %v2050_v63 = vpop.eup %2049 }
 0xa8c   :  { %1177 = vrot.lane.b32.xlu0 %v2050_v63, %s2119_s18 }
 0xa94   :  { %1099 = vrot.lane.b32.xlu0 %v1097_v20, %s2118_s17 }
 0xa9c   :  { %1190 = vrot.lane.b32.xlu0 %v1162_v50, %s2118_s17 }
 0xad0   :  { %v1089_v22 = vpop.permute.xlu1 %1088 }
 0xad1   :  { %v1091_v24 = vmul.f32 %v1089_v22, %v1069_v51 }
 0xad3   :  { %v1092_v9 = vmul.f32 %v1091_v24, %v2668_v45 }
 0xafe   :  { %v1178_v3 = vpop.permute.xlu0 %1177 }
 0xaff   :  { %v1180_v23 = vmul.f32 %v1178_v3, %v1158_v12 }
 0xb01   :  { %v1181_v36 = vmul.f32 %v1180_v23, %v2661_v31 }
 0xb03   :  { %v1188_v37 = vadd.f32 %v1186_v30, %v1181_v36 }
 0xb05   :  { %1287 = vrot.lane.b32.xlu1 %v1188_v37, %s2121_s20  ;;  %v1199_v40 = vmul.f32 %v1188_v37, %v2661_v31 }
 0xb06   :  { %v1100_v34 = vpop.permute.xlu0 %1099 }
 0xb07   :  { %v1102_v10 = vadd.f32 %v1100_v34, %v1092_v9  ;;  %v1914_v46 = vsel %vm1902_vm5, %v1199_v40, %v1021_v35  ;;  %v1103_v40 = vmul.f32 %v2818_v47, %v2668_v45 }
 0xb08   :  { %v1915_v49 = vsel %vm1904_vm14, %v1914_v46, %v837_v33  ;;  %v1189_v46 = vmul.f32 %v2824_v59, %v2661_v31 }
 0xb09   :  { %v1113_v18 = vmul.f32 %v1102_v10, %v2668_v45  ;;  %v1201_v51 = vrot.slane %v1102_v10, 6  ;;  %v2845_v53 = vsel %vm1906_vm10, %v1915_v49, %v654_v32 }
 0xb0b   :  { %1202 = vrot.lane.b32.xlu2 %v1201_v51, %s2121_s20  ;;  %v2850_v27 = vsel %vm1906_vm10, %v2785_v21, %v1113_v18  ;;  %v2863_v21 = vadd.f32 %v2750_v41, %v432_v39  ;;  %v1356_v39 = vrot.slane %v1188_v37, 2 }
 0xb0d   :  { %1104 = vrot.lane.b32.xlu1 %v1073_v16, %s2118_s17 }
 0xb0e   :  { %v1191_v56 = vpop.permute.xlu0 %1190 }
 0xb0f   :  { %v1193_v54 = vmul.f32 %v1191_v56, %v2676_v48 }
 0xb15   :  { %1195 = vrot.lane.b32.xlu1 %v1193_v54, %s2121_s20 }
 0xb65   :  { %v2855_v58 = vpop.permute.xlu2 %1202 }
 0xb66   :  { %1959 = vmatmul.msk.f32.vlgmr.msrb.gmra.mxu0 %vm411_vm1, %v2855_v58  ;;  %v1269_v59 = vmul.f32 %v2855_v58, %v2676_v48 }
 0xb77   :  { %v1288_v60 = vpop.permute.xlu1 %1287 }
 0xb78   :  { %1961 = vmatmul.msk.f32.vlgmr.msrb.gmra.mxu1 %vm411_vm1, %v1288_v60 }
 0xb7f   :  { %v1105_v29 = vpop.permute.xlu1 %1104 }
 0xb80   :  { %v1107_v38 = vmul.f32 %v1105_v29, %v2663_v43 }
 0xb87   :  { %v1196_v32 = vpop.permute.xlu1 %1195 }
 0xb88   :  { %v1198_v49 = vadd.f32 %v1196_v32, %v1189_v46 }
 0xb8a   :  { %v1336_v18 = vrot.slane %v1198_v49, 2 }
 0xbe3   :  { %v1223_v61 = vpop.f32.mrf.mxu0 }
 0xbe4   :  { %v1226_v62 = vadd.f32 %v1223_v61, %v2863_v21 }
 0xbe6   :  { %2051 = vtanh.f32 %v1226_v62  ;;  %v1960_v44 = vmul.f32 -1.442695, %v1226_v62 }
 0xbec   :  { %v2052_v0 = vpop.eup %2051 }
 0xbed   :  { %1252 = vrot.lane.b32.xlu0 %v2052_v0, %s2119_s18 }
 0xbf5   :  { %v1308_v2 = vpop.f32.mrf.mxu1 }
 0xbf6   :  { %v1312_v1 = vrot.slane %v1308_v2, 2 }
 0xbf8   :  { %v1314_v4 = vadd.f32 %v1312_v1, %v2640_v42 }
 0xbfa   :  { %2053 = vtanh.f32 %v1314_v4  ;;  %v1962_v41 = vmul.f32 -1.442695, %v1314_v4 }
 0xbfc   :  { %2055 = vpow2.f32 %v1962_v41 }
 0xbfd   :  { %2057 = vpow2.f32 %v1960_v44 }
 0xc00   :  { %v2054_v5 = vpop.eup %2053 }
 0xc01   :  { %1340 = vrot.lane.b32.xlu2 %v2054_v5, %s2119_s18 }
 0xc02   :  { %v2056_v6 = vpop.eup %2055 }
 0xc03   :  { %v1318_v8 = vadd.f32 1.0, %v2056_v6  ;;  %v2058_v12 = vpop.eup %2057 }
 0xc04   :  { %v1230_v13 = vadd.f32 1.0, %v2058_v12 }
 0xc05   :  { %2059 = vrcp.f32 %v1318_v8  ;;  %v1330_v26 = vand.u32 2147483648, %v1318_v8  ;;  %vm1324_vm12 = vweird.f32 %v1318_v8  ;;  %v1328_v50 = vand.u32 2147483647, %v1318_v8 }
 0xc06   :  { %2061 = vrcp.f32 %v1230_v13  ;;  %v1242_v7 = vand.u32 2147483648, %v1230_v13  ;;  %vm1236_vm3 = vweird.f32 %v1230_v13  ;;  %v1240_v20 = vand.u32 2147483647, %v1230_v13 }
 0xc07   :  { %v1331_v63 = vor.u32 1.1754944e-38, %v1330_v26  ;;  %vm1329_vm0 = vcmp.eq.f32.partialorder %v1328_v50, 8.507059e+37 }
 0xc08   :  { %v1243_v36 = vor.u32 1.1754944e-38, %v1242_v7  ;;  %vm1241_vm6 = vcmp.eq.f32.partialorder %v1240_v20, 8.507059e+37 }
 0xc09   :  { %1109 = vrot.lane.b32.xlu2 %v1107_v38, %s2121_s20 }
 0xc0b   :  { %v2060_v14 = vpop.eup %2059 }
 0xc0c   :  { %v1320_v15 = vmul.f32 %v2060_v14, %v1318_v8  ;;  %v2062_v11 = vpop.eup %2061  ;;  %vm1325_vm11 = vweird.f32 %v2060_v14 }
 0xc0d   :  { %v1232_v16 = vmul.f32 %v2062_v11, %v1230_v13  ;;  %vm1326_vm13 = vmor %vm1324_vm12, %vm1325_vm11  ;;  %vm1237_vm15 = vweird.f32 %v2062_v11 }
 0xc0e   :  { %v1321_v55 = vsub.f32 1.0, %v1320_v15  ;;  %vm1238_vm4 = vmor %vm1236_vm3, %vm1237_vm15 }
 0xc0f   :  { %v1233_v19 = vsub.f32 1.0, %v1232_v16 }
 0xc10   :  { %v1322_v17 = vmul.f32 %v2060_v14, %v1321_v55 }
 0xc11   :  { %1357 = vrot.lane.b32.xlu2 %v1356_v39, %s2121_s20  ;;  %v1234_v28 = vmul.f32 %v2062_v11, %v1233_v19 }
 0xc12   :  { %v1323_v25 = vadd.f32 %v2060_v14, %v1322_v17 }
 0xc13   :  { %v1235_v57 = vadd.f32 %v2062_v11, %v1234_v28 }
 0xc14   :  { %v1327_v52 = vsel %vm1326_vm13, %v2060_v14, %v1323_v25 }
 0xc15   :  { %v1332_v22 = vsel %vm1329_vm0, %v1331_v63, %v1327_v52  ;;  %v1239_v24 = vsel %vm1238_vm4, %v2062_v11, %v1235_v57 }
 0xc16   :  { %v1244_v30 = vsel %vm1241_vm6, %v1243_v36, %v1239_v24  ;;  %v1338_v56 = vmul.f32 %v1336_v18, %v1332_v22 }
 0xc5b   :  { %v1341_v3 = vpop.permute.xlu2 %1340 }
 0xc5c   :  { %v1343_v23 = vmul.f32 %v1341_v3, %v1332_v22 }
 0xc5e   :  { %1345 = vrot.lane.b32.xlu0 %v1343_v23, %s2121_s20 }
 0xc5f   :  { %v1253_v37 = vpop.permute.xlu0 %1252 }
 0xc60   :  { %v1255_v35 = vmul.f32 %v1253_v37, %v1244_v30 }
 0xc62   :  { %1257 = vrot.lane.b32.xlu1 %v1255_v35, %s2121_s20 }
 0xc63   :  { %v1110_v9 = vpop.permute.xlu2 %1109 }
 0xc64   :  { %v1112_v33 = vadd.f32 %v1110_v9, %v1103_v40 }
 0xc66   :  { %v1248_v51 = vrot.slane %v1112_v33, 6 }
 0xc68   :  { %v1250_v47 = vmul.f32 %v1248_v51, %v1244_v30 }
 0xc6b   :  { %v1358_v34 = vpop.permute.xlu2 %1357 }
 0xc6c   :  { %v1360_v10 = vmul.f32 %v1358_v34, %v2663_v43 }
 0xc6e   :  { %1362 = vrot.lane.b32.xlu2 %v1360_v10, %s2118_s17 }
 0xcc8   :  { %v1363_v29 = vpop.permute.xlu2 %1362 }
 0xcd0   :  { %v1346_v54 = vpop.permute.xlu0 %1345 }
 0xcd1   :  { %v2880_v60 = vadd.f32 %v1346_v54, %v1338_v56 }
 0xcd3   :  { %2063 = vtanh.f32 %v2880_v60 }
 0xcd4   :  { %v1258_v61 = vpop.permute.xlu1 %1257 }
 0xcd5   :  { %v2883_v62 = vadd.f32 %v1258_v61, %v1250_v47 }
 0xcd7   :  { %2065 = vtanh.f32 %v2883_v62 }
 0xcd9   :  { %v2064_v0 = vpop.eup %2063 }
 0xcda   :  { %1351 = vrot.lane.b32.xlu0 %v2064_v0, %s2119_s18 }
 0xcdd   :  { %v2066_v2 = vpop.eup %2065 }
 0xcde   :  { %1263 = vrot.lane.b32.xlu1 %v2066_v2, %s2119_s18 }
 0xce2   :  { %1271 = vrot.lane.b32.xlu0 %v1269_v59, %s2118_s17 }
 0xcea   :  { %1276 = vrot.lane.b32.xlu0 %v1248_v51, %s2118_s17 }
 0xd4c   :  { %v1352_v1 = vpop.permute.xlu0 %1351 }
 0xd4d   :  { %v1354_v4 = vmul.f32 %v1352_v1, %v1332_v22 }
 0xd4f   :  { %v1355_v5 = vmul.f32 %v1354_v4, %v2668_v45 }
 0xd50   :  { %v1264_v38 = vpop.permute.xlu1 %1263 }
 0xd51   :  { %v2893_v39 = vadd.f32 %v1363_v29, %v1355_v5  ;;  %v1266_v41 = vmul.f32 %v1264_v38, %v1244_v30  ;;  %v1366_v5 = vmul.f32 %v2880_v60, %v2668_v45 }
 0xd53   :  { %v1267_v44 = vmul.f32 %v1266_v41, %v2661_v31  ;;  %v1469_v6 = vrot.slane %v2893_v39, 6  ;;  %v1539_v41 = vrot.slane %v2893_v39, 2 }
 0xd54   :  { %v1272_v8 = vpop.permute.xlu0 %1271 }
 0xd55   :  { %v2897_v12 = vadd.f32 %v1272_v8, %v1267_v44  ;;  %1470 = vrot.lane.b32.xlu2 %v1469_v6, %s2121_s20 }
 0xd57   :  { %1378 = vrot.lane.b32.xlu1 %v2897_v12, %s2121_s20  ;;  %v1447_v57 = vrot.slane %v2897_v12, 6 }
 0xd5c   :  { %v1277_v58 = vpop.permute.xlu0 %1276 }
 0xd5d   :  { %v1279_v13 = vmul.f32 %v1277_v58, %v2676_v48  ;;  %v1275_v58 = vmul.f32 %v2883_v62, %v2661_v31 }
 0xd5f   :  { %1367 = vrot.lane.b32.xlu1 %v1336_v18, %s2118_s17 }
 0xd67   :  { %1281 = vrot.lane.b32.xlu1 %v1279_v13, %s2121_s20 }
 0xdaf   :  { %v1471_v14 = vpop.permute.xlu2 %1470 }
 0xdb0   :  { %1965 = vmatmul.msk.f32.vlgmr.msra.gmra.mxu3 %vm411_vm1, %v1471_v14 }
 0xdc9   :  { %v1379_v15 = vpop.permute.xlu1 %1378 }
 0xdca   :  { %1963 = vmatmul.msk.f32.vlgmr.msra.gmra.mxu2 %vm411_vm1, %v1379_v15 }
 0xdd1   :  { %v1368_v50 = vpop.permute.xlu1 %1367 }
 0xdd2   :  { %v1370_v52 = vmul.f32 %v1368_v50, %v2663_v43 }
 0xdd9   :  { %v1282_v8 = vpop.permute.xlu1 %1281 }
 0xdda   :  { %v1284_v13 = vadd.f32 %v1282_v8, %v1275_v58 }
 0xddc   :  { %v1427_v15 = vrot.slane %v1284_v13, 6 }
 0xe33   :  { %v1491_v11 = vpop.f32.mrf.mxu3 }
 0xe34   :  { %v1495_v55 = vrot.slane %v1491_v11, 4 }
 0xe36   :  { %v1497_v16 = vadd.f32 %v1495_v55, %v2640_v42 }
 0xe38   :  { %2067 = vtanh.f32 %v1497_v16  ;;  %v1966_v63 = vmul.f32 -1.442695, %v1497_v16 }
 0xe3e   :  { %v2068_v17 = vpop.eup %2067 }
 0xe3f   :  { %1523 = vrot.lane.b32.xlu0 %v2068_v17, %s2119_s18 }
 0xe4d   :  { %v1399_v19 = vpop.f32.mrf.mxu2 }
 0xe4e   :  { %v1403_v25 = vrot.slane %v1399_v19, 6 }
 0xe50   :  { %v1405_v28 = vadd.f32 %v1403_v25, %v2863_v21 }
 0xe52   :  { %2069 = vtanh.f32 %v1405_v28  ;;  %v1964_v7 = vmul.f32 -1.442695, %v1405_v28 }
 0xe53   :  { %2071 = vpow2.f32 %v1966_v63 }
 0xe54   :  { %2073 = vpow2.f32 %v1964_v7 }
 0xe58   :  { %v2070_v26 = vpop.eup %2069 }
 0xe59   :  { %1431 = vrot.lane.b32.xlu2 %v2070_v26, %s2119_s18  ;;  %v2072_v20 = vpop.eup %2071 }
 0xe5a   :  { %v2074_v22 = vpop.eup %2073  ;;  %v1501_v3 = vadd.f32 1.0, %v2072_v20 }
 0xe5b   :  { %v1409_v23 = vadd.f32 1.0, %v2074_v22 }
 0xe5c   :  { %2075 = vrcp.f32 %v1501_v3  ;;  %v1513_v10 = vand.u32 2147483648, %v1501_v3  ;;  %vm1507_vm8 = vweird.f32 %v1501_v3  ;;  %v1511_v32 = vand.u32 2147483647, %v1501_v3 }
 0xe5d   :  { %2077 = vrcp.f32 %v1409_v23  ;;  %v1421_v49 = vand.u32 2147483648, %v1409_v23  ;;  %vm1415_vm12 = vweird.f32 %v1409_v23  ;;  %v1419_v51 = vand.u32 2147483647, %v1409_v23 }
 0xe5e   :  { %v1514_v56 = vor.u32 1.1754944e-38, %v1513_v10  ;;  %vm1512_vm15 = vcmp.eq.f32.partialorder %v1511_v32, 8.507059e+37 }
 0xe5f   :  { %v1422_v0 = vor.u32 1.1754944e-38, %v1421_v49  ;;  %vm1420_vm0 = vcmp.eq.f32.partialorder %v1419_v51, 8.507059e+37 }
 0xe61   :  { %1372 = vrot.lane.b32.xlu2 %v1370_v52, %s2121_s20 }
 0xe62   :  { %v2076_v24 = vpop.eup %2075 }
 0xe63   :  { %v2078_v36 = vpop.eup %2077  ;;  %v1503_v30 = vmul.f32 %v2076_v24, %v1501_v3  ;;  %vm1508_vm7 = vweird.f32 %v2076_v24  ;;  %v1285_v3 = vmul.f32 %v2897_v12, %v2661_v31 }
 0xe64   :  { %v1411_v37 = vmul.f32 %v2078_v36, %v1409_v23  ;;  %vm1416_vm9 = vweird.f32 %v2078_v36  ;;  %vm1509_vm11 = vmor %vm1507_vm8, %vm1508_vm7 }
 0xe65   :  { %v1504_v35 = vsub.f32 1.0, %v1503_v30  ;;  %vm1417_vm13 = vmor %vm1415_vm12, %vm1416_vm9 }
 0xe66   :  { %v1412_v40 = vsub.f32 1.0, %v1411_v37 }
 0xe67   :  { %v1505_v9 = vmul.f32 %v2076_v24, %v1504_v35 }
 0xe68   :  { %v1413_v33 = vmul.f32 %v2078_v36, %v1412_v40 }
 0xe69   :  { %1448 = vrot.lane.b32.xlu2 %v1447_v57, %s2121_s20  ;;  %v1506_v34 = vadd.f32 %v2076_v24, %v1505_v9 }
 0xe6a   :  { %v1414_v46 = vadd.f32 %v2078_v36, %v1413_v33 }
 0xe6b   :  { %v1510_v18 = vsel %vm1509_vm11, %v2076_v24, %v1506_v34 }
 0xe6c   :  { %v1418_v54 = vsel %vm1417_vm13, %v2078_v36, %v1414_v46  ;;  %v1515_v47 = vsel %vm1512_vm15, %v1514_v56, %v1510_v18 }
 0xe6d   :  { %v1423_v1 = vsel %vm1420_vm0, %v1422_v0, %v1418_v54 }
 0xe6e   :  { %v1429_v16 = vmul.f32 %v1427_v15, %v1423_v1 }
 0xeb1   :  { %v1524_v61 = vpop.permute.xlu0 %1523 }
 0xeb2   :  { %v1526_v2 = vmul.f32 %v1524_v61, %v1515_v47 }
 0xeb3   :  { %v1432_v59 = vpop.permute.xlu2 %1431 }
 0xeb4   :  { %v1434_v4 = vmul.f32 %v1432_v59, %v1423_v1  ;;  %1528 = vrot.lane.b32.xlu1 %v1526_v2, %s2121_s20 }
 0xeb6   :  { %1436 = vrot.lane.b32.xlu0 %v1434_v4, %s2121_s20 }
 0xebb   :  { %v1373_v29 = vpop.permute.xlu2 %1372 }
 0xebc   :  { %v1375_v38 = vadd.f32 %v1373_v29, %v1366_v5 }
 0xebe   :  { %1540 = vrot.lane.b32.xlu0 %v1539_v41, %s2121_s20  ;;  %v1519_v14 = vrot.slane %v1375_v38, 2 }
 0xec0   :  { %v1521_v11 = vmul.f32 %v1519_v14, %v1515_v47 }
 0xec3   :  { %v1449_v44 = vpop.permute.xlu2 %1448 }
 0xec4   :  { %v1451_v6 = vmul.f32 %v1449_v44, %v2676_v48 }
 0xec6   :  { %1453 = vrot.lane.b32.xlu0 %v1451_v6, %s2118_s17 }
 0xf26   :  { %v1529_v60 = vpop.permute.xlu1 %1528 }
 0xf27   :  { %v2925_v55 = vadd.f32 %v1529_v60, %v1521_v11 }
 0xf28   :  { %v1437_v17 = vpop.permute.xlu0 %1436 }
 0xf29   :  { %2079 = vtanh.f32 %v2925_v55  ;;  %v2928_v19 = vadd.f32 %v1437_v17, %v1429_v16 }
 0xf2b   :  { %2081 = vtanh.f32 %v2928_v19 }
 0xf2f   :  { %v2080_v25 = vpop.eup %2079 }
 0xf30   :  { %1534 = vrot.lane.b32.xlu2 %v2080_v25, %s2119_s18  ;;  %v1541_v62 = vpop.permute.xlu0 %1540  ;;  %v1549_v25 = vmul.f32 %v2925_v55, %v2668_v45 }
 0xf31   :  { %v2082_v28 = vpop.eup %2081  ;;  %v1543_v26 = vmul.f32 %v1541_v62, %v2663_v43 }
 0xf32   :  { %1442 = vrot.lane.b32.xlu1 %v2082_v28, %s2119_s18 }
 0xf38   :  { %v1454_v20 = vpop.permute.xlu0 %1453 }
 0xf3a   :  { %1545 = vrot.lane.b32.xlu1 %v1543_v26, %s2118_s17 }
 0xf42   :  { %1458 = vrot.lane.b32.xlu1 %v1427_v15, %s2118_s17 }
 0xf8a   :  { %v1535_v50 = vpop.permute.xlu2 %1534 }
 0xf8b   :  { %v1537_v63 = vmul.f32 %v1535_v50, %v1515_v47 }
 0xf8d   :  { %v1538_v24 = vmul.f32 %v1537_v63, %v2668_v45 }
 0xfa4   :  { %v1443_v52 = vpop.permute.xlu1 %1442 }
 0xfa5   :  { %v1445_v57 = vmul.f32 %v1443_v52, %v1423_v1 }
 0xfa7   :  { %v1446_v7 = vmul.f32 %v1445_v57, %v2661_v31 }
 0xfa9   :  { %v1456_v22 = vadd.f32 %v1454_v20, %v1446_v7 }
 0xfab   :  { %v1467_v23 = vmul.f32 %v1456_v22, %v2661_v31  ;;  %v1561_v36 = vrot.slane %v1456_v22, 2  ;;  %v1631_v56 = vrot.slane %v1456_v22, 6 }
 0xfac   :  { %v1546_v30 = vpop.permute.xlu1 %1545 }
 0xfad   :  { %v2941_v37 = vadd.f32 %v1546_v30, %v1538_v24  ;;  %1562 = vrot.lane.b32.xlu2 %v1561_v36, %s2121_s20  ;;  %v2945_v35 = vsel %vm1902_vm5, %v1285_v3, %v1467_v23 }
 0xfaf   :  { %v1653_v40 = vrot.slane %v2941_v37, 4  ;;  %v1723_v26 = vrot.slane %v2941_v37, 2 }
 0xfb1   :  { %1654 = vrot.lane.b32.xlu0 %v1653_v40, %s2121_s20 }
 0xfb4   :  { %v1459_v12 = vpop.permute.xlu1 %1458 }
 0xfb5   :  { %1550 = vrot.lane.b32.xlu2 %v1519_v14, %s2118_s17  ;;  %v1461_v9 = vmul.f32 %v1459_v12, %v2676_v48  ;;  %v1457_v12 = vmul.f32 %v2928_v19, %v2661_v31 }
 0xfbd   :  { %1463 = vrot.lane.b32.xlu2 %v1461_v9, %s2121_s20 }
0x1007   :  { %v1563_v33 = vpop.permute.xlu2 %1562 }
0x1008   :  { %1967 = vmatmul.msk.f32.vlgmr.msra.gmra.mxu0 %vm411_vm1, %v1563_v33 }
0x100f   :  { %v1551_v18 = vpop.permute.xlu2 %1550 }
0x1010   :  { %v1553_v51 = vmul.f32 %v1551_v18, %v2663_v43 }
0x1017   :  { %v1464_v40 = vpop.permute.xlu2 %1463 }
0x1018   :  { %v1466_v9 = vadd.f32 %v1464_v40, %v1457_v12 }
0x101a   :  { %v1611_v33 = vrot.slane %v1466_v9, 6 }
0x1023   :  { %v1655_v34 = vpop.permute.xlu0 %1654 }
0x1024   :  { %1969 = vmatmul.msk.f32.vlgmr.msra.gmra.mxu1 %vm411_vm1, %v1655_v34 }
0x1085   :  { %v1583_v10 = vpop.f32.mrf.mxu0 }
0x1086   :  { %v1587_v32 = vrot.slane %v1583_v10, 4 }
0x1088   :  { %v1589_v46 = vadd.f32 %v1587_v32, %v2863_v21 }
0x108a   :  { %2083 = vtanh.f32 %v1589_v46  ;;  %v1968_v2 = vmul.f32 -1.442695, %v1589_v46 }
0x1090   :  { %v2084_v49 = vpop.eup %2083 }
0x1091   :  { %1615 = vrot.lane.b32.xlu0 %v2084_v49, %s2119_s18 }
0x1099   :  { %1555 = vrot.lane.b32.xlu0 %v1553_v51, %s2121_s20 }
0x10a1   :  { %1632 = vrot.lane.b32.xlu0 %v1631_v56, %s2121_s20  ;;  %v1675_v54 = vpop.f32.mrf.mxu1 }
0x10a2   :  { %v1679_v47 = vrot.slane %v1675_v54, 6 }
0x10a4   :  { %v1681_v61 = vadd.f32 %v1679_v47, %v2640_v42 }
0x10a6   :  { %2085 = vtanh.f32 %v1681_v61  ;;  %v1970_v29 = vmul.f32 -1.442695, %v1681_v61 }
0x10a7   :  { %2087 = vpow2.f32 %v1968_v2 }
0x10ac   :  { %v2086_v0 = vpop.eup %2085 }
0x10ad   :  { %1707 = vrot.lane.b32.xlu1 %v2086_v0, %s2119_s18  ;;  %v2088_v59 = vpop.eup %2087 }
0x10ae   :  { %v1593_v1 = vadd.f32 1.0, %v2088_v59 }
0x10b0   :  { %2089 = vrcp.f32 %v1593_v1  ;;  %v1605_v8 = vand.u32 2147483648, %v1593_v1  ;;  %vm1599_vm4 = vweird.f32 %v1593_v1  ;;  %v1603_v58 = vand.u32 2147483647, %v1593_v1 }
0x10b1   :  { %2091 = vpow2.f32 %v1970_v29 }
0x10b2   :  { %v1606_v15 = vor.u32 1.1754944e-38, %v1605_v8  ;;  %vm1604_vm7 = vcmp.eq.f32.partialorder %v1603_v58, 8.507059e+37 }
0x10b6   :  { %v2090_v4 = vpop.eup %2089 }
0x10b7   :  { %v1595_v5 = vmul.f32 %v2090_v4, %v1593_v1  ;;  %v2092_v44 = vpop.eup %2091  ;;  %vm1600_vm3 = vweird.f32 %v2090_v4 }
0x10b8   :  { %v1685_v13 = vadd.f32 1.0, %v2092_v44  ;;  %vm1601_vm6 = vmor %vm1599_vm4, %vm1600_vm3 }
0x10b9   :  { %v1596_v38 = vsub.f32 1.0, %v1595_v5 }
0x10ba   :  { %2093 = vrcp.f32 %v1685_v13  ;;  %v1697_v22 = vand.u32 2147483648, %v1685_v13  ;;  %vm1691_vm9 = vweird.f32 %v1685_v13  ;;  %v1695_v3 = vand.u32 2147483647, %v1685_v13 }
0x10bb   :  { %v1597_v41 = vmul.f32 %v2090_v4, %v1596_v38 }
0x10bc   :  { %v1698_v23 = vor.u32 1.1754944e-38, %v1697_v22  ;;  %vm1696_vm12 = vcmp.eq.f32.partialorder %v1695_v3, 8.507059e+37 }
0x10bd   :  { %v1598_v6 = vadd.f32 %v2090_v4, %v1597_v41 }
0x10bf   :  { %v1602_v14 = vsel %vm1601_vm6, %v2090_v4, %v1598_v6 }
0x10c0   :  { %v1607_v11 = vsel %vm1604_vm7, %v1606_v15, %v1602_v14  ;;  %v2094_v17 = vpop.eup %2093 }
0x10c1   :  { %v1687_v50 = vmul.f32 %v2094_v17, %v1685_v13  ;;  %vm1692_vm8 = vweird.f32 %v2094_v17  ;;  %v1613_v10 = vmul.f32 %v1611_v33, %v1607_v11 }
0x10c2   :  { %vm1693_vm11 = vmor %vm1691_vm9, %vm1692_vm8 }
0x10c3   :  { %v1688_v52 = vsub.f32 1.0, %v1687_v50 }
0x10c5   :  { %v1689_v7 = vmul.f32 %v2094_v17, %v1688_v52 }
0x10c7   :  { %v1690_v20 = vadd.f32 %v2094_v17, %v1689_v7 }
0x10c9   :  { %v1694_v55 = vsel %vm1693_vm11, %v2094_v17, %v1690_v20 }
0x10ca   :  { %v1699_v36 = vsel %vm1696_vm12, %v1698_v23, %v1694_v55 }
0x1103   :  { %v1616_v60 = vpop.permute.xlu0 %1615 }
0x1104   :  { %v1618_v16 = vmul.f32 %v1616_v60, %v1607_v11 }
0x1106   :  { %1620 = vrot.lane.b32.xlu1 %v1618_v16, %s2121_s20 }
0x110b   :  { %v1556_v28 = vpop.permute.xlu0 %1555 }
0x110c   :  { %v1558_v62 = vadd.f32 %v1556_v28, %v1549_v25 }
0x110e   :  { %1724 = vrot.lane.b32.xlu1 %v1723_v26, %s2121_s20  ;;  %v1703_v34 = vrot.slane %v1558_v62, 2 }
0x1110   :  { %v1705_v49 = vmul.f32 %v1703_v34, %v1699_v36 }
0x1113   :  { %v1633_v57 = vpop.permute.xlu0 %1632 }
0x1114   :  { %v1635_v63 = vmul.f32 %v1633_v57, %v2676_v48 }
0x1116   :  { %1637 = vrot.lane.b32.xlu1 %v1635_v63, %s2118_s17 }
0x111f   :  { %v1708_v24 = vpop.permute.xlu1 %1707 }
0x1120   :  { %v1710_v30 = vmul.f32 %v1708_v24, %v1699_v36 }
0x1122   :  { %1712 = vrot.lane.b32.xlu2 %v1710_v30, %s2121_s20 }
0x1178   :  { %v1621_v32 = vpop.permute.xlu1 %1620 }
0x1179   :  { %v2971_v46 = vadd.f32 %v1621_v32, %v1613_v10 }
0x117b   :  { %2095 = vtanh.f32 %v2971_v46 }
0x117c   :  { %v1713_v18 = vpop.permute.xlu2 %1712 }
0x117d   :  { %v2974_v51 = vadd.f32 %v1713_v18, %v1705_v49 }
0x117f   :  { %2097 = vtanh.f32 %v2974_v51 }
0x1180   :  { %v1725_v19 = vpop.permute.xlu1 %1724 }
0x1181   :  { %v2096_v56 = vpop.eup %2095  ;;  %v1727_v47 = vmul.f32 %v1725_v19, %v2663_v43 }
0x1182   :  { %1626 = vrot.lane.b32.xlu2 %v2096_v56, %s2119_s18 }
0x1185   :  { %v2098_v54 = vpop.eup %2097 }
0x1186   :  { %1718 = vrot.lane.b32.xlu0 %v2098_v54, %s2119_s18 }
0x1188   :  { %v1638_v59 = vpop.permute.xlu1 %1637 }
0x118a   :  { %1729 = vrot.lane.b32.xlu2 %v1727_v47, %s2118_s17 }
0x1192   :  { %1734 = vrot.lane.b32.xlu2 %v1703_v34, %s2118_s17 }
0x11dc   :  { %v1627_v61 = vpop.permute.xlu2 %1626 }
0x11dd   :  { %v1629_v0 = vmul.f32 %v1627_v61, %v1607_v11 }
0x11df   :  { %v1630_v2 = vmul.f32 %v1629_v0, %v2661_v31 }
0x11e1   :  { %v1640_v1 = vadd.f32 %v1638_v59, %v1630_v2 }
0x11e3   :  { %v1651_v4 = vmul.f32 %v1640_v1, %v2661_v31  ;;  %v1745_v5 = vrot.slane %v1640_v1, 4  ;;  %v1815_v52 = vrot.slane %v1640_v1, 6 }
0x11e4   :  { %v1730_v38 = vpop.permute.xlu2 %1729 }
0x11e5   :  { %1746 = vrot.lane.b32.xlu0 %v1745_v5, %s2121_s20  ;;  %v2987_v29 = vsel %vm1904_vm14, %v2945_v35, %v1651_v4  ;;  %v1641_v4 = vmul.f32 %v2971_v46, %v2661_v31 }
0x11ec   :  { %v1735_v41 = vpop.permute.xlu2 %1734 }
0x11ed   :  { %1642 = vrot.lane.b32.xlu0 %v1611_v33, %s2118_s17  ;;  %v1737_v44 = vmul.f32 %v1735_v41, %v2663_v43 }
0x11f5   :  { %1739 = vrot.lane.b32.xlu0 %v1737_v44, %s2121_s20 }
0x11f8   :  { %v1719_v6 = vpop.permute.xlu0 %1718 }
0x11f9   :  { %v1721_v8 = vmul.f32 %v1719_v6, %v1699_v36 }
0x11fb   :  { %v1722_v58 = vmul.f32 %v1721_v8, %v2668_v45 }
0x11fd   :  { %v2993_v13 = vadd.f32 %v1730_v38, %v1722_v58 }
0x11ff   :  { %v1827_v14 = vrot.slane %v2993_v13, 2 }
0x1201   :  { %1828 = vrot.lane.b32.xlu1 %v1827_v14, %s2121_s20  ;;  %v1733_v14 = vmul.f32 %v2974_v51, %v2668_v45 }
0x1257   :  { %v1747_v35 = vpop.permute.xlu0 %1746 }
0x1258   :  { %1971 = vmatmul.msk.f32.vlgmr.msrb.gmra.mxu2 %vm411_vm1, %v1747_v35 }
0x125f   :  { %v1643_v26 = vpop.permute.xlu0 %1642 }
0x1260   :  { %v1645_v50 = vmul.f32 %v1643_v26, %v2676_v48 }
0x1267   :  { %v1740_v38 = vpop.permute.xlu0 %1739 }
0x1268   :  { %v1742_v35 = vadd.f32 %v1740_v38, %v1733_v14 }
0x1273   :  { %v1829_v15 = vpop.permute.xlu1 %1828 }
0x1274   :  { %1973 = vmatmul.msk.f32.vlgmr.msrb.gmra.mxu3 %vm411_vm1, %v1829_v15  ;;  %v1895_v57 = vmul.f32 %v1829_v15, %v2663_v43  ;;  %v1874_v15 = vrot.slane %v1742_v35, 2 }
0x12db   :  { %v1767_v11 = vpop.f32.mrf.mxu2 }
0x12dc   :  { %v1771_v60 = vrot.slane %v1767_v11, 2 }
0x12de   :  { %v1773_v16 = vadd.f32 %v1771_v60, %v2863_v21 }
0x12e0   :  { %2099 = vtanh.f32 %v1773_v16  ;;  %v1972_v21 = vmul.f32 -1.442695, %v1773_v16 }
0x12e6   :  { %v2100_v17 = vpop.eup %2099 }
0x12e7   :  { %1799 = vrot.lane.b32.xlu2 %v2100_v17, %s2119_s18 }
0x12f7   :  { %v1849_v25 = vpop.f32.mrf.mxu3 }
0x12f8   :  { %v1852_v28 = vadd.f32 %v1849_v25, %v2640_v42 }
0x12fa   :  { %2101 = vtanh.f32 %v1852_v28  ;;  %v1974_v9 = vmul.f32 -1.442695, %v1852_v28 }
0x12fb   :  { %2103 = vpow2.f32 %v1972_v21 }
0x1300   :  { %v2102_v62 = vpop.eup %2101 }
0x1301   :  { %1878 = vrot.lane.b32.xlu1 %v2102_v62, %s2119_s18  ;;  %v2104_v63 = vpop.eup %2103 }
0x1302   :  { %v1777_v42 = vadd.f32 1.0, %v2104_v63 }
0x1304   :  { %2105 = vrcp.f32 %v1777_v42  ;;  %v1789_v23 = vand.u32 2147483648, %v1777_v42  ;;  %vm1783_vm15 = vweird.f32 %v1777_v42  ;;  %v1787_v24 = vand.u32 2147483647, %v1777_v42 }
0x1305   :  { %2107 = vpow2.f32 %v1974_v9 }
0x1306   :  { %v1790_v30 = vor.u32 1.1754944e-38, %v1789_v23  ;;  %vm1788_vm3 = vcmp.eq.f32.partialorder %v1787_v24, 8.507059e+37 }
0x1309   :  { %1647 = vrot.lane.b32.xlu1 %v1645_v50, %s2121_s20 }
0x130a   :  { %v2106_v7 = vpop.eup %2105 }
0x130b   :  { %v1779_v20 = vmul.f32 %v2106_v7, %v1777_v42  ;;  %vm1784_vm13 = vweird.f32 %v2106_v7  ;;  %v2108_v33 = vpop.eup %2107 }
0x130c   :  { %vm1785_vm0 = vmor %vm1783_vm15, %vm1784_vm13  ;;  %v1856_v34 = vadd.f32 1.0, %v2108_v33 }
0x130d   :  { %v1780_v22 = vsub.f32 1.0, %v1779_v20 }
0x130e   :  { %2109 = vrcp.f32 %v1856_v34  ;;  %v1868_v54 = vand.u32 2147483648, %v1856_v34  ;;  %vm1862_vm6 = vweird.f32 %v1856_v34  ;;  %v1866_v19 = vand.u32 2147483647, %v1856_v34 }
0x130f   :  { %v1781_v3 = vmul.f32 %v2106_v7, %v1780_v22 }
0x1310   :  { %v1869_v61 = vor.u32 1.1754944e-38, %v1868_v54  ;;  %vm1867_vm8 = vcmp.eq.f32.partialorder %v1866_v19, 8.507059e+37 }
0x1311   :  { %1816 = vrot.lane.b32.xlu1 %v1815_v52, %s2121_s20  ;;  %v1782_v55 = vadd.f32 %v2106_v7, %v1781_v3 }
0x1313   :  { %v1786_v36 = vsel %vm1785_vm0, %v2106_v7, %v1782_v55  ;;  %v1376_v7 = vmul.f32 %v2893_v39, %v2668_v45 }
0x1314   :  { %v1791_v40 = vsel %vm1788_vm3, %v1790_v30, %v1786_v36  ;;  %v2110_v10 = vpop.eup %2109 }
0x1315   :  { %v1858_v32 = vmul.f32 %v2110_v10, %v1856_v34  ;;  %vm1863_vm4 = vweird.f32 %v2110_v10 }
0x1316   :  { %vm1864_vm7 = vmor %vm1862_vm6, %vm1863_vm4 }
0x1317   :  { %v1859_v49 = vsub.f32 1.0, %v1858_v32 }
0x1319   :  { %1897 = vrot.lane.b32.xlu1 %v1895_v57, %s2118_s17  ;;  %v1860_v18 = vmul.f32 %v2110_v10, %v1859_v49 }
0x131b   :  { %v1861_v56 = vadd.f32 %v2110_v10, %v1860_v18 }
0x131d   :  { %v1865_v47 = vsel %vm1864_vm7, %v2110_v10, %v1861_v56 }
0x131e   :  { %v1870_v2 = vsel %vm1867_vm8, %v1869_v61, %v1865_v47 }
0x131f   :  { %v1876_v11 = vmul.f32 %v1874_v15, %v1870_v2 }
0x1341   :  { %v1800_v43 = vpop.permute.xlu2 %1799 }
0x1342   :  { %v1802_v12 = vmul.f32 %v1800_v43, %v1791_v40 }
0x1344   :  { %1804 = vrot.lane.b32.xlu0 %v1802_v12, %s2121_s20 }
0x1373   :  { %v1879_v0 = vpop.permute.xlu1 %1878 }
0x1374   :  { %v1881_v59 = vmul.f32 %v1879_v0, %v1870_v2 }
0x1376   :  { %1883 = vrot.lane.b32.xlu2 %v1881_v59, %s2121_s20 }
0x137b   :  { %v1648_v1 = vpop.permute.xlu1 %1647 }
0x137c   :  { %v1650_v5 = vadd.f32 %v1648_v1, %v1641_v4 }
0x137e   :  { %v1795_v41 = vrot.slane %v1650_v5, 6 }
0x1380   :  { %v1797_v44 = vmul.f32 %v1795_v41, %v1791_v40 }
0x1383   :  { %v1817_v17 = vpop.permute.xlu1 %1816 }
0x1384   :  { %v1819_v25 = vmul.f32 %v1817_v17, %v2676_v48  ;;  %v1559_v48 = vmul.f32 %v2941_v37, %v2668_v45 }
0x138b   :  { %v1898_v50 = vpop.permute.xlu1 %1897 }
0x13b6   :  { %v1805_v6 = vpop.permute.xlu0 %1804 }
0x13b7   :  { %v1807_v8 = vadd.f32 %v1805_v6, %v1797_v44 }
0x13b9   :  { %2111 = vtanh.f32 %v1807_v8 }
0x13bf   :  { %v2112_v58 = vpop.eup %2111 }
0x13c0   :  { %1810 = vrot.lane.b32.xlu0 %v2112_v58, %s2119_s18 }
0x13c8   :  { %1919 = vrot.lane.b32.xlu0 %v2850_v27, %s2121_s20 }
0x13d0   :  { %v1884_v46 = vpop.permute.xlu2 %1883  ;;  %1929 = vrot.lane.b32.xlu0 %v2845_v53, %s2119_s18  ;;  %v1743_v53 = vmul.f32 %v2993_v13, %v2668_v45 }
0x13d1   :  { %v1886_v60 = vadd.f32 %v1884_v46, %v1876_v11 }
0x13d3   :  { %2113 = vtanh.f32 %v1886_v60 }
0x13d9   :  { %v2114_v16 = vpop.eup %2113 }
0x13da   :  { %1889 = vrot.lane.b32.xlu2 %v2114_v16, %s2119_s18 }
0x13e2   :  { %1821 = vrot.lane.b32.xlu2 %v1819_v25, %s2118_s17 }
0x1432   :  { %v1811_v51 = vpop.permute.xlu0 %1810 }
0x1433   :  { %v1813_v62 = vmul.f32 %v1811_v51, %v1791_v40 }
0x1434   :  { %v1890_v28 = vpop.permute.xlu2 %1889 }
0x1435   :  { %v1892_v27 = vmul.f32 %v1890_v28, %v1870_v2  ;;  %v1814_v57 = vmul.f32 %v1813_v62, %v2661_v31 }
0x1437   :  { %v1893_v26 = vmul.f32 %v1892_v27, %v2668_v45 }
0x1439   :  { %v1900_v52 = vadd.f32 %v1898_v50, %v1893_v26 }
0x143a   :  { %v1920_v37 = vpop.permute.xlu0 %1919 }
0x143b   :  { %v1901_v21 = vmul.f32 %v1900_v52, %v2668_v45 }
0x143c   :  { %v1822_v63 = vpop.permute.xlu2 %1821 }
0x143d   :  { %v1824_v42 = vadd.f32 %v1822_v63, %v1814_v57  ;;  %v1911_v20 = vsel %vm1902_vm5, %v1901_v21, %v1743_v53 }
0x143e   :  { %v1912_v22 = vsel %vm1904_vm14, %v1911_v20, %v1559_v48 }
0x143f   :  { %v1825_v3 = vmul.f32 %v1824_v42, %v2661_v31  ;;  %v1913_v13 = vsel %vm1906_vm10, %v1912_v22, %v1376_v7 }
0x1440   :  { %1927 = vrot.lane.b32.xlu2 %v1913_v13, %s2119_s18 }
0x1441   :  { %v1910_v55 = vsel %vm1906_vm10, %v2987_v29, %v1825_v3 }
0x1442   :  { %1921 = vrot.lane.b32.xlu1 %v1910_v55, %s2121_s20  ;;  %v1930_v45 = vpop.permute.xlu0 %1929 }
0x149a   :  { %v1928_v23 = vpop.permute.xlu2 %1927 }
0x149b   :  { %v1933_v24 = vsel %vm411_vm1, %v1920_v37, %v1928_v23 }
0x149c   :  { %1935 = vst.msk [vmem:[%s3058_s9] sm:$0xff] %vm436_vm2, %v1933_v24 }
0x14b4   :  { %v1922_v31 = vpop.permute.xlu1 %1921 }
0x14b5   :  { %v1934_v39 = vsel %vm411_vm1, %v1922_v31, %v1930_v45 }
0x14b6   :  { %1936 = vst.msk [vmem:[%s3058_s9 + $0x8] sm:$0xff] %vm436_vm2, %v1934_v39 }

</bundles_post_ra>
